<compile_context>
chip_gen: v7x
topology: tpu7x:2x2x1
jax: 0.10.0
libtpu: 0.0.40
codegen_flags: <defaults>
</compile_context>

<pallas_src>
import jax
import jax.numpy as jnp
from jax import lax
from jax.experimental import pallas as pl
from jax.experimental.pallas import tpu as pltpu

_LN_EPS = 1e-5


# ----------------------------------------------------------------------------
# In-kernel math helpers
# ----------------------------------------------------------------------------
def _gelu(x):
    c = 0.7978845608028654  # sqrt(2/pi)
    return 0.5 * x * (1.0 + jnp.tanh(c * (x + 0.044715 * x * x * x)))


def _layernorm(x, g, b):
    mu = jnp.mean(x, axis=-1, keepdims=True)
    xc = x - mu
    var = jnp.mean(xc * xc, axis=-1, keepdims=True)
    return xc * lax.rsqrt(var + _LN_EPS) * g + b


# ----------------------------------------------------------------------------
# Whole-forward fused kernel (one grid step == one batch element)
# ----------------------------------------------------------------------------
def _make_lrtas_kernel(T, J, D, half, n_pad, n_spatial, n_temporal):
    n2 = 2 * n_pad

    def kernel(*refs):
        x_ref, o_ref = refs[0], refs[-1]
        it = iter(refs[1:-1])

        def nxt():
            return next(it)

        # ---------------- embed ----------------
        w_e = nxt()[...]
        b_e = nxt()[...]
        x = x_ref[0]                                           # (J*T, F) j-major
        h = jnp.dot(x, w_e, preferred_element_type=jnp.float32) + b_e   # (J*T, D)

        # ---------------- spatial SGU stack ----------------
        for _ in range(n_spatial):
            ln_g = nxt()[...]; ln_b = nxt()[...]
            w_in = nxt()[...]; b_in = nxt()[...]
            lnv_g = nxt()[...]; lnv_b = nxt()[...]
            w_sp_ref = nxt()                                   # (J, J) in SMEM
            b_sp_ref = nxt()                                   # (J,)  in SMEM
            w_out = nxt()[...]; b_out = nxt()[...]

            xn = _layernorm(h, ln_g, ln_b)
            z = _gelu(jnp.dot(xn, w_in,
                              preferred_element_type=jnp.float32) + b_in)
            u = z[:, :half]
            v = z[:, half:]
            vn = _layernorm(v, lnv_g, lnv_b)

            # Joint mix: rows are joint-major, so slab k = rows [k*T, (k+1)*T).
            # J^2 scaled adds on contiguous slabs (VPU), scalars from SMEM --
            # replaces the old kron(I_{B*T}, w_sp) matmul.
            slabs = [vn[k * T:(k + 1) * T, :] for k in range(J)]
            gated = []
            for j in range(J):
                vm = slabs[0] * w_sp_ref[j, 0]
                for k in range(1, J):
                    vm = vm + slabs[k] * w_sp_ref[j, k]
                vm = vm + b_sp_ref[j]
                gated.append(u[j * T:(j + 1) * T, :] * vm)
            g = jnp.concatenate(gated, axis=0)                 # (J*T, half)

            y = jnp.dot(g, w_out, preferred_element_type=jnp.float32) + b_out
            h = h + y

        # -------- spatial aggregation MLP ('B T J D -> B T (J D)') --------
        # Decomposed as sum_j  h_slab_j @ W1[j*D:(j+1)*D]  -> no transpose.
        w1 = nxt()[...]; b1 = nxt()[...]
        w2 = nxt()[...]; b2 = nxt()[...]
        a = jnp.dot(h[0:T, :], w1[0:D, :], preferred_element_type=jnp.float32)
        for j in range(1, J):
            a = a + jnp.dot(h[j * T:(j + 1) * T, :],
                            w1[j * D:(j + 1) * D, :],
                            preferred_element_type=jnp.float32)
        a = _gelu(a + b1)
        h = jnp.dot(a, w2, preferred_element_type=jnp.float32) + b2     # (T, D)

        # ---------------- temporal LRU stack ----------------
        for _ in range(n_temporal):
            ln_g = nxt()[...]; ln_b = nxt()[...]
            w_b = nxt()[...]
            lam_re_pk = nxt()[...]; lam_im_sgn = nxt()[...]
            w_c = nxt()[...]
            d_skip = nxt()[...]
            w_out = nxt()[...]; b_out = nxt()[...]

            xn = _layernorm(h, ln_g, ln_b)
            bu = jnp.dot(xn, w_b, preferred_element_type=jnp.float32)   # (T, 2*n_pad)

            # Serial scan; state is one lane-dense 128-wide vreg [re | im];
            # the re<->im swap is a single half-width roll (XLU slot).
            # TODO(synk): for production T, chunk T on an 'arbitrary' grid
            # axis with the carry in VMEM scratch instead of full unroll.
            s = jnp.zeros((1, n2), jnp.float32)
            steps = []
            for t in range(T):
                s = (lam_re_pk * s
                     + lam_im_sgn * pltpu.roll(s, shift=n_pad, axis=1)
                     + bu[t:t + 1, :])
                steps.append(s)
            hs = jnp.concatenate(steps, axis=0)                          # (T, 2*n_pad)

            y = jnp.dot(hs, w_c, preferred_element_type=jnp.float32)    # Re(C h)
            y = _gelu(y + xn * d_skip)
            y = jnp.dot(y, w_out, preferred_element_type=jnp.float32) + b_out
            h = h + y

        # ---------------- classifier (lane-padded output) ----------------
        wc1 = nxt()[...]; bc1 = nxt()[...]
        wc2 = nxt()[...]; bc2 = nxt()[...]
        c = _gelu(jnp.dot(h, wc1, preferred_element_type=jnp.float32) + bc1)
        c = jnp.dot(c, wc2, preferred_element_type=jnp.float32) + bc2
        o_ref[0] = c                                           # (T, C_PAD)

    return kernel


# ----------------------------------------------------------------------------
# Wrapper: flatten params into the kernel's argument order + build specs
# ----------------------------------------------------------------------------
def _const_spec(a):
    return pl.BlockSpec(a.shape, lambda b, n=a.ndim: (0,) * n)


def _flatten_params(params):
    arrs, specs = [], []

    def vmem(a):
        arrs.append(a)
        specs.append(_const_spec(a))

    def smem(a):
        arrs.append(a)
        specs.append(pl.BlockSpec(memory_space=pltpu.MemorySpace.SMEM))

    vmem(params["embed_w"]); vmem(params["embed_b"])
    for lp in params["spatial_layers"]:
        vmem(lp["ln_g"]); vmem(lp["ln_b"])
        vmem(lp["w_in"]); vmem(lp["b_in"])
        vmem(lp["lnv_g"]); vmem(lp["lnv_b"])
        smem(lp["w_sp"]); smem(lp["b_sp"])
        vmem(lp["w_out"]); vmem(lp["b_out"])
    vmem(params["agg_w1"]); vmem(params["agg_b1"])
    vmem(params["agg_w2"]); vmem(params["agg_b2"])
    for lp in params["temporal_layers"]:
        vmem(lp["ln_g"]); vmem(lp["ln_b"])
        vmem(lp["W_B"])
        vmem(lp["lam_re_pk"]); vmem(lp["lam_im_sgn"])
        vmem(lp["W_C"]); vmem(lp["D_skip"])
        vmem(lp["w_out"]); vmem(lp["b_out"])
    vmem(params["cls_w1"]); vmem(params["cls_b1"])
    vmem(params["cls_w2"]); vmem(params["cls_b2"])
    return arrs, specs


def lrtas_forward(params, x):            # x: (B, T, J, joint_features)
    Bn, Tn, J, F = x.shape
    D = params["embed_w"].shape[1]
    half = params["spatial_layers"][0]["lnv_g"].shape[-1]
    n_pad = params["temporal_layers"][0]["W_B"].shape[-1] // 2
    c_pad = params["cls_w2"].shape[-1]
    n_s = len(params["spatial_layers"])
    n_t = len(params["temporal_layers"])

    # Joint-major row layout for the spatial stage: (B, J*T, F).
    x_r = jnp.transpose(x, (0, 2, 1, 3)).reshape(Bn, J * Tn, F)
    x_r = x_r.astype(jnp.float32)

    w_arrs, w_specs = _flatten_params(params)
    kernel = _make_lrtas_kernel(Tn, J, D, half, n_pad, n_s, n_t)

    out = pl.pallas_call(
        kernel,
        out_shape=jax.ShapeDtypeStruct((Bn, Tn, c_pad), jnp.float32),
        grid=(Bn,),
        in_specs=[pl.BlockSpec((1, J * Tn, F), lambda b: (b, 0, 0))] + w_specs,
        out_specs=pl.BlockSpec((1, Tn, c_pad), lambda b: (b, 0, 0)),
        compiler_params=pltpu.CompilerParams(
            dimension_semantics=("parallel",),
            vmem_limit_bytes=32 * 1024 * 1024),
    )(x_r, *w_arrs)
    return out[..., :25]


# ----------------------------------------------------------------------------
# Deterministic parameter initialization (derived / packed weights built here)
# ----------------------------------------------------------------------------
def _init_linear(key, fan_in, fan_out):
    kw, kb = jax.random.split(key)
    s = float(fan_in) ** -0.5
    w = jax.random.uniform(kw, (fan_in, fan_out), jnp.float32, -s, s)
    b = jax.random.uniform(kb, (1, fan_out), jnp.float32, -s, s)
    return w, b


def init_sgu_params(key, D, S, J):
    ks = jax.random.split(key, 3)
    w_in, b_in = _init_linear(ks[0], D, S)
    w_out, b_out = _init_linear(ks[1], S // 2, D)
    w_sp = 1e-3 * jax.random.normal(ks[2], (J, J), jnp.float32)
    return dict(ln_g=jnp.ones((1, D), jnp.float32),
                ln_b=jnp.zeros((1, D), jnp.float32),
                w_in=w_in, b_in=b_in,
                lnv_g=jnp.ones((1, S // 2), jnp.float32),
                lnv_b=jnp.zeros((1, S // 2), jnp.float32),
                w_sp=w_sp,                          # (J, J)  -> SMEM scalars
                b_sp=jnp.ones((J,), jnp.float32),   # (J,)    -> SMEM scalars
                w_out=w_out, b_out=b_out)


def init_lru_params(key, D, N):
    ks = jax.random.split(key, 8)
    r_min, r_max, max_phase = 0.4, 0.99, 6.283
    u1 = jax.random.uniform(ks[0], (N,), jnp.float32)
    u2 = jax.random.uniform(ks[1], (N,), jnp.float32)
    nu = -0.5 * jnp.log(u1 * (r_max ** 2 - r_min ** 2) + r_min ** 2)
    theta = u2 * max_phase
    mod = jnp.exp(-nu)
    lam_re = mod * jnp.cos(theta)
    lam_im = mod * jnp.sin(theta)
    gamma = jnp.sqrt(jnp.clip(1.0 - mod ** 2, 1e-8))
    B_re = jax.random.normal(ks[2], (D, N), jnp.float32) / jnp.sqrt(2.0 * D)
    B_im = jax.random.normal(ks[3], (D, N), jnp.float32) / jnp.sqrt(2.0 * D)
    C_re = jax.random.normal(ks[4], (N, D), jnp.float32) / jnp.sqrt(1.0 * N)
    C_im = jax.random.normal(ks[5], (N, D), jnp.float32) / jnp.sqrt(1.0 * N)
    D_skip = jax.random.normal(ks[6], (1, D), jnp.float32)
    w_out, b_out = _init_linear(ks[7], D, D)

    # Lane-pack re/im side by side and zero-pad N so the recurrent state is a
    # full 128-lane vreg and the re<->im swap is a single half-width roll.
    # Padded lanes stay exactly zero through the whole recurrence.
    n_pad = ((N + 63) // 64) * 64
    n2 = 2 * n_pad
    W_B = jnp.zeros((D, n2), jnp.float32)
    W_B = W_B.at[:, :N].set(B_re * gamma[None, :])
    W_B = W_B.at[:, n_pad:n_pad + N].set(B_im * gamma[None, :])
    W_C = jnp.zeros((n2, D), jnp.float32)
    W_C = W_C.at[:N, :].set(C_re)
    W_C = W_C.at[n_pad:n_pad + N, :].set(-C_im)
    lam_re_pk = jnp.zeros((1, n2), jnp.float32)
    lam_re_pk = lam_re_pk.at[0, :N].set(lam_re).at[0, n_pad:n_pad + N].set(lam_re)
    lam_im_sgn = jnp.zeros((1, n2), jnp.float32)
    lam_im_sgn = lam_im_sgn.at[0, :N].set(-lam_im).at[0, n_pad:n_pad + N].set(lam_im)
    return dict(ln_g=jnp.ones((1, D), jnp.float32),
                ln_b=jnp.zeros((1, D), jnp.float32),
                W_B=W_B, W_C=W_C,
                lam_re_pk=lam_re_pk, lam_im_sgn=lam_im_sgn,
                D_skip=D_skip, w_out=w_out, b_out=b_out)


def init_lrtas_params(key, model_dim, spatial_dim, spatial_layers_count,
                      temporal_dim, temporal_layers_count, joint_features,
                      joint_count, num_classes=25):
    keys = jax.random.split(key, 8 + spatial_layers_count
                            + temporal_layers_count)
    it = iter(keys)
    embed_w, embed_b = _init_linear(next(it), joint_features, model_dim)
    spatial = [init_sgu_params(next(it), model_dim, spatial_dim, joint_count)
               for _ in range(spatial_layers_count)]
    agg_w1, agg_b1 = _init_linear(next(it), model_dim * joint_count,
                                  model_dim * 5)
    agg_w2, agg_b2 = _init_linear(next(it), model_dim * 5, model_dim)
    temporal = [init_lru_params(next(it), model_dim, temporal_dim)
                for _ in range(temporal_layers_count)]
    cls_w1, cls_b1 = _init_linear(next(it), model_dim, model_dim)
    w2, b2 = _init_linear(next(it), model_dim, num_classes)
    # Zero-pad the classifier head to 128 lanes -> unmasked output stores;
    # the wrapper slices the padding back off.
    c_pad = ((num_classes + 127) // 128) * 128
    cls_w2 = jnp.zeros((model_dim, c_pad), jnp.float32).at[:, :num_classes].set(w2)
    cls_b2 = jnp.zeros((1, c_pad), jnp.float32).at[:, :num_classes].set(b2)
    return dict(embed_w=embed_w, embed_b=embed_b,
                spatial_layers=spatial,
                agg_w1=agg_w1, agg_b1=agg_b1, agg_w2=agg_w2, agg_b2=agg_b2,
                temporal_layers=temporal,
                cls_w1=cls_w1, cls_b1=cls_b1, cls_w2=cls_w2, cls_b2=cls_b2)


# ----------------------------------------------------------------------------
if __name__ == "__main__":
    model_dim = 32
    spatial_dim = 32
    spatial_layers_count = 2
    temporal_dim = 16
    temporal_layers_count = 2
    joint_features = 8
    joint_count = 4
    B, T = 2, 8

    key = jax.random.PRNGKey(0)
    kp, kx = jax.random.split(key)
    params = init_lrtas_params(kp, model_dim, spatial_dim,
                               spatial_layers_count, temporal_dim,
                               temporal_layers_count, joint_features,
                               joint_count)
    x = jax.random.normal(kx, (B, T, joint_count, joint_features),
                          jnp.float32)

    out = jax.jit(lrtas_forward)(params, x)
    jax.block_until_ready(out)
    assert out.shape == (B, T, 25) and out.dtype == jnp.float32
    assert bool(jnp.all(jnp.isfinite(out)))
    print("KERNEL_OK")
</pallas_src>

<mosaic_0001>
module attributes {stable_mosaic.version = 11 : i64} {
  func.func @kernel(%arg0: i32, %arg1: memref<1x32x8xf32, #tpu.memory_space<vmem>>, %arg2: memref<8x32xf32, #tpu.memory_space<vmem>>, %arg3: memref<1x32xf32, #tpu.memory_space<vmem>>, %arg4: memref<1x32xf32, #tpu.memory_space<vmem>>, %arg5: memref<1x32xf32, #tpu.memory_space<vmem>>, %arg6: memref<32x32xf32, #tpu.memory_space<vmem>>, %arg7: memref<1x32xf32, #tpu.memory_space<vmem>>, %arg8: memref<1x16xf32, #tpu.memory_space<vmem>>, %arg9: memref<1x16xf32, #tpu.memory_space<vmem>>, %arg10: memref<4x4xf32, #tpu.memory_space<smem>>, %arg11: memref<4xf32, #tpu.memory_space<smem>>, %arg12: memref<16x32xf32, #tpu.memory_space<vmem>>, %arg13: memref<1x32xf32, #tpu.memory_space<vmem>>, %arg14: memref<1x32xf32, #tpu.memory_space<vmem>>, %arg15: memref<1x32xf32, #tpu.memory_space<vmem>>, %arg16: memref<32x32xf32, #tpu.memory_space<vmem>>, %arg17: memref<1x32xf32, #tpu.memory_space<vmem>>, %arg18: memref<1x16xf32, #tpu.memory_space<vmem>>, %arg19: memref<1x16xf32, #tpu.memory_space<vmem>>, %arg20: memref<4x4xf32, #tpu.memory_space<smem>>, %arg21: memref<4xf32, #tpu.memory_space<smem>>, %arg22: memref<16x32xf32, #tpu.memory_space<vmem>>, %arg23: memref<1x32xf32, #tpu.memory_space<vmem>>, %arg24: memref<128x160xf32, #tpu.memory_space<vmem>>, %arg25: memref<1x160xf32, #tpu.memory_space<vmem>>, %arg26: memref<160x32xf32, #tpu.memory_space<vmem>>, %arg27: memref<1x32xf32, #tpu.memory_space<vmem>>, %arg28: memref<1x32xf32, #tpu.memory_space<vmem>>, %arg29: memref<1x32xf32, #tpu.memory_space<vmem>>, %arg30: memref<32x128xf32, #tpu.memory_space<vmem>>, %arg31: memref<1x128xf32, #tpu.memory_space<vmem>>, %arg32: memref<1x128xf32, #tpu.memory_space<vmem>>, %arg33: memref<128x32xf32, #tpu.memory_space<vmem>>, %arg34: memref<1x32xf32, #tpu.memory_space<vmem>>, %arg35: memref<32x32xf32, #tpu.memory_space<vmem>>, %arg36: memref<1x32xf32, #tpu.memory_space<vmem>>, %arg37: memref<1x32xf32, #tpu.memory_space<vmem>>, %arg38: memref<1x32xf32, #tpu.memory_space<vmem>>, %arg39: memref<32x128xf32, #tpu.memory_space<vmem>>, %arg40: memref<1x128xf32, #tpu.memory_space<vmem>>, %arg41: memref<1x128xf32, #tpu.memory_space<vmem>>, %arg42: memref<128x32xf32, #tpu.memory_space<vmem>>, %arg43: memref<1x32xf32, #tpu.memory_space<vmem>>, %arg44: memref<32x32xf32, #tpu.memory_space<vmem>>, %arg45: memref<1x32xf32, #tpu.memory_space<vmem>>, %arg46: memref<32x32xf32, #tpu.memory_space<vmem>>, %arg47: memref<1x32xf32, #tpu.memory_space<vmem>>, %arg48: memref<32x128xf32, #tpu.memory_space<vmem>>, %arg49: memref<1x128xf32, #tpu.memory_space<vmem>>, %arg50: memref<1x8x128xf32, #tpu.memory_space<vmem>>) attributes {dimension_semantics = [#tpu.dimension_semantics<parallel>], iteration_bounds = array<i64: 2>, scalar_prefetch = 0 : i64, scratch_operands = 0 : i64, tpu.core_type = #tpu.core_type<tc>, window_params = [{transform_indices = @transform_0, window_bounds = array<i64: 1, 32, 8>}, {pipeline_mode = #tpu.pipeline_mode<synchronous>, transform_indices = @transform_1, window_bounds = array<i64: 8, 32>}, {pipeline_mode = #tpu.pipeline_mode<synchronous>, transform_indices = @transform_2, window_bounds = array<i64: 1, 32>}, {pipeline_mode = #tpu.pipeline_mode<synchronous>, transform_indices = @transform_3, window_bounds = array<i64: 1, 32>}, {pipeline_mode = #tpu.pipeline_mode<synchronous>, transform_indices = @transform_4, window_bounds = array<i64: 1, 32>}, {pipeline_mode = #tpu.pipeline_mode<synchronous>, transform_indices = @transform_5, window_bounds = array<i64: 32, 32>}, {pipeline_mode = #tpu.pipeline_mode<synchronous>, transform_indices = @transform_6, window_bounds = array<i64: 1, 32>}, {pipeline_mode = #tpu.pipeline_mode<synchronous>, transform_indices = @transform_7, window_bounds = array<i64: 1, 16>}, {pipeline_mode = #tpu.pipeline_mode<synchronous>, transform_indices = @transform_8, window_bounds = array<i64: 1, 16>}, {transform_indices = @transform_9, window_bounds = array<i64: 4, 4>}, {transform_indices = @transform_10, window_bounds = array<i64: 4>}, {pipeline_mode = #tpu.pipeline_mode<synchronous>, transform_indices = @transform_11, window_bounds = array<i64: 16, 32>}, {pipeline_mode = #tpu.pipeline_mode<synchronous>, transform_indices = @transform_12, window_bounds = array<i64: 1, 32>}, {pipeline_mode = #tpu.pipeline_mode<synchronous>, transform_indices = @transform_13, window_bounds = array<i64: 1, 32>}, {pipeline_mode = #tpu.pipeline_mode<synchronous>, transform_indices = @transform_14, window_bounds = array<i64: 1, 32>}, {pipeline_mode = #tpu.pipeline_mode<synchronous>, transform_indices = @transform_15, window_bounds = array<i64: 32, 32>}, {pipeline_mode = #tpu.pipeline_mode<synchronous>, transform_indices = @transform_16, window_bounds = array<i64: 1, 32>}, {pipeline_mode = #tpu.pipeline_mode<synchronous>, transform_indices = @transform_17, window_bounds = array<i64: 1, 16>}, {pipeline_mode = #tpu.pipeline_mode<synchronous>, transform_indices = @transform_18, window_bounds = array<i64: 1, 16>}, {transform_indices = @transform_19, window_bounds = array<i64: 4, 4>}, {transform_indices = @transform_20, window_bounds = array<i64: 4>}, {pipeline_mode = #tpu.pipeline_mode<synchronous>, transform_indices = @transform_21, window_bounds = array<i64: 16, 32>}, {pipeline_mode = #tpu.pipeline_mode<synchronous>, transform_indices = @transform_22, window_bounds = array<i64: 1, 32>}, {pipeline_mode = #tpu.pipeline_mode<synchronous>, transform_indices = @transform_23, window_bounds = array<i64: 128, 160>}, {pipeline_mode = #tpu.pipeline_mode<synchronous>, transform_indices = @transform_24, window_bounds = array<i64: 1, 160>}, {pipeline_mode = #tpu.pipeline_mode<synchronous>, transform_indices = @transform_25, window_bounds = array<i64: 160, 32>}, {pipeline_mode = #tpu.pipeline_mode<synchronous>, transform_indices = @transform_26, window_bounds = array<i64: 1, 32>}, {pipeline_mode = #tpu.pipeline_mode<synchronous>, transform_indices = @transform_27, window_bounds = array<i64: 1, 32>}, {pipeline_mode = #tpu.pipeline_mode<synchronous>, transform_indices = @transform_28, window_bounds = array<i64: 1, 32>}, {pipeline_mode = #tpu.pipeline_mode<synchronous>, transform_indices = @transform_29, window_bounds = array<i64: 32, 128>}, {pipeline_mode = #tpu.pipeline_mode<synchronous>, transform_indices = @transform_30, window_bounds = array<i64: 1, 128>}, {pipeline_mode = #tpu.pipeline_mode<synchronous>, transform_indices = @transform_31, window_bounds = array<i64: 1, 128>}, {pipeline_mode = #tpu.pipeline_mode<synchronous>, transform_indices = @transform_32, window_bounds = array<i64: 128, 32>}, {pipeline_mode = #tpu.pipeline_mode<synchronous>, transform_indices = @transform_33, window_bounds = array<i64: 1, 32>}, {pipeline_mode = #tpu.pipeline_mode<synchronous>, transform_indices = @transform_34, window_bounds = array<i64: 32, 32>}, {pipeline_mode = #tpu.pipeline_mode<synchronous>, transform_indices = @transform_35, window_bounds = array<i64: 1, 32>}, {pipeline_mode = #tpu.pipeline_mode<synchronous>, transform_indices = @transform_36, window_bounds = array<i64: 1, 32>}, {pipeline_mode = #tpu.pipeline_mode<synchronous>, transform_indices = @transform_37, window_bounds = array<i64: 1, 32>}, {pipeline_mode = #tpu.pipeline_mode<synchronous>, transform_indices = @transform_38, window_bounds = array<i64: 32, 128>}, {pipeline_mode = #tpu.pipeline_mode<synchronous>, transform_indices = @transform_39, window_bounds = array<i64: 1, 128>}, {pipeline_mode = #tpu.pipeline_mode<synchronous>, transform_indices = @transform_40, window_bounds = array<i64: 1, 128>}, {pipeline_mode = #tpu.pipeline_mode<synchronous>, transform_indices = @transform_41, window_bounds = array<i64: 128, 32>}, {pipeline_mode = #tpu.pipeline_mode<synchronous>, transform_indices = @transform_42, window_bounds = array<i64: 1, 32>}, {pipeline_mode = #tpu.pipeline_mode<synchronous>, transform_indices = @transform_43, window_bounds = array<i64: 32, 32>}, {pipeline_mode = #tpu.pipeline_mode<synchronous>, transform_indices = @transform_44, window_bounds = array<i64: 1, 32>}, {pipeline_mode = #tpu.pipeline_mode<synchronous>, transform_indices = @transform_45, window_bounds = array<i64: 32, 32>}, {pipeline_mode = #tpu.pipeline_mode<synchronous>, transform_indices = @transform_46, window_bounds = array<i64: 1, 32>}, {pipeline_mode = #tpu.pipeline_mode<synchronous>, transform_indices = @transform_47, window_bounds = array<i64: 32, 128>}, {pipeline_mode = #tpu.pipeline_mode<synchronous>, transform_indices = @transform_48, window_bounds = array<i64: 1, 128>}, {transform_indices = @transform_49, window_bounds = array<i64: 1, 8, 128>}]} {
    %c0 = arith.constant 0 : index
    %c0_0 = arith.constant 0 : index
    %0 = vector.load %arg2[%c0, %c0_0] : memref<8x32xf32, #tpu.memory_space<vmem>>, vector<8x32xf32>
    %c0_1 = arith.constant 0 : index
    %c0_2 = arith.constant 0 : index
    %1 = vector.load %arg3[%c0_1, %c0_2] : memref<1x32xf32, #tpu.memory_space<vmem>>, vector<1x32xf32>
    %c0_3 = arith.constant 0 : index
    %c0_4 = arith.constant 0 : index
    %c0_5 = arith.constant 0 : index
    %2 = vector.load %arg1[%c0_3, %c0_4, %c0_5] : memref<1x32x8xf32, #tpu.memory_space<vmem>>, vector<1x32x8xf32>
    %3 = vector.shape_cast %2 : vector<1x32x8xf32> to vector<32x8xf32>
    %cst = arith.constant dense<0.000000e+00> : vector<32x32xf32>
    %4 = tpu.matmul %3, %0, %cst {dimension_numbers = #tpu.dot_dimension_numbers<[1], [0], [0], [1], [0, 0, 1, 1], [], []>} : vector<32x8xf32>, vector<8x32xf32>, vector<32x32xf32> -> vector<32x32xf32>
    %5 = vector.broadcast %1 : vector<1x32xf32> to vector<32x32xf32>
    %6 = arith.addf %4, %5 : vector<32x32xf32>
    %c0_6 = arith.constant 0 : index
    %c0_7 = arith.constant 0 : index
    %7 = vector.load %arg4[%c0_6, %c0_7] : memref<1x32xf32, #tpu.memory_space<vmem>>, vector<1x32xf32>
    %c0_8 = arith.constant 0 : index
    %c0_9 = arith.constant 0 : index
    %8 = vector.load %arg5[%c0_8, %c0_9] : memref<1x32xf32, #tpu.memory_space<vmem>>, vector<1x32xf32>
    %c0_10 = arith.constant 0 : index
    %c0_11 = arith.constant 0 : index
    %9 = vector.load %arg6[%c0_10, %c0_11] : memref<32x32xf32, #tpu.memory_space<vmem>>, vector<32x32xf32>
    %c0_12 = arith.constant 0 : index
    %c0_13 = arith.constant 0 : index
    %10 = vector.load %arg7[%c0_12, %c0_13] : memref<1x32xf32, #tpu.memory_space<vmem>>, vector<1x32xf32>
    %c0_14 = arith.constant 0 : index
    %c0_15 = arith.constant 0 : index
    %11 = vector.load %arg8[%c0_14, %c0_15] : memref<1x16xf32, #tpu.memory_space<vmem>>, vector<1x16xf32>
    %c0_16 = arith.constant 0 : index
    %c0_17 = arith.constant 0 : index
    %12 = vector.load %arg9[%c0_16, %c0_17] : memref<1x16xf32, #tpu.memory_space<vmem>>, vector<1x16xf32>
    %c0_18 = arith.constant 0 : index
    %c0_19 = arith.constant 0 : index
    %13 = vector.load %arg12[%c0_18, %c0_19] : memref<16x32xf32, #tpu.memory_space<vmem>>, vector<16x32xf32>
    %c0_20 = arith.constant 0 : index
    %c0_21 = arith.constant 0 : index
    %14 = vector.load %arg13[%c0_20, %c0_21] : memref<1x32xf32, #tpu.memory_space<vmem>>, vector<1x32xf32>
    %cst_22 = arith.constant dense<0.000000e+00> : vector<32xf32>
    %15 = vector.multi_reduction <add>, %6, %cst_22 [1] : vector<32x32xf32> to vector<32xf32>
    %16 = vector.shape_cast %15 : vector<32xf32> to vector<32x1xf32>
    %cst_23 = arith.constant 3.200000e+01 : f32
    %17 = vector.broadcast %cst_23 : f32 to vector<32x1xf32>
    %18 = arith.divf %16, %17 : vector<32x1xf32>
    %19 = vector.broadcast %18 : vector<32x1xf32> to vector<32x32xf32>
    %20 = arith.subf %6, %19 : vector<32x32xf32>
    %21 = arith.mulf %20, %20 : vector<32x32xf32>
    %cst_24 = arith.constant dense<0.000000e+00> : vector<32xf32>
    %22 = vector.multi_reduction <add>, %21, %cst_24 [1] : vector<32x32xf32> to vector<32xf32>
    %23 = vector.shape_cast %22 : vector<32xf32> to vector<32x1xf32>
    %cst_25 = arith.constant 3.200000e+01 : f32
    %24 = vector.broadcast %cst_25 : f32 to vector<32x1xf32>
    %25 = arith.divf %23, %24 : vector<32x1xf32>
    %cst_26 = arith.constant 9.99999974E-6 : f32
    %26 = vector.broadcast %cst_26 : f32 to vector<32x1xf32>
    %27 = arith.addf %25, %26 : vector<32x1xf32>
    %28 = math.rsqrt %27 : vector<32x1xf32>
    %29 = vector.broadcast %28 : vector<32x1xf32> to vector<32x32xf32>
    %30 = arith.mulf %20, %29 : vector<32x32xf32>
    %31 = vector.broadcast %7 : vector<1x32xf32> to vector<32x32xf32>
    %32 = arith.mulf %30, %31 : vector<32x32xf32>
    %33 = vector.broadcast %8 : vector<1x32xf32> to vector<32x32xf32>
    %34 = arith.addf %32, %33 : vector<32x32xf32>
    %cst_27 = arith.constant dense<0.000000e+00> : vector<32x32xf32>
    %35 = tpu.matmul %34, %9, %cst_27 {dimension_numbers = #tpu.dot_dimension_numbers<[1], [0], [0], [1], [0, 0, 1, 1], [], []>} : vector<32x32xf32>, vector<32x32xf32>, vector<32x32xf32> -> vector<32x32xf32>
    %36 = vector.broadcast %10 : vector<1x32xf32> to vector<32x32xf32>
    %37 = arith.addf %35, %36 : vector<32x32xf32>
    %cst_28 = arith.constant 5.000000e-01 : f32
    %38 = vector.broadcast %cst_28 : f32 to vector<32x32xf32>
    %39 = arith.mulf %38, %37 : vector<32x32xf32>
    %cst_29 = arith.constant 4.471500e-02 : f32
    %40 = vector.broadcast %cst_29 : f32 to vector<32x32xf32>
    %41 = arith.mulf %40, %37 : vector<32x32xf32>
    %42 = arith.mulf %41, %37 : vector<32x32xf32>
    %43 = arith.mulf %42, %37 : vector<32x32xf32>
    %44 = arith.addf %37, %43 : vector<32x32xf32>
    %cst_30 = arith.constant 0.797884583 : f32
    %45 = vector.broadcast %cst_30 : f32 to vector<32x32xf32>
    %46 = arith.mulf %45, %44 : vector<32x32xf32>
    %47 = math.tanh %46 : vector<32x32xf32>
    %cst_31 = arith.constant 1.000000e+00 : f32
    %48 = vector.broadcast %cst_31 : f32 to vector<32x32xf32>
    %49 = arith.addf %48, %47 : vector<32x32xf32>
    %50 = arith.mulf %39, %49 : vector<32x32xf32>
    %51 = vector.extract_strided_slice %50 {offsets = [0, 0], sizes = [32, 16], strides = [1, 1]} : vector<32x32xf32> to vector<32x16xf32>
    %52 = vector.extract_strided_slice %50 {offsets = [0, 16], sizes = [32, 16], strides = [1, 1]} : vector<32x32xf32> to vector<32x16xf32>
    %cst_32 = arith.constant dense<0.000000e+00> : vector<32xf32>
    %53 = vector.multi_reduction <add>, %52, %cst_32 [1] : vector<32x16xf32> to vector<32xf32>
    %54 = vector.shape_cast %53 : vector<32xf32> to vector<32x1xf32>
    %cst_33 = arith.constant 1.600000e+01 : f32
    %55 = vector.broadcast %cst_33 : f32 to vector<32x1xf32>
    %56 = arith.divf %54, %55 : vector<32x1xf32>
    %57 = vector.broadcast %56 : vector<32x1xf32> to vector<32x16xf32>
    %58 = arith.subf %52, %57 : vector<32x16xf32>
    %59 = arith.mulf %58, %58 : vector<32x16xf32>
    %cst_34 = arith.constant dense<0.000000e+00> : vector<32xf32>
    %60 = vector.multi_reduction <add>, %59, %cst_34 [1] : vector<32x16xf32> to vector<32xf32>
    %61 = vector.shape_cast %60 : vector<32xf32> to vector<32x1xf32>
    %cst_35 = arith.constant 1.600000e+01 : f32
    %62 = vector.broadcast %cst_35 : f32 to vector<32x1xf32>
    %63 = arith.divf %61, %62 : vector<32x1xf32>
    %cst_36 = arith.constant 9.99999974E-6 : f32
    %64 = vector.broadcast %cst_36 : f32 to vector<32x1xf32>
    %65 = arith.addf %63, %64 : vector<32x1xf32>
    %66 = math.rsqrt %65 : vector<32x1xf32>
    %67 = vector.broadcast %66 : vector<32x1xf32> to vector<32x16xf32>
    %68 = arith.mulf %58, %67 : vector<32x16xf32>
    %69 = vector.broadcast %11 : vector<1x16xf32> to vector<32x16xf32>
    %70 = arith.mulf %68, %69 : vector<32x16xf32>
    %71 = vector.broadcast %12 : vector<1x16xf32> to vector<32x16xf32>
    %72 = arith.addf %70, %71 : vector<32x16xf32>
    %73 = vector.extract_strided_slice %72 {offsets = [0, 0], sizes = [8, 16], strides = [1, 1]} : vector<32x16xf32> to vector<8x16xf32>
    %74 = vector.extract_strided_slice %72 {offsets = [8, 0], sizes = [8, 16], strides = [1, 1]} : vector<32x16xf32> to vector<8x16xf32>
    %75 = vector.extract_strided_slice %72 {offsets = [16, 0], sizes = [8, 16], strides = [1, 1]} : vector<32x16xf32> to vector<8x16xf32>
    %76 = vector.extract_strided_slice %72 {offsets = [24, 0], sizes = [8, 16], strides = [1, 1]} : vector<32x16xf32> to vector<8x16xf32>
    %c0_37 = arith.constant 0 : index
    %c0_38 = arith.constant 0 : index
    %77 = memref.load %arg10[%c0_37, %c0_38] : memref<4x4xf32, #tpu.memory_space<smem>>
    %78 = vector.broadcast %77 : f32 to vector<8x16xf32>
    %79 = arith.mulf %73, %78 : vector<8x16xf32>
    %c0_39 = arith.constant 0 : index
    %c1 = arith.constant 1 : index
    %80 = memref.load %arg10[%c0_39, %c1] : memref<4x4xf32, #tpu.memory_space<smem>>
    %81 = vector.broadcast %80 : f32 to vector<8x16xf32>
    %82 = arith.mulf %74, %81 : vector<8x16xf32>
    %83 = arith.addf %79, %82 : vector<8x16xf32>
    %c0_40 = arith.constant 0 : index
    %c2 = arith.constant 2 : index
    %84 = memref.load %arg10[%c0_40, %c2] : memref<4x4xf32, #tpu.memory_space<smem>>
    %85 = vector.broadcast %84 : f32 to vector<8x16xf32>
    %86 = arith.mulf %75, %85 : vector<8x16xf32>
    %87 = arith.addf %83, %86 : vector<8x16xf32>
    %c0_41 = arith.constant 0 : index
    %c3 = arith.constant 3 : index
    %88 = memref.load %arg10[%c0_41, %c3] : memref<4x4xf32, #tpu.memory_space<smem>>
    %89 = vector.broadcast %88 : f32 to vector<8x16xf32>
    %90 = arith.mulf %76, %89 : vector<8x16xf32>
    %91 = arith.addf %87, %90 : vector<8x16xf32>
    %c0_42 = arith.constant 0 : index
    %92 = memref.load %arg11[%c0_42] : memref<4xf32, #tpu.memory_space<smem>>
    %93 = vector.broadcast %92 : f32 to vector<8x16xf32>
    %94 = arith.addf %91, %93 : vector<8x16xf32>
    %95 = vector.extract_strided_slice %51 {offsets = [0, 0], sizes = [8, 16], strides = [1, 1]} : vector<32x16xf32> to vector<8x16xf32>
    %96 = arith.mulf %95, %94 : vector<8x16xf32>
    %c1_43 = arith.constant 1 : index
    %c0_44 = arith.constant 0 : index
    %97 = memref.load %arg10[%c1_43, %c0_44] : memref<4x4xf32, #tpu.memory_space<smem>>
    %98 = vector.broadcast %97 : f32 to vector<8x16xf32>
    %99 = arith.mulf %73, %98 : vector<8x16xf32>
    %c1_45 = arith.constant 1 : index
    %c1_46 = arith.constant 1 : index
    %100 = memref.load %arg10[%c1_45, %c1_46] : memref<4x4xf32, #tpu.memory_space<smem>>
    %101 = vector.broadcast %100 : f32 to vector<8x16xf32>
    %102 = arith.mulf %74, %101 : vector<8x16xf32>
    %103 = arith.addf %99, %102 : vector<8x16xf32>
    %c1_47 = arith.constant 1 : index
    %c2_48 = arith.constant 2 : index
    %104 = memref.load %arg10[%c1_47, %c2_48] : memref<4x4xf32, #tpu.memory_space<smem>>
    %105 = vector.broadcast %104 : f32 to vector<8x16xf32>
    %106 = arith.mulf %75, %105 : vector<8x16xf32>
    %107 = arith.addf %103, %106 : vector<8x16xf32>
    %c1_49 = arith.constant 1 : index
    %c3_50 = arith.constant 3 : index
    %108 = memref.load %arg10[%c1_49, %c3_50] : memref<4x4xf32, #tpu.memory_space<smem>>
    %109 = vector.broadcast %108 : f32 to vector<8x16xf32>
    %110 = arith.mulf %76, %109 : vector<8x16xf32>
    %111 = arith.addf %107, %110 : vector<8x16xf32>
    %c1_51 = arith.constant 1 : index
    %112 = memref.load %arg11[%c1_51] : memref<4xf32, #tpu.memory_space<smem>>
    %113 = vector.broadcast %112 : f32 to vector<8x16xf32>
    %114 = arith.addf %111, %113 : vector<8x16xf32>
    %115 = vector.extract_strided_slice %51 {offsets = [8, 0], sizes = [8, 16], strides = [1, 1]} : vector<32x16xf32> to vector<8x16xf32>
    %116 = arith.mulf %115, %114 : vector<8x16xf32>
    %c2_52 = arith.constant 2 : index
    %c0_53 = arith.constant 0 : index
    %117 = memref.load %arg10[%c2_52, %c0_53] : memref<4x4xf32, #tpu.memory_space<smem>>
    %118 = vector.broadcast %117 : f32 to vector<8x16xf32>
    %119 = arith.mulf %73, %118 : vector<8x16xf32>
    %c2_54 = arith.constant 2 : index
    %c1_55 = arith.constant 1 : index
    %120 = memref.load %arg10[%c2_54, %c1_55] : memref<4x4xf32, #tpu.memory_space<smem>>
    %121 = vector.broadcast %120 : f32 to vector<8x16xf32>
    %122 = arith.mulf %74, %121 : vector<8x16xf32>
    %123 = arith.addf %119, %122 : vector<8x16xf32>
    %c2_56 = arith.constant 2 : index
    %c2_57 = arith.constant 2 : index
    %124 = memref.load %arg10[%c2_56, %c2_57] : memref<4x4xf32, #tpu.memory_space<smem>>
    %125 = vector.broadcast %124 : f32 to vector<8x16xf32>
    %126 = arith.mulf %75, %125 : vector<8x16xf32>
    %127 = arith.addf %123, %126 : vector<8x16xf32>
    %c2_58 = arith.constant 2 : index
    %c3_59 = arith.constant 3 : index
    %128 = memref.load %arg10[%c2_58, %c3_59] : memref<4x4xf32, #tpu.memory_space<smem>>
    %129 = vector.broadcast %128 : f32 to vector<8x16xf32>
    %130 = arith.mulf %76, %129 : vector<8x16xf32>
    %131 = arith.addf %127, %130 : vector<8x16xf32>
    %c2_60 = arith.constant 2 : index
    %132 = memref.load %arg11[%c2_60] : memref<4xf32, #tpu.memory_space<smem>>
    %133 = vector.broadcast %132 : f32 to vector<8x16xf32>
    %134 = arith.addf %131, %133 : vector<8x16xf32>
    %135 = vector.extract_strided_slice %51 {offsets = [16, 0], sizes = [8, 16], strides = [1, 1]} : vector<32x16xf32> to vector<8x16xf32>
    %136 = arith.mulf %135, %134 : vector<8x16xf32>
    %c3_61 = arith.constant 3 : index
    %c0_62 = arith.constant 0 : index
    %137 = memref.load %arg10[%c3_61, %c0_62] : memref<4x4xf32, #tpu.memory_space<smem>>
    %138 = vector.broadcast %137 : f32 to vector<8x16xf32>
    %139 = arith.mulf %73, %138 : vector<8x16xf32>
    %c3_63 = arith.constant 3 : index
    %c1_64 = arith.constant 1 : index
    %140 = memref.load %arg10[%c3_63, %c1_64] : memref<4x4xf32, #tpu.memory_space<smem>>
    %141 = vector.broadcast %140 : f32 to vector<8x16xf32>
    %142 = arith.mulf %74, %141 : vector<8x16xf32>
    %143 = arith.addf %139, %142 : vector<8x16xf32>
    %c3_65 = arith.constant 3 : index
    %c2_66 = arith.constant 2 : index
    %144 = memref.load %arg10[%c3_65, %c2_66] : memref<4x4xf32, #tpu.memory_space<smem>>
    %145 = vector.broadcast %144 : f32 to vector<8x16xf32>
    %146 = arith.mulf %75, %145 : vector<8x16xf32>
    %147 = arith.addf %143, %146 : vector<8x16xf32>
    %c3_67 = arith.constant 3 : index
    %c3_68 = arith.constant 3 : index
    %148 = memref.load %arg10[%c3_67, %c3_68] : memref<4x4xf32, #tpu.memory_space<smem>>
    %149 = vector.broadcast %148 : f32 to vector<8x16xf32>
    %150 = arith.mulf %76, %149 : vector<8x16xf32>
    %151 = arith.addf %147, %150 : vector<8x16xf32>
    %c3_69 = arith.constant 3 : index
    %152 = memref.load %arg11[%c3_69] : memref<4xf32, #tpu.memory_space<smem>>
    %153 = vector.broadcast %152 : f32 to vector<8x16xf32>
    %154 = arith.addf %151, %153 : vector<8x16xf32>
    %155 = vector.extract_strided_slice %51 {offsets = [24, 0], sizes = [8, 16], strides = [1, 1]} : vector<32x16xf32> to vector<8x16xf32>
    %156 = arith.mulf %155, %154 : vector<8x16xf32>
    %157 = tpu.concatenate %96, %116, %136, %156 in 0 : vector<8x16xf32>, vector<8x16xf32>, vector<8x16xf32>, vector<8x16xf32> -> vector<32x16xf32>
    %cst_70 = arith.constant dense<0.000000e+00> : vector<32x32xf32>
    %158 = tpu.matmul %157, %13, %cst_70 {dimension_numbers = #tpu.dot_dimension_numbers<[1], [0], [0], [1], [0, 0, 1, 1], [], []>} : vector<32x16xf32>, vector<16x32xf32>, vector<32x32xf32> -> vector<32x32xf32>
    %159 = vector.broadcast %14 : vector<1x32xf32> to vector<32x32xf32>
    %160 = arith.addf %158, %159 : vector<32x32xf32>
    %161 = arith.addf %6, %160 : vector<32x32xf32>
    %c0_71 = arith.constant 0 : index
    %c0_72 = arith.constant 0 : index
    %162 = vector.load %arg14[%c0_71, %c0_72] : memref<1x32xf32, #tpu.memory_space<vmem>>, vector<1x32xf32>
    %c0_73 = arith.constant 0 : index
    %c0_74 = arith.constant 0 : index
    %163 = vector.load %arg15[%c0_73, %c0_74] : memref<1x32xf32, #tpu.memory_space<vmem>>, vector<1x32xf32>
    %c0_75 = arith.constant 0 : index
    %c0_76 = arith.constant 0 : index
    %164 = vector.load %arg16[%c0_75, %c0_76] : memref<32x32xf32, #tpu.memory_space<vmem>>, vector<32x32xf32>
    %c0_77 = arith.constant 0 : index
    %c0_78 = arith.constant 0 : index
    %165 = vector.load %arg17[%c0_77, %c0_78] : memref<1x32xf32, #tpu.memory_space<vmem>>, vector<1x32xf32>
    %c0_79 = arith.constant 0 : index
    %c0_80 = arith.constant 0 : index
    %166 = vector.load %arg18[%c0_79, %c0_80] : memref<1x16xf32, #tpu.memory_space<vmem>>, vector<1x16xf32>
    %c0_81 = arith.constant 0 : index
    %c0_82 = arith.constant 0 : index
    %167 = vector.load %arg19[%c0_81, %c0_82] : memref<1x16xf32, #tpu.memory_space<vmem>>, vector<1x16xf32>
    %c0_83 = arith.constant 0 : index
    %c0_84 = arith.constant 0 : index
    %168 = vector.load %arg22[%c0_83, %c0_84] : memref<16x32xf32, #tpu.memory_space<vmem>>, vector<16x32xf32>
    %c0_85 = arith.constant 0 : index
    %c0_86 = arith.constant 0 : index
    %169 = vector.load %arg23[%c0_85, %c0_86] : memref<1x32xf32, #tpu.memory_space<vmem>>, vector<1x32xf32>
    %cst_87 = arith.constant dense<0.000000e+00> : vector<32xf32>
    %170 = vector.multi_reduction <add>, %161, %cst_87 [1] : vector<32x32xf32> to vector<32xf32>
    %171 = vector.shape_cast %170 : vector<32xf32> to vector<32x1xf32>
    %cst_88 = arith.constant 3.200000e+01 : f32
    %172 = vector.broadcast %cst_88 : f32 to vector<32x1xf32>
    %173 = arith.divf %171, %172 : vector<32x1xf32>
    %174 = vector.broadcast %173 : vector<32x1xf32> to vector<32x32xf32>
    %175 = arith.subf %161, %174 : vector<32x32xf32>
    %176 = arith.mulf %175, %175 : vector<32x32xf32>
    %cst_89 = arith.constant dense<0.000000e+00> : vector<32xf32>
    %177 = vector.multi_reduction <add>, %176, %cst_89 [1] : vector<32x32xf32> to vector<32xf32>
    %178 = vector.shape_cast %177 : vector<32xf32> to vector<32x1xf32>
    %cst_90 = arith.constant 3.200000e+01 : f32
    %179 = vector.broadcast %cst_90 : f32 to vector<32x1xf32>
    %180 = arith.divf %178, %179 : vector<32x1xf32>
    %cst_91 = arith.constant 9.99999974E-6 : f32
    %181 = vector.broadcast %cst_91 : f32 to vector<32x1xf32>
    %182 = arith.addf %180, %181 : vector<32x1xf32>
    %183 = math.rsqrt %182 : vector<32x1xf32>
    %184 = vector.broadcast %183 : vector<32x1xf32> to vector<32x32xf32>
    %185 = arith.mulf %175, %184 : vector<32x32xf32>
    %186 = vector.broadcast %162 : vector<1x32xf32> to vector<32x32xf32>
    %187 = arith.mulf %185, %186 : vector<32x32xf32>
    %188 = vector.broadcast %163 : vector<1x32xf32> to vector<32x32xf32>
    %189 = arith.addf %187, %188 : vector<32x32xf32>
    %cst_92 = arith.constant dense<0.000000e+00> : vector<32x32xf32>
    %190 = tpu.matmul %189, %164, %cst_92 {dimension_numbers = #tpu.dot_dimension_numbers<[1], [0], [0], [1], [0, 0, 1, 1], [], []>} : vector<32x32xf32>, vector<32x32xf32>, vector<32x32xf32> -> vector<32x32xf32>
    %191 = vector.broadcast %165 : vector<1x32xf32> to vector<32x32xf32>
    %192 = arith.addf %190, %191 : vector<32x32xf32>
    %cst_93 = arith.constant 5.000000e-01 : f32
    %193 = vector.broadcast %cst_93 : f32 to vector<32x32xf32>
    %194 = arith.mulf %193, %192 : vector<32x32xf32>
    %cst_94 = arith.constant 4.471500e-02 : f32
    %195 = vector.broadcast %cst_94 : f32 to vector<32x32xf32>
    %196 = arith.mulf %195, %192 : vector<32x32xf32>
    %197 = arith.mulf %196, %192 : vector<32x32xf32>
    %198 = arith.mulf %197, %192 : vector<32x32xf32>
    %199 = arith.addf %192, %198 : vector<32x32xf32>
    %cst_95 = arith.constant 0.797884583 : f32
    %200 = vector.broadcast %cst_95 : f32 to vector<32x32xf32>
    %201 = arith.mulf %200, %199 : vector<32x32xf32>
    %202 = math.tanh %201 : vector<32x32xf32>
    %cst_96 = arith.constant 1.000000e+00 : f32
    %203 = vector.broadcast %cst_96 : f32 to vector<32x32xf32>
    %204 = arith.addf %203, %202 : vector<32x32xf32>
    %205 = arith.mulf %194, %204 : vector<32x32xf32>
    %206 = vector.extract_strided_slice %205 {offsets = [0, 0], sizes = [32, 16], strides = [1, 1]} : vector<32x32xf32> to vector<32x16xf32>
    %207 = vector.extract_strided_slice %205 {offsets = [0, 16], sizes = [32, 16], strides = [1, 1]} : vector<32x32xf32> to vector<32x16xf32>
    %cst_97 = arith.constant dense<0.000000e+00> : vector<32xf32>
    %208 = vector.multi_reduction <add>, %207, %cst_97 [1] : vector<32x16xf32> to vector<32xf32>
    %209 = vector.shape_cast %208 : vector<32xf32> to vector<32x1xf32>
    %cst_98 = arith.constant 1.600000e+01 : f32
    %210 = vector.broadcast %cst_98 : f32 to vector<32x1xf32>
    %211 = arith.divf %209, %210 : vector<32x1xf32>
    %212 = vector.broadcast %211 : vector<32x1xf32> to vector<32x16xf32>
    %213 = arith.subf %207, %212 : vector<32x16xf32>
    %214 = arith.mulf %213, %213 : vector<32x16xf32>
    %cst_99 = arith.constant dense<0.000000e+00> : vector<32xf32>
    %215 = vector.multi_reduction <add>, %214, %cst_99 [1] : vector<32x16xf32> to vector<32xf32>
    %216 = vector.shape_cast %215 : vector<32xf32> to vector<32x1xf32>
    %cst_100 = arith.constant 1.600000e+01 : f32
    %217 = vector.broadcast %cst_100 : f32 to vector<32x1xf32>
    %218 = arith.divf %216, %217 : vector<32x1xf32>
    %cst_101 = arith.constant 9.99999974E-6 : f32
    %219 = vector.broadcast %cst_101 : f32 to vector<32x1xf32>
    %220 = arith.addf %218, %219 : vector<32x1xf32>
    %221 = math.rsqrt %220 : vector<32x1xf32>
    %222 = vector.broadcast %221 : vector<32x1xf32> to vector<32x16xf32>
    %223 = arith.mulf %213, %222 : vector<32x16xf32>
    %224 = vector.broadcast %166 : vector<1x16xf32> to vector<32x16xf32>
    %225 = arith.mulf %223, %224 : vector<32x16xf32>
    %226 = vector.broadcast %167 : vector<1x16xf32> to vector<32x16xf32>
    %227 = arith.addf %225, %226 : vector<32x16xf32>
    %228 = vector.extract_strided_slice %227 {offsets = [0, 0], sizes = [8, 16], strides = [1, 1]} : vector<32x16xf32> to vector<8x16xf32>
    %229 = vector.extract_strided_slice %227 {offsets = [8, 0], sizes = [8, 16], strides = [1, 1]} : vector<32x16xf32> to vector<8x16xf32>
    %230 = vector.extract_strided_slice %227 {offsets = [16, 0], sizes = [8, 16], strides = [1, 1]} : vector<32x16xf32> to vector<8x16xf32>
    %231 = vector.extract_strided_slice %227 {offsets = [24, 0], sizes = [8, 16], strides = [1, 1]} : vector<32x16xf32> to vector<8x16xf32>
    %c0_102 = arith.constant 0 : index
    %c0_103 = arith.constant 0 : index
    %232 = memref.load %arg20[%c0_102, %c0_103] : memref<4x4xf32, #tpu.memory_space<smem>>
    %233 = vector.broadcast %232 : f32 to vector<8x16xf32>
    %234 = arith.mulf %228, %233 : vector<8x16xf32>
    %c0_104 = arith.constant 0 : index
    %c1_105 = arith.constant 1 : index
    %235 = memref.load %arg20[%c0_104, %c1_105] : memref<4x4xf32, #tpu.memory_space<smem>>
    %236 = vector.broadcast %235 : f32 to vector<8x16xf32>
    %237 = arith.mulf %229, %236 : vector<8x16xf32>
    %238 = arith.addf %234, %237 : vector<8x16xf32>
    %c0_106 = arith.constant 0 : index
    %c2_107 = arith.constant 2 : index
    %239 = memref.load %arg20[%c0_106, %c2_107] : memref<4x4xf32, #tpu.memory_space<smem>>
    %240 = vector.broadcast %239 : f32 to vector<8x16xf32>
    %241 = arith.mulf %230, %240 : vector<8x16xf32>
    %242 = arith.addf %238, %241 : vector<8x16xf32>
    %c0_108 = arith.constant 0 : index
    %c3_109 = arith.constant 3 : index
    %243 = memref.load %arg20[%c0_108, %c3_109] : memref<4x4xf32, #tpu.memory_space<smem>>
    %244 = vector.broadcast %243 : f32 to vector<8x16xf32>
    %245 = arith.mulf %231, %244 : vector<8x16xf32>
    %246 = arith.addf %242, %245 : vector<8x16xf32>
    %c0_110 = arith.constant 0 : index
    %247 = memref.load %arg21[%c0_110] : memref<4xf32, #tpu.memory_space<smem>>
    %248 = vector.broadcast %247 : f32 to vector<8x16xf32>
    %249 = arith.addf %246, %248 : vector<8x16xf32>
    %250 = vector.extract_strided_slice %206 {offsets = [0, 0], sizes = [8, 16], strides = [1, 1]} : vector<32x16xf32> to vector<8x16xf32>
    %251 = arith.mulf %250, %249 : vector<8x16xf32>
    %c1_111 = arith.constant 1 : index
    %c0_112 = arith.constant 0 : index
    %252 = memref.load %arg20[%c1_111, %c0_112] : memref<4x4xf32, #tpu.memory_space<smem>>
    %253 = vector.broadcast %252 : f32 to vector<8x16xf32>
    %254 = arith.mulf %228, %253 : vector<8x16xf32>
    %c1_113 = arith.constant 1 : index
    %c1_114 = arith.constant 1 : index
    %255 = memref.load %arg20[%c1_113, %c1_114] : memref<4x4xf32, #tpu.memory_space<smem>>
    %256 = vector.broadcast %255 : f32 to vector<8x16xf32>
    %257 = arith.mulf %229, %256 : vector<8x16xf32>
    %258 = arith.addf %254, %257 : vector<8x16xf32>
    %c1_115 = arith.constant 1 : index
    %c2_116 = arith.constant 2 : index
    %259 = memref.load %arg20[%c1_115, %c2_116] : memref<4x4xf32, #tpu.memory_space<smem>>
    %260 = vector.broadcast %259 : f32 to vector<8x16xf32>
    %261 = arith.mulf %230, %260 : vector<8x16xf32>
    %262 = arith.addf %258, %261 : vector<8x16xf32>
    %c1_117 = arith.constant 1 : index
    %c3_118 = arith.constant 3 : index
    %263 = memref.load %arg20[%c1_117, %c3_118] : memref<4x4xf32, #tpu.memory_space<smem>>
    %264 = vector.broadcast %263 : f32 to vector<8x16xf32>
    %265 = arith.mulf %231, %264 : vector<8x16xf32>
    %266 = arith.addf %262, %265 : vector<8x16xf32>
    %c1_119 = arith.constant 1 : index
    %267 = memref.load %arg21[%c1_119] : memref<4xf32, #tpu.memory_space<smem>>
    %268 = vector.broadcast %267 : f32 to vector<8x16xf32>
    %269 = arith.addf %266, %268 : vector<8x16xf32>
    %270 = vector.extract_strided_slice %206 {offsets = [8, 0], sizes = [8, 16], strides = [1, 1]} : vector<32x16xf32> to vector<8x16xf32>
    %271 = arith.mulf %270, %269 : vector<8x16xf32>
    %c2_120 = arith.constant 2 : index
    %c0_121 = arith.constant 0 : index
    %272 = memref.load %arg20[%c2_120, %c0_121] : memref<4x4xf32, #tpu.memory_space<smem>>
    %273 = vector.broadcast %272 : f32 to vector<8x16xf32>
    %274 = arith.mulf %228, %273 : vector<8x16xf32>
    %c2_122 = arith.constant 2 : index
    %c1_123 = arith.constant 1 : index
    %275 = memref.load %arg20[%c2_122, %c1_123] : memref<4x4xf32, #tpu.memory_space<smem>>
    %276 = vector.broadcast %275 : f32 to vector<8x16xf32>
    %277 = arith.mulf %229, %276 : vector<8x16xf32>
    %278 = arith.addf %274, %277 : vector<8x16xf32>
    %c2_124 = arith.constant 2 : index
    %c2_125 = arith.constant 2 : index
    %279 = memref.load %arg20[%c2_124, %c2_125] : memref<4x4xf32, #tpu.memory_space<smem>>
    %280 = vector.broadcast %279 : f32 to vector<8x16xf32>
    %281 = arith.mulf %230, %280 : vector<8x16xf32>
    %282 = arith.addf %278, %281 : vector<8x16xf32>
    %c2_126 = arith.constant 2 : index
    %c3_127 = arith.constant 3 : index
    %283 = memref.load %arg20[%c2_126, %c3_127] : memref<4x4xf32, #tpu.memory_space<smem>>
    %284 = vector.broadcast %283 : f32 to vector<8x16xf32>
    %285 = arith.mulf %231, %284 : vector<8x16xf32>
    %286 = arith.addf %282, %285 : vector<8x16xf32>
    %c2_128 = arith.constant 2 : index
    %287 = memref.load %arg21[%c2_128] : memref<4xf32, #tpu.memory_space<smem>>
    %288 = vector.broadcast %287 : f32 to vector<8x16xf32>
    %289 = arith.addf %286, %288 : vector<8x16xf32>
    %290 = vector.extract_strided_slice %206 {offsets = [16, 0], sizes = [8, 16], strides = [1, 1]} : vector<32x16xf32> to vector<8x16xf32>
    %291 = arith.mulf %290, %289 : vector<8x16xf32>
    %c3_129 = arith.constant 3 : index
    %c0_130 = arith.constant 0 : index
    %292 = memref.load %arg20[%c3_129, %c0_130] : memref<4x4xf32, #tpu.memory_space<smem>>
    %293 = vector.broadcast %292 : f32 to vector<8x16xf32>
    %294 = arith.mulf %228, %293 : vector<8x16xf32>
    %c3_131 = arith.constant 3 : index
    %c1_132 = arith.constant 1 : index
    %295 = memref.load %arg20[%c3_131, %c1_132] : memref<4x4xf32, #tpu.memory_space<smem>>
    %296 = vector.broadcast %295 : f32 to vector<8x16xf32>
    %297 = arith.mulf %229, %296 : vector<8x16xf32>
    %298 = arith.addf %294, %297 : vector<8x16xf32>
    %c3_133 = arith.constant 3 : index
    %c2_134 = arith.constant 2 : index
    %299 = memref.load %arg20[%c3_133, %c2_134] : memref<4x4xf32, #tpu.memory_space<smem>>
    %300 = vector.broadcast %299 : f32 to vector<8x16xf32>
    %301 = arith.mulf %230, %300 : vector<8x16xf32>
    %302 = arith.addf %298, %301 : vector<8x16xf32>
    %c3_135 = arith.constant 3 : index
    %c3_136 = arith.constant 3 : index
    %303 = memref.load %arg20[%c3_135, %c3_136] : memref<4x4xf32, #tpu.memory_space<smem>>
    %304 = vector.broadcast %303 : f32 to vector<8x16xf32>
    %305 = arith.mulf %231, %304 : vector<8x16xf32>
    %306 = arith.addf %302, %305 : vector<8x16xf32>
    %c3_137 = arith.constant 3 : index
    %307 = memref.load %arg21[%c3_137] : memref<4xf32, #tpu.memory_space<smem>>
    %308 = vector.broadcast %307 : f32 to vector<8x16xf32>
    %309 = arith.addf %306, %308 : vector<8x16xf32>
    %310 = vector.extract_strided_slice %206 {offsets = [24, 0], sizes = [8, 16], strides = [1, 1]} : vector<32x16xf32> to vector<8x16xf32>
    %311 = arith.mulf %310, %309 : vector<8x16xf32>
    %312 = tpu.concatenate %251, %271, %291, %311 in 0 : vector<8x16xf32>, vector<8x16xf32>, vector<8x16xf32>, vector<8x16xf32> -> vector<32x16xf32>
    %cst_138 = arith.constant dense<0.000000e+00> : vector<32x32xf32>
    %313 = tpu.matmul %312, %168, %cst_138 {dimension_numbers = #tpu.dot_dimension_numbers<[1], [0], [0], [1], [0, 0, 1, 1], [], []>} : vector<32x16xf32>, vector<16x32xf32>, vector<32x32xf32> -> vector<32x32xf32>
    %314 = vector.broadcast %169 : vector<1x32xf32> to vector<32x32xf32>
    %315 = arith.addf %313, %314 : vector<32x32xf32>
    %316 = arith.addf %161, %315 : vector<32x32xf32>
    %c0_139 = arith.constant 0 : index
    %c0_140 = arith.constant 0 : index
    %317 = vector.load %arg24[%c0_139, %c0_140] : memref<128x160xf32, #tpu.memory_space<vmem>>, vector<128x160xf32>
    %c0_141 = arith.constant 0 : index
    %c0_142 = arith.constant 0 : index
    %318 = vector.load %arg25[%c0_141, %c0_142] : memref<1x160xf32, #tpu.memory_space<vmem>>, vector<1x160xf32>
    %c0_143 = arith.constant 0 : index
    %c0_144 = arith.constant 0 : index
    %319 = vector.load %arg26[%c0_143, %c0_144] : memref<160x32xf32, #tpu.memory_space<vmem>>, vector<160x32xf32>
    %c0_145 = arith.constant 0 : index
    %c0_146 = arith.constant 0 : index
    %320 = vector.load %arg27[%c0_145, %c0_146] : memref<1x32xf32, #tpu.memory_space<vmem>>, vector<1x32xf32>
    %321 = vector.extract_strided_slice %316 {offsets = [0, 0], sizes = [8, 32], strides = [1, 1]} : vector<32x32xf32> to vector<8x32xf32>
    %322 = vector.extract_strided_slice %317 {offsets = [0, 0], sizes = [32, 160], strides = [1, 1]} : vector<128x160xf32> to vector<32x160xf32>
    %cst_147 = arith.constant dense<0.000000e+00> : vector<8x160xf32>
    %323 = tpu.matmul %321, %322, %cst_147 {dimension_numbers = #tpu.dot_dimension_numbers<[1], [0], [0], [1], [0, 0, 1, 1], [], []>} : vector<8x32xf32>, vector<32x160xf32>, vector<8x160xf32> -> vector<8x160xf32>
    %324 = vector.extract_strided_slice %316 {offsets = [8, 0], sizes = [8, 32], strides = [1, 1]} : vector<32x32xf32> to vector<8x32xf32>
    %325 = vector.extract_strided_slice %317 {offsets = [32, 0], sizes = [32, 160], strides = [1, 1]} : vector<128x160xf32> to vector<32x160xf32>
    %cst_148 = arith.constant dense<0.000000e+00> : vector<8x160xf32>
    %326 = tpu.matmul %324, %325, %cst_148 {dimension_numbers = #tpu.dot_dimension_numbers<[1], [0], [0], [1], [0, 0, 1, 1], [], []>} : vector<8x32xf32>, vector<32x160xf32>, vector<8x160xf32> -> vector<8x160xf32>
    %327 = arith.addf %323, %326 : vector<8x160xf32>
    %328 = vector.extract_strided_slice %316 {offsets = [16, 0], sizes = [8, 32], strides = [1, 1]} : vector<32x32xf32> to vector<8x32xf32>
    %329 = vector.extract_strided_slice %317 {offsets = [64, 0], sizes = [32, 160], strides = [1, 1]} : vector<128x160xf32> to vector<32x160xf32>
    %cst_149 = arith.constant dense<0.000000e+00> : vector<8x160xf32>
    %330 = tpu.matmul %328, %329, %cst_149 {dimension_numbers = #tpu.dot_dimension_numbers<[1], [0], [0], [1], [0, 0, 1, 1], [], []>} : vector<8x32xf32>, vector<32x160xf32>, vector<8x160xf32> -> vector<8x160xf32>
    %331 = arith.addf %327, %330 : vector<8x160xf32>
    %332 = vector.extract_strided_slice %316 {offsets = [24, 0], sizes = [8, 32], strides = [1, 1]} : vector<32x32xf32> to vector<8x32xf32>
    %333 = vector.extract_strided_slice %317 {offsets = [96, 0], sizes = [32, 160], strides = [1, 1]} : vector<128x160xf32> to vector<32x160xf32>
    %cst_150 = arith.constant dense<0.000000e+00> : vector<8x160xf32>
    %334 = tpu.matmul %332, %333, %cst_150 {dimension_numbers = #tpu.dot_dimension_numbers<[1], [0], [0], [1], [0, 0, 1, 1], [], []>} : vector<8x32xf32>, vector<32x160xf32>, vector<8x160xf32> -> vector<8x160xf32>
    %335 = arith.addf %331, %334 : vector<8x160xf32>
    %336 = vector.broadcast %318 : vector<1x160xf32> to vector<8x160xf32>
    %337 = arith.addf %335, %336 : vector<8x160xf32>
    %cst_151 = arith.constant 5.000000e-01 : f32
    %338 = vector.broadcast %cst_151 : f32 to vector<8x160xf32>
    %339 = arith.mulf %338, %337 : vector<8x160xf32>
    %cst_152 = arith.constant 4.471500e-02 : f32
    %340 = vector.broadcast %cst_152 : f32 to vector<8x160xf32>
    %341 = arith.mulf %340, %337 : vector<8x160xf32>
    %342 = arith.mulf %341, %337 : vector<8x160xf32>
    %343 = arith.mulf %342, %337 : vector<8x160xf32>
    %344 = arith.addf %337, %343 : vector<8x160xf32>
    %cst_153 = arith.constant 0.797884583 : f32
    %345 = vector.broadcast %cst_153 : f32 to vector<8x160xf32>
    %346 = arith.mulf %345, %344 : vector<8x160xf32>
    %347 = math.tanh %346 : vector<8x160xf32>
    %cst_154 = arith.constant 1.000000e+00 : f32
    %348 = vector.broadcast %cst_154 : f32 to vector<8x160xf32>
    %349 = arith.addf %348, %347 : vector<8x160xf32>
    %350 = arith.mulf %339, %349 : vector<8x160xf32>
    %cst_155 = arith.constant dense<0.000000e+00> : vector<8x32xf32>
    %351 = tpu.matmul %350, %319, %cst_155 {dimension_numbers = #tpu.dot_dimension_numbers<[1], [0], [0], [1], [0, 0, 1, 1], [], []>} : vector<8x160xf32>, vector<160x32xf32>, vector<8x32xf32> -> vector<8x32xf32>
    %352 = vector.broadcast %320 : vector<1x32xf32> to vector<8x32xf32>
    %353 = arith.addf %351, %352 : vector<8x32xf32>
    %c0_156 = arith.constant 0 : index
    %c0_157 = arith.constant 0 : index
    %354 = vector.load %arg28[%c0_156, %c0_157] : memref<1x32xf32, #tpu.memory_space<vmem>>, vector<1x32xf32>
    %c0_158 = arith.constant 0 : index
    %c0_159 = arith.constant 0 : index
    %355 = vector.load %arg29[%c0_158, %c0_159] : memref<1x32xf32, #tpu.memory_space<vmem>>, vector<1x32xf32>
    %c0_160 = arith.constant 0 : index
    %c0_161 = arith.constant 0 : index
    %356 = vector.load %arg30[%c0_160, %c0_161] : memref<32x128xf32, #tpu.memory_space<vmem>>, vector<32x128xf32>
    %c0_162 = arith.constant 0 : index
    %c0_163 = arith.constant 0 : index
    %357 = vector.load %arg31[%c0_162, %c0_163] : memref<1x128xf32, #tpu.memory_space<vmem>>, vector<1x128xf32>
    %c0_164 = arith.constant 0 : index
    %c0_165 = arith.constant 0 : index
    %358 = vector.load %arg32[%c0_164, %c0_165] : memref<1x128xf32, #tpu.memory_space<vmem>>, vector<1x128xf32>
    %c0_166 = arith.constant 0 : index
    %c0_167 = arith.constant 0 : index
    %359 = vector.load %arg33[%c0_166, %c0_167] : memref<128x32xf32, #tpu.memory_space<vmem>>, vector<128x32xf32>
    %c0_168 = arith.constant 0 : index
    %c0_169 = arith.constant 0 : index
    %360 = vector.load %arg34[%c0_168, %c0_169] : memref<1x32xf32, #tpu.memory_space<vmem>>, vector<1x32xf32>
    %c0_170 = arith.constant 0 : index
    %c0_171 = arith.constant 0 : index
    %361 = vector.load %arg35[%c0_170, %c0_171] : memref<32x32xf32, #tpu.memory_space<vmem>>, vector<32x32xf32>
    %c0_172 = arith.constant 0 : index
    %c0_173 = arith.constant 0 : index
    %362 = vector.load %arg36[%c0_172, %c0_173] : memref<1x32xf32, #tpu.memory_space<vmem>>, vector<1x32xf32>
    %cst_174 = arith.constant dense<0.000000e+00> : vector<8xf32>
    %363 = vector.multi_reduction <add>, %353, %cst_174 [1] : vector<8x32xf32> to vector<8xf32>
    %364 = vector.shape_cast %363 : vector<8xf32> to vector<8x1xf32>
    %cst_175 = arith.constant 3.200000e+01 : f32
    %365 = vector.broadcast %cst_175 : f32 to vector<8x1xf32>
    %366 = arith.divf %364, %365 : vector<8x1xf32>
    %367 = vector.broadcast %366 : vector<8x1xf32> to vector<8x32xf32>
    %368 = arith.subf %353, %367 : vector<8x32xf32>
    %369 = arith.mulf %368, %368 : vector<8x32xf32>
    %cst_176 = arith.constant dense<0.000000e+00> : vector<8xf32>
    %370 = vector.multi_reduction <add>, %369, %cst_176 [1] : vector<8x32xf32> to vector<8xf32>
    %371 = vector.shape_cast %370 : vector<8xf32> to vector<8x1xf32>
    %cst_177 = arith.constant 3.200000e+01 : f32
    %372 = vector.broadcast %cst_177 : f32 to vector<8x1xf32>
    %373 = arith.divf %371, %372 : vector<8x1xf32>
    %cst_178 = arith.constant 9.99999974E-6 : f32
    %374 = vector.broadcast %cst_178 : f32 to vector<8x1xf32>
    %375 = arith.addf %373, %374 : vector<8x1xf32>
    %376 = math.rsqrt %375 : vector<8x1xf32>
    %377 = vector.broadcast %376 : vector<8x1xf32> to vector<8x32xf32>
    %378 = arith.mulf %368, %377 : vector<8x32xf32>
    %379 = vector.broadcast %354 : vector<1x32xf32> to vector<8x32xf32>
    %380 = arith.mulf %378, %379 : vector<8x32xf32>
    %381 = vector.broadcast %355 : vector<1x32xf32> to vector<8x32xf32>
    %382 = arith.addf %380, %381 : vector<8x32xf32>
    %cst_179 = arith.constant dense<0.000000e+00> : vector<8x128xf32>
    %383 = tpu.matmul %382, %356, %cst_179 {dimension_numbers = #tpu.dot_dimension_numbers<[1], [0], [0], [1], [0, 0, 1, 1], [], []>} : vector<8x32xf32>, vector<32x128xf32>, vector<8x128xf32> -> vector<8x128xf32>
    %cst_180 = arith.constant 0.000000e+00 : f32
    %384 = vector.broadcast %cst_180 : f32 to vector<1x128xf32>
    %385 = arith.mulf %357, %384 : vector<1x128xf32>
    %c64_i32 = arith.constant 64 : i32
    %386 = tpu.dynamic_rotate %384 by %c64_i32 dim 1 : vector<1x128xf32>, i32 -> vector<1x128xf32>
    %387 = arith.mulf %358, %386 : vector<1x128xf32>
    %388 = arith.addf %385, %387 : vector<1x128xf32>
    %389 = vector.extract_strided_slice %383 {offsets = [0, 0], sizes = [1, 128], strides = [1, 1]} : vector<8x128xf32> to vector<1x128xf32>
    %390 = arith.addf %388, %389 : vector<1x128xf32>
    %391 = arith.mulf %357, %390 : vector<1x128xf32>
    %c64_i32_181 = arith.constant 64 : i32
    %392 = tpu.dynamic_rotate %390 by %c64_i32_181 dim 1 : vector<1x128xf32>, i32 -> vector<1x128xf32>
    %393 = arith.mulf %358, %392 : vector<1x128xf32>
    %394 = arith.addf %391, %393 : vector<1x128xf32>
    %395 = vector.extract_strided_slice %383 {offsets = [1, 0], sizes = [1, 128], strides = [1, 1]} : vector<8x128xf32> to vector<1x128xf32>
    %396 = arith.addf %394, %395 : vector<1x128xf32>
    %397 = arith.mulf %357, %396 : vector<1x128xf32>
    %c64_i32_182 = arith.constant 64 : i32
    %398 = tpu.dynamic_rotate %396 by %c64_i32_182 dim 1 : vector<1x128xf32>, i32 -> vector<1x128xf32>
    %399 = arith.mulf %358, %398 : vector<1x128xf32>
    %400 = arith.addf %397, %399 : vector<1x128xf32>
    %401 = vector.extract_strided_slice %383 {offsets = [2, 0], sizes = [1, 128], strides = [1, 1]} : vector<8x128xf32> to vector<1x128xf32>
    %402 = arith.addf %400, %401 : vector<1x128xf32>
    %403 = arith.mulf %357, %402 : vector<1x128xf32>
    %c64_i32_183 = arith.constant 64 : i32
    %404 = tpu.dynamic_rotate %402 by %c64_i32_183 dim 1 : vector<1x128xf32>, i32 -> vector<1x128xf32>
    %405 = arith.mulf %358, %404 : vector<1x128xf32>
    %406 = arith.addf %403, %405 : vector<1x128xf32>
    %407 = vector.extract_strided_slice %383 {offsets = [3, 0], sizes = [1, 128], strides = [1, 1]} : vector<8x128xf32> to vector<1x128xf32>
    %408 = arith.addf %406, %407 : vector<1x128xf32>
    %409 = arith.mulf %357, %408 : vector<1x128xf32>
    %c64_i32_184 = arith.constant 64 : i32
    %410 = tpu.dynamic_rotate %408 by %c64_i32_184 dim 1 : vector<1x128xf32>, i32 -> vector<1x128xf32>
    %411 = arith.mulf %358, %410 : vector<1x128xf32>
    %412 = arith.addf %409, %411 : vector<1x128xf32>
    %413 = vector.extract_strided_slice %383 {offsets = [4, 0], sizes = [1, 128], strides = [1, 1]} : vector<8x128xf32> to vector<1x128xf32>
    %414 = arith.addf %412, %413 : vector<1x128xf32>
    %415 = arith.mulf %357, %414 : vector<1x128xf32>
    %c64_i32_185 = arith.constant 64 : i32
    %416 = tpu.dynamic_rotate %414 by %c64_i32_185 dim 1 : vector<1x128xf32>, i32 -> vector<1x128xf32>
    %417 = arith.mulf %358, %416 : vector<1x128xf32>
    %418 = arith.addf %415, %417 : vector<1x128xf32>
    %419 = vector.extract_strided_slice %383 {offsets = [5, 0], sizes = [1, 128], strides = [1, 1]} : vector<8x128xf32> to vector<1x128xf32>
    %420 = arith.addf %418, %419 : vector<1x128xf32>
    %421 = arith.mulf %357, %420 : vector<1x128xf32>
    %c64_i32_186 = arith.constant 64 : i32
    %422 = tpu.dynamic_rotate %420 by %c64_i32_186 dim 1 : vector<1x128xf32>, i32 -> vector<1x128xf32>
    %423 = arith.mulf %358, %422 : vector<1x128xf32>
    %424 = arith.addf %421, %423 : vector<1x128xf32>
    %425 = vector.extract_strided_slice %383 {offsets = [6, 0], sizes = [1, 128], strides = [1, 1]} : vector<8x128xf32> to vector<1x128xf32>
    %426 = arith.addf %424, %425 : vector<1x128xf32>
    %427 = arith.mulf %357, %426 : vector<1x128xf32>
    %c64_i32_187 = arith.constant 64 : i32
    %428 = tpu.dynamic_rotate %426 by %c64_i32_187 dim 1 : vector<1x128xf32>, i32 -> vector<1x128xf32>
    %429 = arith.mulf %358, %428 : vector<1x128xf32>
    %430 = arith.addf %427, %429 : vector<1x128xf32>
    %431 = vector.extract_strided_slice %383 {offsets = [7, 0], sizes = [1, 128], strides = [1, 1]} : vector<8x128xf32> to vector<1x128xf32>
    %432 = arith.addf %430, %431 : vector<1x128xf32>
    %433 = tpu.concatenate %390, %396, %402, %408, %414, %420, %426, %432 in 0 : vector<1x128xf32>, vector<1x128xf32>, vector<1x128xf32>, vector<1x128xf32>, vector<1x128xf32>, vector<1x128xf32>, vector<1x128xf32>, vector<1x128xf32> -> vector<8x128xf32>
    %cst_188 = arith.constant dense<0.000000e+00> : vector<8x32xf32>
    %434 = tpu.matmul %433, %359, %cst_188 {dimension_numbers = #tpu.dot_dimension_numbers<[1], [0], [0], [1], [0, 0, 1, 1], [], []>} : vector<8x128xf32>, vector<128x32xf32>, vector<8x32xf32> -> vector<8x32xf32>
    %435 = vector.broadcast %360 : vector<1x32xf32> to vector<8x32xf32>
    %436 = arith.mulf %382, %435 : vector<8x32xf32>
    %437 = arith.addf %434, %436 : vector<8x32xf32>
    %cst_189 = arith.constant 5.000000e-01 : f32
    %438 = vector.broadcast %cst_189 : f32 to vector<8x32xf32>
    %439 = arith.mulf %438, %437 : vector<8x32xf32>
    %cst_190 = arith.constant 4.471500e-02 : f32
    %440 = vector.broadcast %cst_190 : f32 to vector<8x32xf32>
    %441 = arith.mulf %440, %437 : vector<8x32xf32>
    %442 = arith.mulf %441, %437 : vector<8x32xf32>
    %443 = arith.mulf %442, %437 : vector<8x32xf32>
    %444 = arith.addf %437, %443 : vector<8x32xf32>
    %cst_191 = arith.constant 0.797884583 : f32
    %445 = vector.broadcast %cst_191 : f32 to vector<8x32xf32>
    %446 = arith.mulf %445, %444 : vector<8x32xf32>
    %447 = math.tanh %446 : vector<8x32xf32>
    %cst_192 = arith.constant 1.000000e+00 : f32
    %448 = vector.broadcast %cst_192 : f32 to vector<8x32xf32>
    %449 = arith.addf %448, %447 : vector<8x32xf32>
    %450 = arith.mulf %439, %449 : vector<8x32xf32>
    %cst_193 = arith.constant dense<0.000000e+00> : vector<8x32xf32>
    %451 = tpu.matmul %450, %361, %cst_193 {dimension_numbers = #tpu.dot_dimension_numbers<[1], [0], [0], [1], [0, 0, 1, 1], [], []>} : vector<8x32xf32>, vector<32x32xf32>, vector<8x32xf32> -> vector<8x32xf32>
    %452 = vector.broadcast %362 : vector<1x32xf32> to vector<8x32xf32>
    %453 = arith.addf %451, %452 : vector<8x32xf32>
    %454 = arith.addf %353, %453 : vector<8x32xf32>
    %c0_194 = arith.constant 0 : index
    %c0_195 = arith.constant 0 : index
    %455 = vector.load %arg37[%c0_194, %c0_195] : memref<1x32xf32, #tpu.memory_space<vmem>>, vector<1x32xf32>
    %c0_196 = arith.constant 0 : index
    %c0_197 = arith.constant 0 : index
    %456 = vector.load %arg38[%c0_196, %c0_197] : memref<1x32xf32, #tpu.memory_space<vmem>>, vector<1x32xf32>
    %c0_198 = arith.constant 0 : index
    %c0_199 = arith.constant 0 : index
    %457 = vector.load %arg39[%c0_198, %c0_199] : memref<32x128xf32, #tpu.memory_space<vmem>>, vector<32x128xf32>
    %c0_200 = arith.constant 0 : index
    %c0_201 = arith.constant 0 : index
    %458 = vector.load %arg40[%c0_200, %c0_201] : memref<1x128xf32, #tpu.memory_space<vmem>>, vector<1x128xf32>
    %c0_202 = arith.constant 0 : index
    %c0_203 = arith.constant 0 : index
    %459 = vector.load %arg41[%c0_202, %c0_203] : memref<1x128xf32, #tpu.memory_space<vmem>>, vector<1x128xf32>
    %c0_204 = arith.constant 0 : index
    %c0_205 = arith.constant 0 : index
    %460 = vector.load %arg42[%c0_204, %c0_205] : memref<128x32xf32, #tpu.memory_space<vmem>>, vector<128x32xf32>
    %c0_206 = arith.constant 0 : index
    %c0_207 = arith.constant 0 : index
    %461 = vector.load %arg43[%c0_206, %c0_207] : memref<1x32xf32, #tpu.memory_space<vmem>>, vector<1x32xf32>
    %c0_208 = arith.constant 0 : index
    %c0_209 = arith.constant 0 : index
    %462 = vector.load %arg44[%c0_208, %c0_209] : memref<32x32xf32, #tpu.memory_space<vmem>>, vector<32x32xf32>
    %c0_210 = arith.constant 0 : index
    %c0_211 = arith.constant 0 : index
    %463 = vector.load %arg45[%c0_210, %c0_211] : memref<1x32xf32, #tpu.memory_space<vmem>>, vector<1x32xf32>
    %cst_212 = arith.constant dense<0.000000e+00> : vector<8xf32>
    %464 = vector.multi_reduction <add>, %454, %cst_212 [1] : vector<8x32xf32> to vector<8xf32>
    %465 = vector.shape_cast %464 : vector<8xf32> to vector<8x1xf32>
    %cst_213 = arith.constant 3.200000e+01 : f32
    %466 = vector.broadcast %cst_213 : f32 to vector<8x1xf32>
    %467 = arith.divf %465, %466 : vector<8x1xf32>
    %468 = vector.broadcast %467 : vector<8x1xf32> to vector<8x32xf32>
    %469 = arith.subf %454, %468 : vector<8x32xf32>
    %470 = arith.mulf %469, %469 : vector<8x32xf32>
    %cst_214 = arith.constant dense<0.000000e+00> : vector<8xf32>
    %471 = vector.multi_reduction <add>, %470, %cst_214 [1] : vector<8x32xf32> to vector<8xf32>
    %472 = vector.shape_cast %471 : vector<8xf32> to vector<8x1xf32>
    %cst_215 = arith.constant 3.200000e+01 : f32
    %473 = vector.broadcast %cst_215 : f32 to vector<8x1xf32>
    %474 = arith.divf %472, %473 : vector<8x1xf32>
    %cst_216 = arith.constant 9.99999974E-6 : f32
    %475 = vector.broadcast %cst_216 : f32 to vector<8x1xf32>
    %476 = arith.addf %474, %475 : vector<8x1xf32>
    %477 = math.rsqrt %476 : vector<8x1xf32>
    %478 = vector.broadcast %477 : vector<8x1xf32> to vector<8x32xf32>
    %479 = arith.mulf %469, %478 : vector<8x32xf32>
    %480 = vector.broadcast %455 : vector<1x32xf32> to vector<8x32xf32>
    %481 = arith.mulf %479, %480 : vector<8x32xf32>
    %482 = vector.broadcast %456 : vector<1x32xf32> to vector<8x32xf32>
    %483 = arith.addf %481, %482 : vector<8x32xf32>
    %cst_217 = arith.constant dense<0.000000e+00> : vector<8x128xf32>
    %484 = tpu.matmul %483, %457, %cst_217 {dimension_numbers = #tpu.dot_dimension_numbers<[1], [0], [0], [1], [0, 0, 1, 1], [], []>} : vector<8x32xf32>, vector<32x128xf32>, vector<8x128xf32> -> vector<8x128xf32>
    %cst_218 = arith.constant 0.000000e+00 : f32
    %485 = vector.broadcast %cst_218 : f32 to vector<1x128xf32>
    %486 = arith.mulf %458, %485 : vector<1x128xf32>
    %c64_i32_219 = arith.constant 64 : i32
    %487 = tpu.dynamic_rotate %485 by %c64_i32_219 dim 1 : vector<1x128xf32>, i32 -> vector<1x128xf32>
    %488 = arith.mulf %459, %487 : vector<1x128xf32>
    %489 = arith.addf %486, %488 : vector<1x128xf32>
    %490 = vector.extract_strided_slice %484 {offsets = [0, 0], sizes = [1, 128], strides = [1, 1]} : vector<8x128xf32> to vector<1x128xf32>
    %491 = arith.addf %489, %490 : vector<1x128xf32>
    %492 = arith.mulf %458, %491 : vector<1x128xf32>
    %c64_i32_220 = arith.constant 64 : i32
    %493 = tpu.dynamic_rotate %491 by %c64_i32_220 dim 1 : vector<1x128xf32>, i32 -> vector<1x128xf32>
    %494 = arith.mulf %459, %493 : vector<1x128xf32>
    %495 = arith.addf %492, %494 : vector<1x128xf32>
    %496 = vector.extract_strided_slice %484 {offsets = [1, 0], sizes = [1, 128], strides = [1, 1]} : vector<8x128xf32> to vector<1x128xf32>
    %497 = arith.addf %495, %496 : vector<1x128xf32>
    %498 = arith.mulf %458, %497 : vector<1x128xf32>
    %c64_i32_221 = arith.constant 64 : i32
    %499 = tpu.dynamic_rotate %497 by %c64_i32_221 dim 1 : vector<1x128xf32>, i32 -> vector<1x128xf32>
    %500 = arith.mulf %459, %499 : vector<1x128xf32>
    %501 = arith.addf %498, %500 : vector<1x128xf32>
    %502 = vector.extract_strided_slice %484 {offsets = [2, 0], sizes = [1, 128], strides = [1, 1]} : vector<8x128xf32> to vector<1x128xf32>
    %503 = arith.addf %501, %502 : vector<1x128xf32>
    %504 = arith.mulf %458, %503 : vector<1x128xf32>
    %c64_i32_222 = arith.constant 64 : i32
    %505 = tpu.dynamic_rotate %503 by %c64_i32_222 dim 1 : vector<1x128xf32>, i32 -> vector<1x128xf32>
    %506 = arith.mulf %459, %505 : vector<1x128xf32>
    %507 = arith.addf %504, %506 : vector<1x128xf32>
    %508 = vector.extract_strided_slice %484 {offsets = [3, 0], sizes = [1, 128], strides = [1, 1]} : vector<8x128xf32> to vector<1x128xf32>
    %509 = arith.addf %507, %508 : vector<1x128xf32>
    %510 = arith.mulf %458, %509 : vector<1x128xf32>
    %c64_i32_223 = arith.constant 64 : i32
    %511 = tpu.dynamic_rotate %509 by %c64_i32_223 dim 1 : vector<1x128xf32>, i32 -> vector<1x128xf32>
    %512 = arith.mulf %459, %511 : vector<1x128xf32>
    %513 = arith.addf %510, %512 : vector<1x128xf32>
    %514 = vector.extract_strided_slice %484 {offsets = [4, 0], sizes = [1, 128], strides = [1, 1]} : vector<8x128xf32> to vector<1x128xf32>
    %515 = arith.addf %513, %514 : vector<1x128xf32>
    %516 = arith.mulf %458, %515 : vector<1x128xf32>
    %c64_i32_224 = arith.constant 64 : i32
    %517 = tpu.dynamic_rotate %515 by %c64_i32_224 dim 1 : vector<1x128xf32>, i32 -> vector<1x128xf32>
    %518 = arith.mulf %459, %517 : vector<1x128xf32>
    %519 = arith.addf %516, %518 : vector<1x128xf32>
    %520 = vector.extract_strided_slice %484 {offsets = [5, 0], sizes = [1, 128], strides = [1, 1]} : vector<8x128xf32> to vector<1x128xf32>
    %521 = arith.addf %519, %520 : vector<1x128xf32>
    %522 = arith.mulf %458, %521 : vector<1x128xf32>
    %c64_i32_225 = arith.constant 64 : i32
    %523 = tpu.dynamic_rotate %521 by %c64_i32_225 dim 1 : vector<1x128xf32>, i32 -> vector<1x128xf32>
    %524 = arith.mulf %459, %523 : vector<1x128xf32>
    %525 = arith.addf %522, %524 : vector<1x128xf32>
    %526 = vector.extract_strided_slice %484 {offsets = [6, 0], sizes = [1, 128], strides = [1, 1]} : vector<8x128xf32> to vector<1x128xf32>
    %527 = arith.addf %525, %526 : vector<1x128xf32>
    %528 = arith.mulf %458, %527 : vector<1x128xf32>
    %c64_i32_226 = arith.constant 64 : i32
    %529 = tpu.dynamic_rotate %527 by %c64_i32_226 dim 1 : vector<1x128xf32>, i32 -> vector<1x128xf32>
    %530 = arith.mulf %459, %529 : vector<1x128xf32>
    %531 = arith.addf %528, %530 : vector<1x128xf32>
    %532 = vector.extract_strided_slice %484 {offsets = [7, 0], sizes = [1, 128], strides = [1, 1]} : vector<8x128xf32> to vector<1x128xf32>
    %533 = arith.addf %531, %532 : vector<1x128xf32>
    %534 = tpu.concatenate %491, %497, %503, %509, %515, %521, %527, %533 in 0 : vector<1x128xf32>, vector<1x128xf32>, vector<1x128xf32>, vector<1x128xf32>, vector<1x128xf32>, vector<1x128xf32>, vector<1x128xf32>, vector<1x128xf32> -> vector<8x128xf32>
    %cst_227 = arith.constant dense<0.000000e+00> : vector<8x32xf32>
    %535 = tpu.matmul %534, %460, %cst_227 {dimension_numbers = #tpu.dot_dimension_numbers<[1], [0], [0], [1], [0, 0, 1, 1], [], []>} : vector<8x128xf32>, vector<128x32xf32>, vector<8x32xf32> -> vector<8x32xf32>
    %536 = vector.broadcast %461 : vector<1x32xf32> to vector<8x32xf32>
    %537 = arith.mulf %483, %536 : vector<8x32xf32>
    %538 = arith.addf %535, %537 : vector<8x32xf32>
    %cst_228 = arith.constant 5.000000e-01 : f32
    %539 = vector.broadcast %cst_228 : f32 to vector<8x32xf32>
    %540 = arith.mulf %539, %538 : vector<8x32xf32>
    %cst_229 = arith.constant 4.471500e-02 : f32
    %541 = vector.broadcast %cst_229 : f32 to vector<8x32xf32>
    %542 = arith.mulf %541, %538 : vector<8x32xf32>
    %543 = arith.mulf %542, %538 : vector<8x32xf32>
    %544 = arith.mulf %543, %538 : vector<8x32xf32>
    %545 = arith.addf %538, %544 : vector<8x32xf32>
    %cst_230 = arith.constant 0.797884583 : f32
    %546 = vector.broadcast %cst_230 : f32 to vector<8x32xf32>
    %547 = arith.mulf %546, %545 : vector<8x32xf32>
    %548 = math.tanh %547 : vector<8x32xf32>
    %cst_231 = arith.constant 1.000000e+00 : f32
    %549 = vector.broadcast %cst_231 : f32 to vector<8x32xf32>
    %550 = arith.addf %549, %548 : vector<8x32xf32>
    %551 = arith.mulf %540, %550 : vector<8x32xf32>
    %cst_232 = arith.constant dense<0.000000e+00> : vector<8x32xf32>
    %552 = tpu.matmul %551, %462, %cst_232 {dimension_numbers = #tpu.dot_dimension_numbers<[1], [0], [0], [1], [0, 0, 1, 1], [], []>} : vector<8x32xf32>, vector<32x32xf32>, vector<8x32xf32> -> vector<8x32xf32>
    %553 = vector.broadcast %463 : vector<1x32xf32> to vector<8x32xf32>
    %554 = arith.addf %552, %553 : vector<8x32xf32>
    %555 = arith.addf %454, %554 : vector<8x32xf32>
    %c0_233 = arith.constant 0 : index
    %c0_234 = arith.constant 0 : index
    %556 = vector.load %arg46[%c0_233, %c0_234] : memref<32x32xf32, #tpu.memory_space<vmem>>, vector<32x32xf32>
    %c0_235 = arith.constant 0 : index
    %c0_236 = arith.constant 0 : index
    %557 = vector.load %arg47[%c0_235, %c0_236] : memref<1x32xf32, #tpu.memory_space<vmem>>, vector<1x32xf32>
    %c0_237 = arith.constant 0 : index
    %c0_238 = arith.constant 0 : index
    %558 = vector.load %arg48[%c0_237, %c0_238] : memref<32x128xf32, #tpu.memory_space<vmem>>, vector<32x128xf32>
    %c0_239 = arith.constant 0 : index
    %c0_240 = arith.constant 0 : index
    %559 = vector.load %arg49[%c0_239, %c0_240] : memref<1x128xf32, #tpu.memory_space<vmem>>, vector<1x128xf32>
    %cst_241 = arith.constant dense<0.000000e+00> : vector<8x32xf32>
    %560 = tpu.matmul %555, %556, %cst_241 {dimension_numbers = #tpu.dot_dimension_numbers<[1], [0], [0], [1], [0, 0, 1, 1], [], []>} : vector<8x32xf32>, vector<32x32xf32>, vector<8x32xf32> -> vector<8x32xf32>
    %561 = vector.broadcast %557 : vector<1x32xf32> to vector<8x32xf32>
    %562 = arith.addf %560, %561 : vector<8x32xf32>
    %cst_242 = arith.constant 5.000000e-01 : f32
    %563 = vector.broadcast %cst_242 : f32 to vector<8x32xf32>
    %564 = arith.mulf %563, %562 : vector<8x32xf32>
    %cst_243 = arith.constant 4.471500e-02 : f32
    %565 = vector.broadcast %cst_243 : f32 to vector<8x32xf32>
    %566 = arith.mulf %565, %562 : vector<8x32xf32>
    %567 = arith.mulf %566, %562 : vector<8x32xf32>
    %568 = arith.mulf %567, %562 : vector<8x32xf32>
    %569 = arith.addf %562, %568 : vector<8x32xf32>
    %cst_244 = arith.constant 0.797884583 : f32
    %570 = vector.broadcast %cst_244 : f32 to vector<8x32xf32>
    %571 = arith.mulf %570, %569 : vector<8x32xf32>
    %572 = math.tanh %571 : vector<8x32xf32>
    %cst_245 = arith.constant 1.000000e+00 : f32
    %573 = vector.broadcast %cst_245 : f32 to vector<8x32xf32>
    %574 = arith.addf %573, %572 : vector<8x32xf32>
    %575 = arith.mulf %564, %574 : vector<8x32xf32>
    %cst_246 = arith.constant dense<0.000000e+00> : vector<8x128xf32>
    %576 = tpu.matmul %575, %558, %cst_246 {dimension_numbers = #tpu.dot_dimension_numbers<[1], [0], [0], [1], [0, 0, 1, 1], [], []>} : vector<8x32xf32>, vector<32x128xf32>, vector<8x128xf32> -> vector<8x128xf32>
    %577 = vector.broadcast %559 : vector<1x128xf32> to vector<8x128xf32>
    %578 = arith.addf %576, %577 : vector<8x128xf32>
    %c0_247 = arith.constant 0 : index
    %c0_248 = arith.constant 0 : index
    %c0_249 = arith.constant 0 : index
    %579 = vector.load %arg50[%c0_247, %c0_248, %c0_249] : memref<1x8x128xf32, #tpu.memory_space<vmem>>, vector<1x8x128xf32>
    %580 = vector.shape_cast %579 : vector<1x8x128xf32> to vector<8x128xf32>
    %581 = vector.shape_cast %578 : vector<8x128xf32> to vector<1x8x128xf32>
    tpu.vector_store %arg50[%c0_247, %c0_248, %c0_249], %581 {strides = array<i32>} : memref<1x8x128xf32, #tpu.memory_space<vmem>>, vector<1x8x128xf32>,
    return
  }
  func.func @transform_0(%arg0: i32) -> (i32, i32, i32) {
    %c0_i32 = arith.constant 0 : i32
    %c0_i32_0 = arith.constant 0 : i32
    %c0_i32_1 = arith.constant 0 : i32
    return %arg0, %c0_i32, %c0_i32_0 : i32, i32, i32
  }
  func.func @transform_1(%arg0: i32) -> (i32, i32) {
    %c0_i32 = arith.constant 0 : i32
    %c0_i32_0 = arith.constant 0 : i32
    %c0_i32_1 = arith.constant 0 : i32
    return %c0_i32, %c0_i32_0 : i32, i32
  }
  func.func @transform_2(%arg0: i32) -> (i32, i32) {
    %c0_i32 = arith.constant 0 : i32
    %c0_i32_0 = arith.constant 0 : i32
    %c0_i32_1 = arith.constant 0 : i32
    return %c0_i32, %c0_i32_0 : i32, i32
  }
  func.func @transform_3(%arg0: i32) -> (i32, i32) {
    %c0_i32 = arith.constant 0 : i32
    %c0_i32_0 = arith.constant 0 : i32
    %c0_i32_1 = arith.constant 0 : i32
    return %c0_i32, %c0_i32_0 : i32, i32
  }
  func.func @transform_4(%arg0: i32) -> (i32, i32) {
    %c0_i32 = arith.constant 0 : i32
    %c0_i32_0 = arith.constant 0 : i32
    %c0_i32_1 = arith.constant 0 : i32
    return %c0_i32, %c0_i32_0 : i32, i32
  }
  func.func @transform_5(%arg0: i32) -> (i32, i32) {
    %c0_i32 = arith.constant 0 : i32
    %c0_i32_0 = arith.constant 0 : i32
    %c0_i32_1 = arith.constant 0 : i32
    return %c0_i32, %c0_i32_0 : i32, i32
  }
  func.func @transform_6(%arg0: i32) -> (i32, i32) {
    %c0_i32 = arith.constant 0 : i32
    %c0_i32_0 = arith.constant 0 : i32
    %c0_i32_1 = arith.constant 0 : i32
    return %c0_i32, %c0_i32_0 : i32, i32
  }
  func.func @transform_7(%arg0: i32) -> (i32, i32) {
    %c0_i32 = arith.constant 0 : i32
    %c0_i32_0 = arith.constant 0 : i32
    %c0_i32_1 = arith.constant 0 : i32
    return %c0_i32, %c0_i32_0 : i32, i32
  }
  func.func @transform_8(%arg0: i32) -> (i32, i32) {
    %c0_i32 = arith.constant 0 : i32
    %c0_i32_0 = arith.constant 0 : i32
    %c0_i32_1 = arith.constant 0 : i32
    return %c0_i32, %c0_i32_0 : i32, i32
  }
  func.func @transform_9(%arg0: i32) -> (i32, i32) {
    %c0_i32 = arith.constant 0 : i32
    %c0_i32_0 = arith.constant 0 : i32
    %c0_i32_1 = arith.constant 0 : i32
    return %c0_i32, %c0_i32_0 : i32, i32
  }
  func.func @transform_10(%arg0: i32) -> i32 {
    %c0_i32 = arith.constant 0 : i32
    %c0_i32_0 = arith.constant 0 : i32
    return %c0_i32 : i32
  }
  func.func @transform_11(%arg0: i32) -> (i32, i32) {
    %c0_i32 = arith.constant 0 : i32
    %c0_i32_0 = arith.constant 0 : i32
    %c0_i32_1 = arith.constant 0 : i32
    return %c0_i32, %c0_i32_0 : i32, i32
  }
  func.func @transform_12(%arg0: i32) -> (i32, i32) {
    %c0_i32 = arith.constant 0 : i32
    %c0_i32_0 = arith.constant 0 : i32
    %c0_i32_1 = arith.constant 0 : i32
    return %c0_i32, %c0_i32_0 : i32, i32
  }
  func.func @transform_13(%arg0: i32) -> (i32, i32) {
    %c0_i32 = arith.constant 0 : i32
    %c0_i32_0 = arith.constant 0 : i32
    %c0_i32_1 = arith.constant 0 : i32
    return %c0_i32, %c0_i32_0 : i32, i32
  }
  func.func @transform_14(%arg0: i32) -> (i32, i32) {
    %c0_i32 = arith.constant 0 : i32
    %c0_i32_0 = arith.constant 0 : i32
    %c0_i32_1 = arith.constant 0 : i32
    return %c0_i32, %c0_i32_0 : i32, i32
  }
  func.func @transform_15(%arg0: i32) -> (i32, i32) {
    %c0_i32 = arith.constant 0 : i32
    %c0_i32_0 = arith.constant 0 : i32
    %c0_i32_1 = arith.constant 0 : i32
    return %c0_i32, %c0_i32_0 : i32, i32
  }
  func.func @transform_16(%arg0: i32) -> (i32, i32) {
    %c0_i32 = arith.constant 0 : i32
    %c0_i32_0 = arith.constant 0 : i32
    %c0_i32_1 = arith.constant 0 : i32
    return %c0_i32, %c0_i32_0 : i32, i32
  }
  func.func @transform_17(%arg0: i32) -> (i32, i32) {
    %c0_i32 = arith.constant 0 : i32
    %c0_i32_0 = arith.constant 0 : i32
    %c0_i32_1 = arith.constant 0 : i32
    return %c0_i32, %c0_i32_0 : i32, i32
  }
  func.func @transform_18(%arg0: i32) -> (i32, i32) {
    %c0_i32 = arith.constant 0 : i32
    %c0_i32_0 = arith.constant 0 : i32
    %c0_i32_1 = arith.constant 0 : i32
    return %c0_i32, %c0_i32_0 : i32, i32
  }
  func.func @transform_19(%arg0: i32) -> (i32, i32) {
    %c0_i32 = arith.constant 0 : i32
    %c0_i32_0 = arith.constant 0 : i32
    %c0_i32_1 = arith.constant 0 : i32
    return %c0_i32, %c0_i32_0 : i32, i32
  }
  func.func @transform_20(%arg0: i32) -> i32 {
    %c0_i32 = arith.constant 0 : i32
    %c0_i32_0 = arith.constant 0 : i32
    return %c0_i32 : i32
  }
  func.func @transform_21(%arg0: i32) -> (i32, i32) {
    %c0_i32 = arith.constant 0 : i32
    %c0_i32_0 = arith.constant 0 : i32
    %c0_i32_1 = arith.constant 0 : i32
    return %c0_i32, %c0_i32_0 : i32, i32
  }
  func.func @transform_22(%arg0: i32) -> (i32, i32) {
    %c0_i32 = arith.constant 0 : i32
    %c0_i32_0 = arith.constant 0 : i32
    %c0_i32_1 = arith.constant 0 : i32
    return %c0_i32, %c0_i32_0 : i32, i32
  }
  func.func @transform_23(%arg0: i32) -> (i32, i32) {
    %c0_i32 = arith.constant 0 : i32
    %c0_i32_0 = arith.constant 0 : i32
    %c0_i32_1 = arith.constant 0 : i32
    return %c0_i32, %c0_i32_0 : i32, i32
  }
  func.func @transform_24(%arg0: i32) -> (i32, i32) {
    %c0_i32 = arith.constant 0 : i32
    %c0_i32_0 = arith.constant 0 : i32
    %c0_i32_1 = arith.constant 0 : i32
    return %c0_i32, %c0_i32_0 : i32, i32
  }
  func.func @transform_25(%arg0: i32) -> (i32, i32) {
    %c0_i32 = arith.constant 0 : i32
    %c0_i32_0 = arith.constant 0 : i32
    %c0_i32_1 = arith.constant 0 : i32
    return %c0_i32, %c0_i32_0 : i32, i32
  }
  func.func @transform_26(%arg0: i32) -> (i32, i32) {
    %c0_i32 = arith.constant 0 : i32
    %c0_i32_0 = arith.constant 0 : i32
    %c0_i32_1 = arith.constant 0 : i32
    return %c0_i32, %c0_i32_0 : i32, i32
  }
  func.func @transform_27(%arg0: i32) -> (i32, i32) {
    %c0_i32 = arith.constant 0 : i32
    %c0_i32_0 = arith.constant 0 : i32
    %c0_i32_1 = arith.constant 0 : i32
    return %c0_i32, %c0_i32_0 : i32, i32
  }
  func.func @transform_28(%arg0: i32) -> (i32, i32) {
    %c0_i32 = arith.constant 0 : i32
    %c0_i32_0 = arith.constant 0 : i32
    %c0_i32_1 = arith.constant 0 : i32
    return %c0_i32, %c0_i32_0 : i32, i32
  }
  func.func @transform_29(%arg0: i32) -> (i32, i32) {
    %c0_i32 = arith.constant 0 : i32
    %c0_i32_0 = arith.constant 0 : i32
    %c0_i32_1 = arith.constant 0 : i32
    return %c0_i32, %c0_i32_0 : i32, i32
  }
  func.func @transform_30(%arg0: i32) -> (i32, i32) {
    %c0_i32 = arith.constant 0 : i32
    %c0_i32_0 = arith.constant 0 : i32
    %c0_i32_1 = arith.constant 0 : i32
    return %c0_i32, %c0_i32_0 : i32, i32
  }
  func.func @transform_31(%arg0: i32) -> (i32, i32) {
    %c0_i32 = arith.constant 0 : i32
    %c0_i32_0 = arith.constant 0 : i32
    %c0_i32_1 = arith.constant 0 : i32
    return %c0_i32, %c0_i32_0 : i32, i32
  }
  func.func @transform_32(%arg0: i32) -> (i32, i32) {
    %c0_i32 = arith.constant 0 : i32
    %c0_i32_0 = arith.constant 0 : i32
    %c0_i32_1 = arith.constant 0 : i32
    return %c0_i32, %c0_i32_0 : i32, i32
  }
  func.func @transform_33(%arg0: i32) -> (i32, i32) {
    %c0_i32 = arith.constant 0 : i32
    %c0_i32_0 = arith.constant 0 : i32
    %c0_i32_1 = arith.constant 0 : i32
    return %c0_i32, %c0_i32_0 : i32, i32
  }
  func.func @transform_34(%arg0: i32) -> (i32, i32) {
    %c0_i32 = arith.constant 0 : i32
    %c0_i32_0 = arith.constant 0 : i32
    %c0_i32_1 = arith.constant 0 : i32
    return %c0_i32, %c0_i32_0 : i32, i32
  }
  func.func @transform_35(%arg0: i32) -> (i32, i32) {
    %c0_i32 = arith.constant 0 : i32
    %c0_i32_0 = arith.constant 0 : i32
    %c0_i32_1 = arith.constant 0 : i32
    return %c0_i32, %c0_i32_0 : i32, i32
  }
  func.func @transform_36(%arg0: i32) -> (i32, i32) {
    %c0_i32 = arith.constant 0 : i32
    %c0_i32_0 = arith.constant 0 : i32
    %c0_i32_1 = arith.constant 0 : i32
    return %c0_i32, %c0_i32_0 : i32, i32
  }
  func.func @transform_37(%arg0: i32) -> (i32, i32) {
    %c0_i32 = arith.constant 0 : i32
    %c0_i32_0 = arith.constant 0 : i32
    %c0_i32_1 = arith.constant 0 : i32
    return %c0_i32, %c0_i32_0 : i32, i32
  }
  func.func @transform_38(%arg0: i32) -> (i32, i32) {
    %c0_i32 = arith.constant 0 : i32
    %c0_i32_0 = arith.constant 0 : i32
    %c0_i32_1 = arith.constant 0 : i32
    return %c0_i32, %c0_i32_0 : i32, i32
  }
  func.func @transform_39(%arg0: i32) -> (i32, i32) {
    %c0_i32 = arith.constant 0 : i32
    %c0_i32_0 = arith.constant 0 : i32
    %c0_i32_1 = arith.constant 0 : i32
    return %c0_i32, %c0_i32_0 : i32, i32
  }
  func.func @transform_40(%arg0: i32) -> (i32, i32) {
    %c0_i32 = arith.constant 0 : i32
    %c0_i32_0 = arith.constant 0 : i32
    %c0_i32_1 = arith.constant 0 : i32
    return %c0_i32, %c0_i32_0 : i32, i32
  }
  func.func @transform_41(%arg0: i32) -> (i32, i32) {
    %c0_i32 = arith.constant 0 : i32
    %c0_i32_0 = arith.constant 0 : i32
    %c0_i32_1 = arith.constant 0 : i32
    return %c0_i32, %c0_i32_0 : i32, i32
  }
  func.func @transform_42(%arg0: i32) -> (i32, i32) {
    %c0_i32 = arith.constant 0 : i32
    %c0_i32_0 = arith.constant 0 : i32
    %c0_i32_1 = arith.constant 0 : i32
    return %c0_i32, %c0_i32_0 : i32, i32
  }
  func.func @transform_43(%arg0: i32) -> (i32, i32) {
    %c0_i32 = arith.constant 0 : i32
    %c0_i32_0 = arith.constant 0 : i32
    %c0_i32_1 = arith.constant 0 : i32
    return %c0_i32, %c0_i32_0 : i32, i32
  }
  func.func @transform_44(%arg0: i32) -> (i32, i32) {
    %c0_i32 = arith.constant 0 : i32
    %c0_i32_0 = arith.constant 0 : i32
    %c0_i32_1 = arith.constant 0 : i32
    return %c0_i32, %c0_i32_0 : i32, i32
  }
  func.func @transform_45(%arg0: i32) -> (i32, i32) {
    %c0_i32 = arith.constant 0 : i32
    %c0_i32_0 = arith.constant 0 : i32
    %c0_i32_1 = arith.constant 0 : i32
    return %c0_i32, %c0_i32_0 : i32, i32
  }
  func.func @transform_46(%arg0: i32) -> (i32, i32) {
    %c0_i32 = arith.constant 0 : i32
    %c0_i32_0 = arith.constant 0 : i32
    %c0_i32_1 = arith.constant 0 : i32
    return %c0_i32, %c0_i32_0 : i32, i32
  }
  func.func @transform_47(%arg0: i32) -> (i32, i32) {
    %c0_i32 = arith.constant 0 : i32
    %c0_i32_0 = arith.constant 0 : i32
    %c0_i32_1 = arith.constant 0 : i32
    return %c0_i32, %c0_i32_0 : i32, i32
  }
  func.func @transform_48(%arg0: i32) -> (i32, i32) {
    %c0_i32 = arith.constant 0 : i32
    %c0_i32_0 = arith.constant 0 : i32
    %c0_i32_1 = arith.constant 0 : i32
    return %c0_i32, %c0_i32_0 : i32, i32
  }
  func.func @transform_49(%arg0: i32) -> (i32, i32, i32) {
    %c0_i32 = arith.constant 0 : i32
    %c0_i32_0 = arith.constant 0 : i32
    %c0_i32_1 = arith.constant 0 : i32
    return %arg0, %c0_i32, %c0_i32_0 : i32, i32, i32
  }
}

</mosaic_0001>

<bundles_post_ra>
// kernel: lrtas_forward.1
= control target key start
LH: loop header
LB: loop body
LE: loop exit
PB: predicated region body
PF: predicated region fallthrough
CT: control target
= control target key end

     0   :  { %s5699_s6 = smov 1   ;;  %s5700_s10 = smov 2   ;;  %s6908_s0 = inlined_call_operand.smem [shape: u32[50], index: -1, kind: input, shape index: {}] }
   0x1   :  { %s5774_s5 = sld [smem:[%s6908_s0]]   ;;  %s5701_s14 = smov 3  }
   0x2   :  { %s5779_s9 = sld [smem:[%s6908_s0 + %s5699_s6]]   ;;  %s5702_s18 = smov 4  }
   0x3   :  { %s5784_s13 = sld [smem:[%s6908_s0 + %s5700_s10]]   ;;  %s5703_s22 = smov 5  }
   0x4   :  { %s5789_s17 = sld [smem:[%s6908_s0 + %s5701_s14]]   ;;  %s5704_s26 = smov 6  }
   0x5   :  { %s5794_s21 = sld [smem:[%s6908_s0 + %s5702_s18]]   ;;  %s5705_s30 = smov 7  }
   0x6   :  { %s5799_s25 = sld [smem:[%s6908_s0 + %s5703_s22]]   ;;  %s5706_s4 = smov 8  }
   0x7   :  { %6940 = sst [smem:[#allocation29_spill]] %s5774_s5  ;;  %s5707_s10 = smov 9  }
   0x8   :  { %6941 = sst [smem:[#allocation30_spill]] %s5779_s9  ;;  %s5708_s15 = smov 10  }
   0x9   :  { %6942 = sst [smem:[#allocation31_spill]] %s5784_s13  ;;  %s5709_s20 = smov 11  }
   0xa   :  { %s5804_s29 = sld [smem:[%s6908_s0 + %s5704_s26]]   ;;  %s5710_s26 = smov 12  }
   0xb   :  { %s5809_s3 = sld [smem:[%s6908_s0 + %s5705_s30]]   ;;  %s5711_s1 = smov 13  }
   0xc   :  { %s5814_s8 = sld [smem:[%s6908_s0 + %s5706_s4]]   ;;  %s5712_s7 = smov 14  }
   0xd   :  { %s5819_s14 = sld [smem:[%s6908_s0 + %s5707_s10]]   ;;  %s5714_s22 = smov 16  }
   0xe   :  { %s5824_s19 = sld [smem:[%s6908_s0 + %s5708_s15]]   ;;  %s5713_s15 = smov 15  }
   0xf   :  { %s5829_s24 = sld [smem:[%s6908_s0 + %s5709_s20]]   ;;  %s5715_s28 = smov 17  }
  0x10   :  { %6943 = sst [smem:[#allocation32_spill]] %s5804_s29 }
  0x11   :  { %6944 = sst [smem:[#allocation33_spill]] %s5809_s3 }
  0x12   :  { %6945 = sst [smem:[#allocation34_spill]] %s5814_s8 }
  0x13   :  { %6946 = sst [smem:[#allocation35_spill]] %s5819_s14 }
  0x14   :  { %6947 = sst [smem:[#allocation36_spill]] %s5824_s19 }
  0x15   :  { %6948 = sst [smem:[#allocation37_spill]] %s5829_s24 }
  0x16   :  { %s5834_s30 = sld [smem:[%s6908_s0 + %s5710_s26]]  }
  0x17   :  { %s5839_s6 = sld [smem:[%s6908_s0 + %s5711_s1]]  }
  0x18   :  { %s5844_s12 = sld [smem:[%s6908_s0 + %s5712_s7]]   ;;  %s5716_s7 = smov 18  }
  0x19   :  { %s5849_s20 = sld [smem:[%s6908_s0 + %s5713_s15]]   ;;  %s5717_s15 = smov 19  }
  0x1a   :  { %s5854_s27 = sld [smem:[%s6908_s0 + %s5714_s22]]   ;;  %s5718_s22 = smov 20  }
  0x1b   :  { %s5859_s4 = sld [smem:[%s6908_s0 + %s5715_s28]]   ;;  %s5719_s28 = smov 21  }
  0x1c   :  { %6949 = sst [smem:[#allocation38_spill]] %s5834_s30 }
  0x1d   :  { %6950 = sst [smem:[#allocation39_spill]] %s5839_s6 }
  0x1e   :  { %6951 = sst [smem:[#allocation40_spill]] %s5844_s12 }
  0x1f   :  { %6952 = sst [smem:[#allocation41_spill]] %s5849_s20 }
  0x20   :  { %6953 = sst [smem:[#allocation42_spill]] %s5854_s27 }
  0x21   :  { %6954 = sst [smem:[#allocation43_spill]] %s5859_s4 }
  0x22   :  { %s5864_s12 = sld [smem:[%s6908_s0 + %s5716_s7]]   ;;  %s5720_s7 = smov 22  }
  0x23   :  { %s5869_s6 = sld [smem:[%s6908_s0 + %s5717_s15]]   ;;  %s5721_s15 = smov 23  }
  0x24   :  { %s5874_s27 = sld [smem:[%s6908_s0 + %s5718_s22]]   ;;  %s5722_s22 = smov 24  }
  0x25   :  { %s5879_s4 = sld [smem:[%s6908_s0 + %s5719_s28]]   ;;  %s5723_s28 = smov 25  }
  0x26   :  { %s5889_s20 = sld [smem:[%s6908_s0 + %s5721_s15]]   ;;  %s5725_s15 = smov 27  }
  0x27   :  { %s5894_s30 = sld [smem:[%s6908_s0 + %s5722_s22]]   ;;  %s5726_s22 = smov 28  }
  0x28   :  { %6955 = sst [smem:[#allocation44_spill]] %s5864_s12 }
  0x29   :  { %6956 = sst [smem:[#allocation45_spill]] %s5869_s6 }
  0x2a   :  { %s5884_s12 = sld [smem:[%s6908_s0 + %s5720_s7]]   ;;  %s5724_s7 = smov 26  }
  0x2b   :  { %6957 = sst [smem:[#allocation46_spill]] %s5879_s4 }
  0x2c   :  { %6959 = sst [smem:[#allocation48_spill]] %s5889_s20 }
  0x2d   :  { %6960 = sst [smem:[#allocation49_spill]] %s5894_s30 }
  0x2e   :  { %s5899_s4 = sld [smem:[%s6908_s0 + %s5723_s28]]   ;;  %s5727_s28 = smov 29  }
  0x2f   :  { %s5909_s20 = sld [smem:[%s6908_s0 + %s5725_s15]]   ;;  %s5729_s15 = smov 31  }
  0x30   :  { %6958 = sst [smem:[#allocation47_spill]] %s5884_s12 }
  0x31   :  { %s5904_s12 = sld [smem:[%s6908_s0 + %s5724_s7]]   ;;  %s5728_s7 = smov 30  }
  0x32   :  { %s5914_s30 = sld [smem:[%s6908_s0 + %s5726_s22]]   ;;  %s5730_s22 = smov 32  }
  0x34   :  { %6961 = sst [smem:[#allocation50_spill]] %s5899_s4 }
  0x35   :  { %6963 = sst [smem:[#allocation52_spill]] %s5909_s20 }
  0x36   :  { %s5919_s4 = sld [smem:[%s6908_s0 + %s5727_s28]]   ;;  %s5731_s28 = smov 33  }
  0x37   :  { %6962 = sst [smem:[#allocation51_spill]] %s5904_s12 }
  0x38   :  { %6964 = sst [smem:[#allocation53_spill]] %s5914_s30 }
  0x39   :  { %s5924_s12 = sld [smem:[%s6908_s0 + %s5728_s7]]   ;;  %s5732_s7 = smov 34  }
  0x3a   :  { %s5929_s20 = sld [smem:[%s6908_s0 + %s5729_s15]]   ;;  %s5733_s15 = smov 35  }
  0x3b   :  { %s5934_s30 = sld [smem:[%s6908_s0 + %s5730_s22]]   ;;  %s5734_s22 = smov 36  }
  0x3c   :  { %6965 = sst [smem:[#allocation54_spill]] %s5919_s4 }
  0x3d   :  { %s5939_s4 = sld [smem:[%s6908_s0 + %s5731_s28]]   ;;  %s5735_s28 = smov 37  }
  0x3f   :  { %6966 = sst [smem:[#allocation55_spill]] %s5924_s12 }
  0x40   :  { %6967 = sst [smem:[#allocation56_spill]] %s5929_s20 }
  0x41   :  { %6968 = sst [smem:[#allocation57_spill]] %s5934_s30 }
  0x42   :  { %s5944_s12 = sld [smem:[%s6908_s0 + %s5732_s7]]   ;;  %s5736_s7 = smov 38  }
  0x43   :  { %6969 = sst [smem:[#allocation58_spill]] %s5939_s4 }
  0x44   :  { %s5949_s20 = sld [smem:[%s6908_s0 + %s5733_s15]]   ;;  %s5737_s15 = smov 39  }
  0x45   :  { %s5954_s30 = sld [smem:[%s6908_s0 + %s5734_s22]]   ;;  %s5738_s22 = smov 40  }
  0x46   :  { %s5959_s4 = sld [smem:[%s6908_s0 + %s5735_s28]]   ;;  %s5739_s28 = smov 41  }
  0x48   :  { %6970 = sst [smem:[#allocation59_spill]] %s5944_s12 }
  0x49   :  { %s5964_s12 = sld [smem:[%s6908_s0 + %s5736_s7]]   ;;  %s5740_s7 = smov 42  }
  0x4a   :  { %6971 = sst [smem:[#allocation60_spill]] %s5949_s20 }
  0x4b   :  { %6972 = sst [smem:[#allocation61_spill]] %s5954_s30 }
  0x4c   :  { %6973 = sst [smem:[#allocation62_spill]] %s5959_s4 }
  0x4d   :  { %s5969_s20 = sld [smem:[%s6908_s0 + %s5737_s15]]   ;;  %s5741_s15 = smov 43  }
  0x4e   :  { %s5974_s30 = sld [smem:[%s6908_s0 + %s5738_s22]]   ;;  %s5742_s22 = smov 44  }
  0x4f   :  { %6974 = sst [smem:[#allocation63_spill]] %s5964_s12 }
  0x50   :  { %s5979_s4 = sld [smem:[%s6908_s0 + %s5739_s28]]   ;;  %s5743_s28 = smov 45  }
  0x51   :  { %s5984_s12 = sld [smem:[%s6908_s0 + %s5740_s7]]   ;;  %s5744_s7 = smov 46  }
  0x52   :  { %s5989_s24 = sld [smem:[%s6908_s0 + %s5741_s15]]   ;;  %s5745_s15 = smov 47  }
  0x53   :  { %s5994_s3 = sld [smem:[%s6908_s0 + %s5742_s22]]   ;;  %s5746_s22 = smov 48  }
  0x54   :  { %s6004_s8 = sld [smem:[%s6908_s0 + %s5744_s7]]  }
  0x55   :  { %s6014_s29 = sld [smem:[%s6908_s0 + %s5746_s22]]  }
  0x56   :  { %6975 = sst [smem:[#allocation64_spill]] %s5979_s4 }
  0x57   :  { %6976 = sst [smem:[#allocation65_spill]] %s5984_s12 }
  0x58   :  { %6977 = sst [smem:[#allocation66_spill]] %s5989_s24 }
  0x59   :  { %6978 = sst [smem:[#allocation67_spill]] %s5994_s3 }
  0x5a   :  { %s5999_s4 = sld [smem:[%s6908_s0 + %s5743_s28]]   ;;  %s5747_s28 = smov 49  }
  0x5b   :  { %6980 = sst [smem:[#allocation69_spill]] %s6004_s8 }
  0x5c   :  { %s6009_s24 = sld [smem:[%s6908_s0 + %s5745_s15]]  }
  0x60   :  { %6979 = sst [smem:[#allocation68_spill]] %s5999_s4 }
  0x61   :  { %s6019_s4 = sld [smem:[%s6908_s0 + %s5747_s28]]  }
  0x62   :  { %104 = vsyncpa [#allocation5], 0 }
  0x63   :  { %105 = vsyncpa [#allocation7], 0 }
  0x64   :  { %106 = vsyncpa [#allocation10], 0 }
  0x65   :  { %107 = vsyncpa [#allocation3], 0 }
  0x66   :  { %108 = vsyncpa [#allocation13], 0 }
  0x67   :  { %109 = vsyncpa [#allocation16], 0 }
  0x68   :  { %110 = vsyncpa [#allocation19], 0 }
  0x69   :  { %111 = vsyncpa [#allocation4], 0 }
  0x6a   :  { %113 = vsyncpa [#allocation4 + $0x1], 0  ;;  %s6021_s7 = smov 0   ;;  %s6023_s10 = smov 0  }
  0x6b   :  { %s6025_s11 = smov 0   ;;  %s6027_s15 = smov 0  }
  0x6c LB: > { %s6981_s14 = sld [smem:[#allocation35_spill]]  ;;  %s6982_s12 = sld [smem:[#allocation65_spill]]  ;;  %s5697_s15 = sphi %s6027_s15, %s7056_s15   ;;  %s5693_s11 = sphi %s6025_s11, %s7061_s11   ;;  %s5689_s10 = sphi %s6023_s10, %s7060_s10   ;;  %s5685_s7 = sphi %s6021_s7, %s7059_s7  }
  0x6d   : > { %s6983_s8 = sld [smem:[#allocation69_spill]]  ;;  %s6984_s3 = sld [smem:[#allocation67_spill]] }
  0x6e   : > { %6985 = sst [smem:[#allocation70_spill]] %s5685_s7  ;;  %s6042_s0 = sadd.s32 4294967295, %s5697_s15  }
  0x6f   : > { %6986 = sst [smem:[#allocation71_spill]] %s5693_s11  ;;  %s4533_s16 = sadd.s32 4294967294, %s5697_s15  }
  0x70   : > { %s6987_s19 = sld [smem:[#allocation36_spill]]  ;;  %s6046_s18 = sadd.s32 1, %s5697_s15  }
  0x71   : > { %6988 = sst [smem:[#allocation72_spill]] %s6046_s18  ;;  %s1160_s22 = sadd.s32 1, %s5693_s11 }
  0x72   : > { %s1157_s23 = ssub.s32 %s5697_s15, %s6046_s18  ;;  %p1170_p0 = scmp.ne.s32.totalorder %s5693_s11, %s5689_s10 }
  0x73   : > { %p1158_p1 = scmp.eq.s32.totalorder %s1157_s23, 0  ;;  %p1171_p2 = scmp.eq.s32.totalorder %s6042_s0, 1 }
  0x74   : > { %p1176_p3 = scmp.ne.s32.totalorder %s5689_s10, %s5685_s7  ;;  %p1177_p4 = scmp.eq.s32.totalorder %s4533_s16, 1 }
  0x75   : > { %s6057_s26 = scalar_select %p1158_p1, %s5693_s11, %s1160_s22  }
  0x76   : > { %p6059_p5 = por %p1171_p2, %p1170_p0  ;;  %p6063_p6 = por %p1177_p4, %p1176_p3 }
  0x77   : > { %6989 = sst [smem:[#allocation73_spill]] %s6057_s26  ;;  %p4534_p7 = scmp.ge.s32.totalorder %s5697_s15, 1 }
  0x78   : > { %s6990_s28 = scalar_select %p6059_p5, 1, 0 }
  0x79   : > { %s6991_s1 = scalar_select %p6063_p6, 1, 0 }
  0x7a   : > { %p1184_p8 = scmp.lt.s32.totalorder %s5697_s15, 3  ;;  %p6926_p9 = scmp.eq.s32.totalorder %s6042_s0, 0 }
  0x7b   : > { %6992 = sst [smem:[#allocation74_spill]] %s6991_s1  ;;  %s1232_s16 = sshll.u32 %s6987_s19, 4  ;;  %s1233_s16 = int_to_ptr.vmem [resolvable:$true] %s1232_s16 }
  0x7c   : > { %p6070_p10 = pnand %p4534_p7, %p1184_p8  ;;  %s5748_s22 = smov [#allocation12]  }
  0x7d   : > { %s1354_s23 = sshll.u32 %s5748_s22, 4  ;;  %s5749_s11 = smov [#allocation15]   ;;  %s6083_s23 = int_to_ptr.vmem [resolvable:$true] %s1354_s23 }
  0x7e   : > { %s6993_s2 = scalar_select %p6070_p10, 1, 0 }
  0x7f   : > { %p5163_p11 = pneg %p6070_p10  ;;  %s1382_s18 = sshll.u32 %s5749_s11, 4  ;;  %s6086_s18 = int_to_ptr.vmem [resolvable:$true] %s1382_s18 }
  0x80   : > { %s5379_s7 = scalar_lea.vmem %s1233_s16, 16  ;;  %p5387_p3 = scmp.lt.s32.totalorder %s1233_s16, %s1233_s16 }
  0x81   : > { %p6079_p12 = pnand %p6926_p9, %p5163_p11  ;;  %p5380_p13 = scmp.ne.s32.totalorder %s1233_s16, %s5379_s7 }
  0x82   : > { %p5388_p4 = scmp.lt.s32.totalorder %s5379_s7, %s5379_s7 }
  0x83   : > { %p6090_p0 = pneg %p6079_p12 }
  0x84   : > { %p5389_p7 = por %p5388_p4, %p5387_p3 }
  0x85   : > { %p5382_p1 = pnand %p6090_p0, %p5380_p13 }
  0x87   : > { %p5383_p2 = pneg %p5382_p1 }
  0x89   : > { %p5390_p8 = pnand %p5389_p7, %p5383_p2 }
  0x8b   : > { %5393 = shalt.err (!%p5390_p8)
}
  0x8c   : > { %s5750_s11 = smov [#allocation6]   ;;  %s5394_s22 = scalar_lea.hbm %s5974_s30, 16 }
  0x8d   : > { %5169 = dma.vmem_to_smem (!%p6079_p12), %s1233_s16, 16, %s5750_s11, [#allocation7]  }
  0x8e   : > { %p5395_p11 = scmp.ne.s32.totalorder %s5974_s30, %s5394_s22  ;;  %p5401_p13 = scmp.lt.u32.totalorder %s5394_s22, %s5974_s30 }
  0x90   : > { %p5397_p9 = pnand %p5395_p11, %p6090_p0 }
  0x92   : > { %p5398_p6 = pneg %p5397_p9 }
  0x94   : > { %p5403_p1 = pnand %p5401_p13, %p5398_p6 }
  0x96   : > { %5406 = shalt.err (!%p5403_p1)
}
  0x97   : > { %s5407_s7 = scalar_lea.vmem %s6083_s23, 16  ;;  %s5414_s1 = scalar_lea.vmem %s6083_s23, 32 }
  0x98   : > { %p5408_p2 = scmp.ne.s32.totalorder %s6083_s23, %s5407_s7  ;;  %p5415_p7 = scmp.lt.s32.totalorder %s6083_s23, %s6083_s23 }
  0x99   : > { %p5416_p8 = scmp.lt.s32.totalorder %s5414_s1, %s5407_s7 }
  0x9a   : > { %p5410_p3 = pnand %p5408_p2, %p6090_p0 }
  0x9b   : > { %p5417_p5 = por %p5416_p8, %p5415_p7 }
  0x9c   : > { %p5411_p4 = pneg %p5410_p3 }
  0x9e   : > { %p5418_p11 = pnand %p5417_p5, %p5411_p4 }
  0xa0   : > { %5421 = shalt.err (!%p5418_p11)
}
  0xa1   : > { %5181 = dma.hbm_to_vmem [thread:$0]  (!%p6079_p12), %s5974_s30, 16, %s6083_s23, [#allocation13]  }
  0xa2   : > { %s5422_s16 = scalar_lea.hbm %s6984_s3, 16 }
  0xa3   : > { %p5423_p6 = scmp.ne.s32.totalorder %s6984_s3, %s5422_s16  ;;  %p5429_p1 = scmp.lt.u32.totalorder %s5422_s16, %s6984_s3 }
  0xa5   : > { %p5425_p9 = pnand %p5423_p6, %p6090_p0 }
  0xa7   : > { %p5426_p13 = pneg %p5425_p9 }
  0xa9   : > { %p5431_p2 = pnand %p5429_p1, %p5426_p13 }
  0xab   : > { %5434 = shalt.err (!%p5431_p2)
}
  0xac   : > { %s5435_s1 = scalar_lea.vmem %s6086_s18, 16  ;;  %s5442_s11 = scalar_lea.vmem %s6086_s18, 32 }
  0xad   : > { %p5436_p5 = scmp.ne.s32.totalorder %s6086_s18, %s5435_s1  ;;  %p5443_p7 = scmp.lt.s32.totalorder %s6086_s18, %s6086_s18 }
  0xae   : > { %p5444_p8 = scmp.lt.s32.totalorder %s5442_s11, %s5435_s1 }
  0xaf   : > { %p5438_p3 = pnand %p5436_p5, %p6090_p0 }
  0xb0   : > { %p5445_p11 = por %p5444_p8, %p5443_p7 }
  0xb1   : > { %p5439_p4 = pneg %p5438_p3 }
  0xb3   : > { %p5446_p6 = pnand %p5445_p11, %p5439_p4 }
  0xb5   : > { %5449 = shalt.err (!%p5446_p6)
}
  0xb6   : > { %5187 = dma.hbm_to_vmem [thread:$0]  (!%p6079_p12), %s6984_s3, 16, %s6086_s18, [#allocation16]  }
  0xb7   : > { %s6996_s23 = sshll.u32 %s6981_s14, 4  ;;  %s1222_s23 = int_to_ptr.vmem [resolvable:$true] %s6996_s23 }
  0xb8   : > { %s5450_s22 = scalar_lea.vmem %s1222_s23, 64  ;;  %p5458_p2 = scmp.lt.s32.totalorder %s1222_s23, %s1222_s23 }
  0xb9   : > { %p5451_p9 = scmp.ne.s32.totalorder %s1222_s23, %s5450_s22  ;;  %p5459_p5 = scmp.lt.s32.totalorder %s5450_s22, %s5450_s22 }
  0xbb   : > { %p5453_p13 = pnand %p5451_p9, %p6090_p0  ;;  %p5460_p3 = por %p5459_p5, %p5458_p2 }
  0xbd   : > { %p5454_p1 = pneg %p5453_p13 }
  0xbf   : > { %p5461_p7 = pnand %p5460_p3, %p5454_p1 }
  0xc1   : > { %5464 = shalt.err (!%p5461_p7)
}
  0xc2   : > { %s5751_s7 = smov [#allocation2]   ;;  %s6997_s6 = sld [smem:[#allocation45_spill]] }
  0xc3   : > { %5166 = dma.vmem_to_smem (!%p6079_p12), %s1222_s23, 64, %s5751_s7, [#allocation5]  }
  0xc4   : > { %s1278_s16 = sshll.u32 %s5874_s27, 4  ;;  %s1279_s16 = int_to_ptr.vmem [resolvable:$true] %s1278_s16 }
  0xc8   : > { %s1267_s18 = sshll.u32 %s6997_s6, 4  ;;  %s1268_s18 = int_to_ptr.vmem [resolvable:$true] %s1267_s18 }
  0xc9   : > { %s5465_s1 = scalar_lea.vmem %s1268_s18, 64  ;;  %p5473_p6 = scmp.lt.s32.totalorder %s1268_s18, %s1268_s18 }
  0xca   : > { %p5466_p4 = scmp.ne.s32.totalorder %s1268_s18, %s5465_s1  ;;  %p5474_p9 = scmp.lt.s32.totalorder %s5465_s1, %s5465_s1 }
  0xcc   : > { %p5468_p8 = pnand %p5466_p4, %p6090_p0  ;;  %p5475_p13 = por %p5474_p9, %p5473_p6 }
  0xce   : > { %p5469_p11 = pneg %p5468_p8 }
  0xd0   : > { %p5476_p1 = pnand %p5475_p13, %p5469_p11 }
  0xd2   : > { %5479 = shalt.err (!%p5476_p1)
}
  0xd3   : > { %s5752_s11 = smov [#allocation8]   ;;  %s5480_s23 = scalar_lea.vmem %s1279_s16, 16 }
  0xd4   : > { %5172 = dma.vmem_to_smem (!%p6079_p12), %s1268_s18, 64, %s5752_s11, [#allocation7]  }
  0xd5   : > { %p5481_p2 = scmp.ne.s32.totalorder %s1279_s16, %s5480_s23  ;;  %p5488_p7 = scmp.lt.s32.totalorder %s1279_s16, %s1279_s16 }
  0xd6   : > { %p5489_p10 = scmp.lt.s32.totalorder %s5480_s23, %s5480_s23 }
  0xd7   : > { %p5483_p5 = pnand %p5481_p2, %p6090_p0 }
  0xd8   : > { %p5490_p4 = por %p5489_p10, %p5488_p7 }
  0xd9   : > { %p5484_p3 = pneg %p5483_p5 }
  0xdb   : > { %p5491_p8 = pnand %p5490_p4, %p5484_p3 }
  0xdd   : > { %5494 = shalt.err (!%p5491_p8)
}
  0xde   : > { %s5753_s22 = smov [#allocation9]   ;;  %s5754_s7 = smov [#allocation11]  }
  0xdf   : > { %5175 = dma.vmem_to_smem (!%p6079_p12), %s1279_s16, 16, %s5753_s22, [#allocation10]  }
  0xe0   : > { %s1343_s18 = sshll.u32 %s5754_s7, 4  ;;  %s5755_s1 = smov [#allocation14]   ;;  %s1344_s18 = int_to_ptr.vmem [resolvable:$true] %s1343_s18 }
  0xe1   : > { %s1368_s11 = sshll.u32 %s5755_s1, 4  ;;  %s5495_s3 = scalar_lea.hbm %s5969_s20, 16  ;;  %s6146_s11 = int_to_ptr.vmem [resolvable:$true] %s1368_s11 }
  0xe2   : > { %p5496_p11 = scmp.ne.s32.totalorder %s5969_s20, %s5495_s3  ;;  %p5502_p9 = scmp.lt.u32.totalorder %s5495_s3, %s5969_s20 }
  0xe4   : > { %p5498_p10 = pnand %p5496_p11, %p6090_p0 }
  0xe6   : > { %p5499_p6 = pneg %p5498_p10 }
  0xe8   : > { %p5504_p13 = pnand %p5502_p9, %p5499_p6 }
  0xea   : > { %5507 = shalt.err (!%p5504_p13)
}
  0xeb   : > { %s5508_s23 = scalar_lea.vmem %s1344_s18, 16  ;;  %s5515_s16 = scalar_lea.vmem %s1344_s18, 32 }
  0xec   : > { %p5509_p1 = scmp.ne.s32.totalorder %s1344_s18, %s5508_s23  ;;  %p5516_p3 = scmp.lt.s32.totalorder %s1344_s18, %s1344_s18 }
  0xed   : > { %p5517_p7 = scmp.lt.s32.totalorder %s5515_s16, %s5508_s23 }
  0xee   : > { %p5511_p2 = pnand %p5509_p1, %p6090_p0 }
  0xef   : > { %p5518_p4 = por %p5517_p7, %p5516_p3 }
  0xf0   : > { %p5512_p5 = pneg %p5511_p2 }
  0xf2   : > { %p5519_p8 = pnand %p5518_p4, %p5512_p5 }
  0xf4   : > { %5522 = shalt.err (!%p5519_p8)
}
  0xf5   : > { %5178 = dma.hbm_to_vmem [thread:$0]  (!%p6079_p12), %s5969_s20, 16, %s1344_s18, [#allocation3]  }
  0xf6   : > { %s5523_s3 = scalar_lea.hbm %s6982_s12, 16 }
  0xf7   : > { %p5524_p11 = scmp.ne.s32.totalorder %s6982_s12, %s5523_s3  ;;  %p5530_p9 = scmp.lt.u32.totalorder %s5523_s3, %s6982_s12 }
  0xf9   : > { %p5526_p10 = pnand %p5524_p11, %p6090_p0 }
  0xfb   : > { %p5527_p6 = pneg %p5526_p10 }
  0xfd   : > { %p5532_p13 = pnand %p5530_p9, %p5527_p6 }
  0xff   : > { %5535 = shalt.err (!%p5532_p13)
}
 0x100   : > { %s5536_s22 = scalar_lea.vmem %s6146_s11, 16  ;;  %s5543_s7 = scalar_lea.vmem %s6146_s11, 32 }
 0x101   : > { %p5537_p1 = scmp.ne.s32.totalorder %s6146_s11, %s5536_s22  ;;  %p5544_p3 = scmp.lt.s32.totalorder %s6146_s11, %s6146_s11 }
 0x102   : > { %p5545_p7 = scmp.lt.s32.totalorder %s5543_s7, %s5536_s22 }
 0x103   : > { %p5539_p2 = pnand %p5537_p1, %p6090_p0 }
 0x104   : > { %p5546_p4 = por %p5545_p7, %p5544_p3 }
 0x105   : > { %p5540_p5 = pneg %p5539_p2 }
 0x107   : > { %p5547_p8 = pnand %p5546_p4, %p5540_p5 }
 0x109   : > { %5550 = shalt.err (!%p5547_p8)
}
 0x10a   : > { %5184 = dma.hbm_to_vmem [thread:$0]  (!%p6079_p12), %s6982_s12, 16, %s6146_s11, [#allocation13]  }
 0x10b   : > { %s5756_s18 = smov [#allocation17]   ;;  %s5757_s23 = smov [#allocation18]  }
 0x10c   : > { %s1396_s1 = sshll.u32 %s5756_s18, 4  ;;  %s1410_s16 = sshll.u32 %s5757_s23, 4  ;;  %s1397_s1 = int_to_ptr.vmem [resolvable:$true] %s1396_s1  ;;  %s6174_s16 = int_to_ptr.vmem [resolvable:$true] %s1410_s16 }
 0x10d   : > { %s5551_s3 = scalar_lea.hbm %s6983_s8, 16 }
 0x10e   : > { %p5552_p11 = scmp.ne.s32.totalorder %s6983_s8, %s5551_s3  ;;  %p5558_p9 = scmp.lt.u32.totalorder %s5551_s3, %s6983_s8 }
 0x110   : > { %p5554_p10 = pnand %p5552_p11, %p6090_p0 }
 0x112   : > { %p5555_p6 = pneg %p5554_p10 }
 0x114   : > { %p5560_p13 = pnand %p5558_p9, %p5555_p6 }
 0x116   : > { %5563 = shalt.err (!%p5560_p13)
}
 0x117   : > { %s5564_s22 = scalar_lea.vmem %s1397_s1, 16  ;;  %s5571_s11 = scalar_lea.vmem %s1397_s1, 32 }
 0x118   : > { %p5565_p1 = scmp.ne.s32.totalorder %s1397_s1, %s5564_s22  ;;  %p5572_p3 = scmp.lt.s32.totalorder %s1397_s1, %s1397_s1 }
 0x119   : > { %p5573_p7 = scmp.lt.s32.totalorder %s5571_s11, %s5564_s22 }
 0x11a   : > { %p5567_p2 = pnand %p5565_p1, %p6090_p0 }
 0x11b   : > { %p5574_p4 = por %p5573_p7, %p5572_p3 }
 0x11c   : > { %p5568_p5 = pneg %p5567_p2 }
 0x11e   : > { %p5575_p8 = pnand %p5574_p4, %p5568_p5 }
 0x120   : > { %5578 = shalt.err (!%p5575_p8)
}
 0x121   : > { %5190 = dma.hbm_to_vmem [thread:$0]  (!%p6079_p12), %s6983_s8, 16, %s1397_s1, [#allocation16]  }
 0x122   : > { %s5579_s7 = scalar_lea.hbm %s6014_s29, 16 }
 0x123   : > { %p5580_p11 = scmp.ne.s32.totalorder %s6014_s29, %s5579_s7  ;;  %p5586_p9 = scmp.lt.u32.totalorder %s5579_s7, %s6014_s29 }
 0x125   : > { %p5582_p10 = pnand %p5580_p11, %p6090_p0 }
 0x127   : > { %p5583_p6 = pneg %p5582_p10 }
 0x129   : > { %p5588_p13 = pnand %p5586_p9, %p5583_p6 }
 0x12b   : > { %5591 = shalt.err (!%p5588_p13)
}
 0x12c   : > { %s5592_s18 = scalar_lea.vmem %s6174_s16, 16  ;;  %s5599_s23 = scalar_lea.vmem %s6174_s16, 32 }
 0x12d   : > { %p5593_p1 = scmp.ne.s32.totalorder %s6174_s16, %s5592_s18  ;;  %p5600_p3 = scmp.lt.s32.totalorder %s6174_s16, %s6174_s16 }
 0x12e   : > { %p5601_p7 = scmp.lt.s32.totalorder %s5599_s23, %s5592_s18 }
 0x12f   : > { %p5595_p2 = pnand %p5593_p1, %p6090_p0 }
 0x130   : > { %p5602_p4 = por %p5601_p7, %p5600_p3 }
 0x131   : > { %p5596_p5 = pneg %p5595_p2 }
 0x133   : > { %p5603_p8 = pnand %p5602_p4, %p5596_p5 }
 0x135   : > { %5606 = shalt.err (!%p5603_p8)
}
 0x136   : > { %5193 = dma.hbm_to_vmem [thread:$0]  (!%p6079_p12), %s6014_s29, 16, %s6174_s16, [#allocation19]  }
 0x137   : > { %p6998_p11 = scmp.ne.s32.totalorder %s6993_s2, 0 }
 0x138   : > { %p6999_p10 = scmp.eq.s32.totalorder (!%p6998_p11), %s6042_s0, 0 }
 0x139   : > { %1431 = sbr.rel (%p6998_p11) target bundleno = 8091 (0x1f9b), region = 216 }
 0x140   : > { %5652 = dma.done.wait (%p6999_p10), [#allocation5], 64   ;;  %p7000_p0 = pmov %p6999_p10 }
 0x142   : > { %5654 = vsyncadd (%p7000_p0), [#allocation5], 4294967232  ;;  %p7001_p6 = pmov %p7000_p0 }
 0x143   : > { %p7002_p9 = pmov %p7000_p0 }
 0x144   : > { %5656 = dma.done.wait (%p7001_p6), [#allocation7], 80  }
 0x145   : > { %5658 = vsyncadd (%p7002_p9), [#allocation7], 4294967216  ;;  %p7003_p13 = pmov %p7000_p0 }
 0x146   : > { %p7004_p12 = pmov %p7000_p0 }
 0x147   : > { %5660 = dma.done.wait (%p7003_p13), [#allocation10], 16  }
 0x148   : > { %5662 = vsyncadd (%p7004_p12), [#allocation10], 4294967280  ;;  %p7005_p1 = pmov %p7000_p0 }
 0x149   : > { %p7006_p2 = pmov %p7000_p0 }
 0x14a   : > { %5664 = dma.done.wait (%p7005_p1), [#allocation3], 16  }
 0x14b   : > { %5666 = vsyncadd (%p7006_p2), [#allocation3], 4294967280  ;;  %p7007_p5 = pmov %p7000_p0 }
 0x14c   : > { %p7008_p3 = pmov %p7000_p0 }
 0x14d   : > { %5668 = dma.done.wait (%p7007_p5), [#allocation13], 32  }
 0x14e   : > { %5670 = vsyncadd (%p7008_p3), [#allocation13], 4294967264  ;;  %p7009_p7 = pmov %p7000_p0 }
 0x14f   : > { %p7010_p4 = pmov %p7000_p0 }
 0x150   : > { %5672 = dma.done.wait (%p7009_p7), [#allocation16], 32  }
 0x151   : > { %5674 = vsyncadd (%p7010_p4), [#allocation16], 4294967264  ;;  %p7011_p8 = pmov %p7000_p0 }
 0x152   : > { %p7012_p11 = pmov %p7000_p0 }
 0x153   : > { %5676 = dma.done.wait (%p7011_p8), [#allocation19], 16  }
 0x154   : > { %5678 = vsyncadd (%p7012_p11), [#allocation19], 4294967280 }
 0x155   : > { %1473 = sfence }
 0x156   : > { %s7013_s9 = sld [smem:[#allocation30_spill]]  ;;  %s7014_s5 = sld [smem:[#allocation29_spill]]  ;;  %vm1601_vm0 = vcmask 64512   ;;  %vm1711_vm1 = vcmask 261120   ;;  %v1701_v38 = vld [vmem:[%s5799_s25] sm:$0xff]  ;;  %v1702_v39 = vld [vmem:[%s5799_s25 + $0x8] sm:$0xff] }
 0x157   : > { %s7015_s13 = sld [smem:[#allocation31_spill]]  ;;  %p1584_p10 = scmp.lt.s32.totalorder %s6042_s0, 1  ;;  %v1703_v40 = vld [vmem:[%s5799_s25 + $0x10] sm:$0xff]  ;;  %v4945_v41 = vpack.c.bf16 %v1702_v39, %v1701_v38  ;;  %v1704_v42 = vld [vmem:[%s5799_s25 + $0x18] sm:$0xff]  ;;  %v4565_v57 = vld [vmem:[%s5789_s17] ss:$0 sm:$0xff] }
 0x158   : > { %v4949_v43 = vpack.c.bf16 %v1704_v42, %v1703_v40  ;;  %v4566_v59 = vld [vmem:[%s5794_s21] ss:$0 sm:$0xff]  ;;  %s7016_s1 = sld [smem:[#allocation32_spill]]  ;;  %s6932_s16 = smov 112   ;;  %vm1940_vm2 = vcmask 130048   ;;  %vm5762_vm3 = vmmov 0  }
 0x159   : > { %s1585_s19 = scalar_select %p1584_p10, %s6042_s0, 1  ;;  %4946 = vmatprep.subr.bf16.mxu1 %v4945_v41  ;;  %vm3504_vm4 = vcmask 1040384   ;;  %vm3506_vm5 = vcmask 1041408   ;;  %vm3508_vm6 = vcmask 1042432   ;;  %vm3510_vm7 = vcmask 1043456  }
 0x15a   : > { %4948 = vmatpush3.bf16.msra.mxu1 %v4945_v41  ;;  %s7017_s3 = sld [smem:[#allocation34_spill]]  ;;  %s7018_s22 = sld [smem:[#allocation33_spill]]  ;;  %vm3512_vm8 = vcmask 1044480   ;;  %vm3514_vm9 = vcmask 1045504   ;;  %vm3516_vm10 = vcmask 1046528  }
 0x15b   : > { %s4655_s26 = sshll.u32 %s1585_s19, 5  ;;  %4950 = vmatprep.subr.bf16.mxu1 %v4949_v43  ;;  %s7019_s11 = sld [smem:[#allocation37_spill]] }
 0x15c   : > { %v1589_v0 = vld [vmem:[%s7013_s9] sm:$0xff]  ;;  %s1588_s2 = scalar_lea.vmem %s7014_s5, %s4655_s26  ;;  %s6930_s7 = smov 16  }
 0x15d   : > { %4753 = vmatprep.subr.mxu0 %v1589_v0  ;;  %v1591_v1 = vld [vmem:[%s1588_s2] sm:$0xff]  ;;  %v1592_v2 = vld [vmem:[%s1588_s2 + $0x8] sm:$0xff]  ;;  %v1593_v3 = vld [vmem:[%s1588_s2 + $0x10] sm:$0xff]  ;;  %s6318_s23 = sld [smem:[#allocation2 + $0x101]]  ;;  %s6322_s26 = sld [smem:[#allocation2 + $0x100]] }
 0x15e   : > { %4754 = vmatpush3.msra.mxu0 %v1589_v0  ;;  %4755 = vmatprep.mubr.msk.f32.mxu0 %vm1601_vm0, %v1591_v1  ;;  %v1594_v4 = vld [vmem:[%s1588_s2 + $0x18] sm:$0xff]  ;;  %v4560_v5 = vld [vmem:[%s7015_s13] ss:$0 sm:$0xff]  ;;  %s6320_s19 = sld [smem:[#allocation2 + $0x1]]  ;;  %s6324_s2 = sld [smem:[#allocation2]] }
 0x15f   : > { %4756 = vmatmul.mubr.msk.f32.vlgmr.msra.gmra.mrb[0].mxu0 %vm1601_vm0, %v1592_v2  ;;  %4952 = vmatpush3.bf16.msra.mxu1 %v4949_v43  ;;  %s6338_s5 = sld [smem:[#allocation2 + $0x2]]  ;;  %s6343_s8 = sld [smem:[#allocation2 + $0x3]] }
 0x160   : > { %4758 = vmatprep.mubr.msk.f32.mxu0 %vm1601_vm0, %v1593_v3  ;;  %s6340_s6 = sld [smem:[#allocation2 + $0x82]]  ;;  %s6353_s12 = sld [smem:[#allocation2 + $0x83]] }
 0x161   : > { %s7020_s18 = smov %s7019_s11  ;;  %s6345_s9 = sld [smem:[#allocation2 + $0x182]] }
 0x162   : > { %s6494_s13 = sld [smem:[#allocation8 + $0x182]]  ;;  %s6502_s14 = sld [smem:[#allocation8 + $0x83]] }
 0x163   : > { %4759 = vmatmul.mubr.msk.f32.gmra.mrb[2].mxu0 %vm1601_vm0, %v1594_v4  ;;  %p7052_p6 = scmp.ne.s32.totalorder %s6990_s28, 0 }
 0x232   : > { %v4757_v6 = vpop.f32.mrb[0].mxu0 }
 0x233   : > { %v1680_v7 = vpop.f32.mrb[1].mxu0  ;;  %v6239_v9 = vadd.f32 %v4757_v6, %v4560_v5 }
 0x234   : > { %v6237_v8 = vadd.f32 %v4560_v5, %v1680_v7 }
 0x235   : > { %v1715_v16 = vsel %vm1711_vm1, %v6239_v9, 0.0 }
 0x236   : > { %v4760_v10 = vpop.f32.mrb[2].mxu0  ;;  %v1712_v11 = vsel %vm1711_vm1, %v6237_v8, 0.0 }
 0x237   : > { %v1690_v12 = vpop.f32.mrb[3].mxu0  ;;  %1713 = vadd.xlane.f32.xlu0 %v1712_v11  ;;  %v6245_v14 = vadd.f32 %v4760_v10, %v4560_v5 }
 0x238   : > { %v6243_v13 = vadd.f32 %v4560_v5, %v1690_v12  ;;  %v4567_v12 = vld [vmem:[%s7016_s1] ss:$0 sm:$0xff]  ;;  %s6326_s1 = sld [smem:[#allocation2 + $0x80]] }
 0x239   : > { %v1721_v17 = vsel %vm1711_vm1, %v6245_v14, 0.0 }
 0x23a   : > { %v1718_v15 = vsel %vm1711_vm1, %v6243_v13, 0.0 }
 0x23b   : > { %1719 = vadd.xlane.f32.xlu1 %v1718_v15  ;;  %1716 = vadd.xlane.f32.xlu0 %v1715_v16 }
 0x23f   : > { %1722 = vadd.xlane.f32.xlu1 %v1721_v17 }
 0x2c4   : > { %v1714_v18 = vpop.xlane.xlu0 %1713 }
 0x2c5   : > { %v1725_v19 = vmul.f32 0.03125, %v1714_v18 }
 0x2c7   : > { %v1729_v20 = vsub.f32 %v6237_v8, %v1725_v19 }
 0x2c8   : > { %v1720_v21 = vpop.xlane.xlu1 %1719  ;;  %v1717_v22 = vpop.xlane.xlu0 %1716 }
 0x2c9   : > { %v1727_v23 = vmul.f32 0.03125, %v1720_v21  ;;  %v1726_v24 = vmul.f32 0.03125, %v1717_v22  ;;  %v1733_v25 = vmul.f32 %v1729_v20, %v1729_v20 }
 0x2cb   : > { %v1731_v26 = vsub.f32 %v6243_v13, %v1727_v23  ;;  %v1730_v27 = vsub.f32 %v6239_v9, %v1726_v24  ;;  %v1737_v28 = vsel %vm1711_vm1, %v1733_v25, 0.0 }
 0x2cc   : > { %v1723_v29 = vpop.xlane.xlu1 %1722  ;;  %1738 = vadd.xlane.f32.xlu0 %v1737_v28 }
 0x2cd   : > { %v1728_v30 = vmul.f32 0.03125, %v1723_v29  ;;  %v1735_v31 = vmul.f32 %v1731_v26, %v1731_v26  ;;  %v1734_v32 = vmul.f32 %v1730_v27, %v1730_v27 }
 0x2cf   : > { %v1732_v33 = vsub.f32 %v6245_v14, %v1728_v30  ;;  %v1743_v34 = vsel %vm1711_vm1, %v1735_v31, 0.0  ;;  %v1740_v35 = vsel %vm1711_vm1, %v1734_v32, 0.0 }
 0x2d0   : > { %1744 = vadd.xlane.f32.xlu0 %v1743_v34  ;;  %1741 = vadd.xlane.f32.xlu1 %v1740_v35 }
 0x2d1   : > { %v1736_v36 = vmul.f32 %v1732_v33, %v1732_v33 }
 0x2d3   : > { %v1746_v37 = vsel %vm1711_vm1, %v1736_v36, 0.0 }
 0x2d4   : > { %1747 = vadd.xlane.f32.xlu1 %v1746_v37 }
 0x359   : > { %v1739_v44 = vpop.xlane.xlu0 %1738 }
 0x35a   : > { %v1749_v45 = vmul.f32 0.03125, %v1739_v44 }
 0x35c   : > { %v1753_v46 = vadd.f32 1e-05, %v1749_v45 }
 0x35d   : > { %v1742_v47 = vpop.xlane.xlu1 %1741  ;;  %v1745_v48 = vpop.xlane.xlu0 %1744 }
 0x35e   : > { %5317 = vrsqrt.f32 %v1753_v46  ;;  %v1750_v49 = vmul.f32 0.03125, %v1742_v47  ;;  %v1751_v50 = vmul.f32 0.03125, %v1745_v48 }
 0x360   : > { %v1754_v51 = vadd.f32 1e-05, %v1750_v49  ;;  %v1755_v52 = vadd.f32 1e-05, %v1751_v50 }
 0x361   : > { %v1748_v53 = vpop.xlane.xlu1 %1747 }
 0x362   : > { %5319 = vrsqrt.f32 %v1754_v51  ;;  %v1752_v54 = vmul.f32 0.03125, %v1748_v53 }
 0x363   : > { %5321 = vrsqrt.f32 %v1755_v52 }
 0x364   : > { %v1756_v55 = vadd.f32 1e-05, %v1752_v54 }
 0x366   : > { %5323 = vrsqrt.f32 %v1756_v55 }
 0x368   : > { %v5318_v56 = vpop.eup %5317 }
 0x369   : > { %v1761_v58 = vmul.f32 %v5318_v56, %v1729_v20 }
 0x36b   : > { %v1771_v60 = vmul.f32 %v4565_v57, %v1761_v58 }
 0x36c   : > { %v5320_v61 = vpop.eup %5319 }
 0x36d   : > { %v5322_v62 = vpop.eup %5321  ;;  %v1781_v63 = vadd.f32 %v4566_v59, %v1771_v60  ;;  %v1762_v0 = vmul.f32 %v5320_v61, %v1730_v27 }
 0x36e   : > { %v1763_v1 = vmul.f32 %v5322_v62, %v1731_v26 }
 0x36f   : > { %4769 = vmatprep.mubr.msk.f32.mxu1 %vm1711_vm1, %v1781_v63  ;;  %v1772_v2 = vmul.f32 %v4565_v57, %v1762_v0 }
 0x370   : > { %v5324_v3 = vpop.eup %5323  ;;  %v1773_v4 = vmul.f32 %v4565_v57, %v1763_v1 }
 0x371   : > { %v1782_v5 = vadd.f32 %v4566_v59, %v1772_v2  ;;  %v1764_v6 = vmul.f32 %v5324_v3, %v1732_v33 }
 0x372   : > { %v1783_v7 = vadd.f32 %v4566_v59, %v1773_v4 }
 0x373   : > { %4770 = vmatmul.mubr.msk.f32.vlgmr.msra.gmra.mrb[0].mxu1 %vm1711_vm1, %v1782_v5  ;;  %v1774_v10 = vmul.f32 %v4565_v57, %v1764_v6 }
 0x374   : > { %4772 = vmatprep.mubr.msk.f32.mxu1 %vm1711_vm1, %v1783_v7 }
 0x375   : > { %v1784_v11 = vadd.f32 %v4566_v59, %v1774_v10 }
 0x377   : > { %4773 = vmatmul.mubr.msk.f32.gmra.mrb[2].mxu1 %vm1711_vm1, %v1784_v11 }
 0x446   : > { %v4771_v15 = vpop.f32.mrb[0].mxu1 }
 0x447   : > { %v1875_v16 = vadd.f32 %v4771_v15, %v4567_v12  ;;  %v1869_v17 = vpop.f32.mrb[1].mxu1 }
 0x448   : > { %v1870_v18 = vadd.f32 %v4567_v12, %v1869_v17 }
 0x449   : > { %v1893_v19 = vmul.f32 0.044715, %v1875_v16  ;;  %v1889_v45 = vmul.f32 0.5, %v1875_v16 }
 0x44a   : > { %v1892_v20 = vmul.f32 0.044715, %v1870_v18  ;;  %v4774_v21 = vpop.f32.mrb[2].mxu1  ;;  %v1888_v47 = vmul.f32 0.5, %v1870_v18 }
 0x44b   : > { %v1897_v22 = vmul.f32 %v1893_v19, %v1875_v16  ;;  %v1885_v23 = vadd.f32 %v4774_v21, %v4567_v12  ;;  %v1879_v24 = vpop.f32.mrb[3].mxu1 }
 0x44c   : > { %v1896_v25 = vmul.f32 %v1892_v20, %v1870_v18  ;;  %v1880_v26 = vadd.f32 %v4567_v12, %v1879_v24 }
 0x44d   : > { %v1895_v27 = vmul.f32 0.044715, %v1885_v23  ;;  %v1901_v28 = vmul.f32 %v1897_v22, %v1875_v16  ;;  %v1891_v57 = vmul.f32 0.5, %v1885_v23 }
 0x44e   : > { %v1894_v29 = vmul.f32 0.044715, %v1880_v26  ;;  %v1900_v30 = vmul.f32 %v1896_v25, %v1870_v18  ;;  %v1890_v53 = vmul.f32 0.5, %v1880_v26 }
 0x44f   : > { %v1899_v31 = vmul.f32 %v1895_v27, %v1885_v23  ;;  %v1905_v32 = vadd.f32 %v1901_v28, %v1875_v16 }
 0x450   : > { %v1898_v33 = vmul.f32 %v1894_v29, %v1880_v26  ;;  %v1904_v34 = vadd.f32 %v1900_v30, %v1870_v18 }
 0x451   : > { %v1909_v35 = vmul.f32 0.7978846, %v1905_v32  ;;  %v1903_v36 = vmul.f32 %v1899_v31, %v1885_v23  ;;  %v4573_v31 = vld [vmem:[%s7017_s3] ss:$0 sm:$0xff]  ;;  %s6328_s3 = sld [smem:[#allocation2 + $0x81]] }
 0x452   : > { %v1908_v37 = vmul.f32 0.7978846, %v1904_v34  ;;  %v1902_v38 = vmul.f32 %v1898_v33, %v1880_v26  ;;  %v4572_v32 = vld [vmem:[%s7018_s22] ss:$0 sm:$0xff]  ;;  %v1709_v34 = vld [vmem:[%s7020_s18 + $0x8] sm:$0xff]  ;;  %s6330_s22 = sld [smem:[#allocation2 + $0x180]] }
 0x453   : > { %5325 = vtanh.f32 %v1909_v35  ;;  %v1907_v39 = vadd.f32 %v1903_v36, %v1885_v23  ;;  %v1708_v33 = vld [vmem:[%s7019_s11] sm:$0xff]  ;;  %s6332_s11 = sld [smem:[#allocation2 + $0x181]] }
 0x454   : > { %5327 = vtanh.f32 %v1908_v37  ;;  %v1906_v40 = vadd.f32 %v1902_v38, %v1880_v26  ;;  %v4953_v35 = vpack.c.bf16 %v1709_v34, %v1708_v33 }
 0x455   : > { %v1911_v41 = vmul.f32 0.7978846, %v1907_v39 }
 0x456   : > { %v1910_v42 = vmul.f32 0.7978846, %v1906_v40  ;;  %4954 = vmatprep.subr.bf16.mxu0 %v4953_v35 }
 0x457   : > { %5329 = vtanh.f32 %v1911_v41  ;;  %4956 = vmatpush3.bf16.msra.mxu0 %v4953_v35 }
 0x458   : > { %5331 = vtanh.f32 %v1910_v42 }
 0x45d   : > { %v5326_v43 = vpop.eup %5325 }
 0x45e   : > { %v5328_v44 = vpop.eup %5327  ;;  %v1917_v46 = vadd.f32 1.0, %v5326_v43 }
 0x45f   : > { %v1916_v48 = vadd.f32 1.0, %v5328_v44 }
 0x460   : > { %v6272_v49 = vmul.f32 %v1917_v46, %v1889_v45 }
 0x461   : > { %v5330_v50 = vpop.eup %5329  ;;  %v6274_v51 = vmul.f32 %v1916_v48, %v1888_v47 }
 0x462   : > { %v5332_v52 = vpop.eup %5331  ;;  %1930 = vrot.lane.b32.xlu1 %v6272_v49, %s6932_s16  ;;  %v1919_v56 = vadd.f32 1.0, %v5330_v50 }
 0x463   : > { %1928 = vrot.lane.b32.xlu0 %v6274_v51, %s6932_s16  ;;  %v1918_v54 = vadd.f32 1.0, %v5332_v52 }
 0x464   : > { %v6284_v58 = vmul.f32 %v1919_v56, %v1891_v57 }
 0x465   : > { %v6280_v55 = vmul.f32 %v1918_v54, %v1890_v53 }
 0x467   : > { %1932 = vrot.lane.b32.xlu1 %v6280_v55, %s6932_s16 }
 0x46b   : > { %1934 = vrot.lane.b32.xlu1 %v6284_v58, %s6932_s16 }
 0x4d4   : > { %v1931_v59 = vpop.permute.xlu1 %1930 }
 0x4d5   : > { %v1929_v60 = vpop.permute.xlu0 %1928  ;;  %v1944_v61 = vsel %vm1940_vm2, %v1931_v59, 0.0 }
 0x4d6   : > { %1945 = vadd.xlane.f32.xlu1 %v1944_v61  ;;  %v1941_v62 = vsel %vm1940_vm2, %v1929_v60, 0.0 }
 0x4d7   : > { %1942 = vadd.xlane.f32.xlu0 %v1941_v62 }
 0x4d9   : > { %v1933_v63 = vpop.permute.xlu1 %1932 }
 0x4da   : > { %v1947_v0 = vsel %vm1940_vm2, %v1933_v63, 0.0 }
 0x4db   : > { %1948 = vadd.xlane.f32.xlu0 %v1947_v0  ;;  %v2081_v0 = vstv %s6322_s26  ;;  %s6365_s26 = sld [smem:[#allocation2 + $0x183]] }
 0x4dd   : > { %v1935_v1 = vpop.permute.xlu1 %1934 }
 0x4de   : > { %v1950_v2 = vsel %vm1940_vm2, %v1935_v1, 0.0  ;;  %v2084_v1 = vstv %s6318_s23  ;;  %s6357_s23 = sld [smem:[#allocation6 + $0x2]] }
 0x4df   : > { %1951 = vadd.xlane.f32.xlu0 %v1950_v2  ;;  %v2035_v2 = vstv %s6324_s2  ;;  %s4581_s2 = sld [smem:[#allocation6 + $0x1]] }
 0x563   : > { %v1946_v3 = vpop.xlane.xlu1 %1945 }
 0x564   : > { %v1955_v4 = vmul.f32 0.0625, %v1946_v3  ;;  %v1943_v5 = vpop.xlane.xlu0 %1942  ;;  %v2038_v3 = vstv %s6320_s19  ;;  %s6359_s19 = sld [smem:[#allocation6]] }
 0x565   : > { %v1954_v6 = vmul.f32 0.0625, %v1943_v5 }
 0x566   : > { %v1959_v7 = vsub.f32 %v6272_v49, %v1955_v4 }
 0x567   : > { %v1958_v10 = vsub.f32 %v6274_v51, %v1954_v6  ;;  %v2058_v6 = vstv %s6326_s1  ;;  %s7027_s1 = sld [smem:[#allocation44_spill]] }
 0x568   : > { %v1949_v11 = vpop.xlane.xlu0 %1948  ;;  %v1963_v12 = vmul.f32 %v1959_v7, %v1959_v7 }
 0x569   : > { %v1956_v15 = vmul.f32 0.0625, %v1949_v11  ;;  %v1962_v16 = vmul.f32 %v1958_v10, %v1958_v10  ;;  %v2104_v11 = vstv %s6330_s22  ;;  %s7029_s22 = sld [smem:[#allocation46_spill]] }
 0x56a   : > { %1972 = vrot.lane.b32.xlu1 %v1963_v12, %s6932_s16 }
 0x56b   : > { %v6296_v17 = vsub.f32 %v6280_v55, %v1956_v15  ;;  %1970 = vrot.lane.b32.xlu0 %v1962_v16, %s6932_s16 }
 0x56c   : > { %v1952_v18 = vpop.xlane.xlu0 %1951 }
 0x56d   : > { %v1957_v19 = vmul.f32 0.0625, %v1952_v18  ;;  %v1964_v20 = vmul.f32 %v6296_v17, %v6296_v17 }
 0x56f   : > { %v6302_v21 = vsub.f32 %v6284_v58, %v1957_v19  ;;  %1974 = vrot.lane.b32.xlu1 %v1964_v20, %s6932_s16 }
 0x571   : > { %v1965_v22 = vmul.f32 %v6302_v21, %v6302_v21 }
 0x573   : > { %1976 = vrot.lane.b32.xlu1 %v1965_v22, %s6932_s16  ;;  %s6336_s16 = sld [smem:[#allocation2 + $0x103]]  ;;  %v2107_v22 = vstv %s6332_s11  ;;  %s7030_s11 = smov 16  }
 0x5dc   : > { %v1973_v23 = vpop.permute.xlu1 %1972 }
 0x5dd   : > { %v1971_v24 = vpop.permute.xlu0 %1970  ;;  %v1985_v25 = vsel %vm1940_vm2, %v1973_v23, 0.0 }
 0x5de   : > { %1986 = vadd.xlane.f32.xlu1 %v1985_v25  ;;  %v1982_v26 = vsel %vm1940_vm2, %v1971_v24, 0.0  ;;  %v2042_v25 = vstv %s6338_s5  ;;  %s4591_s5 = sld [smem:[#allocation6 + $0x3]] }
 0x5df   : > { %1983 = vadd.xlane.f32.xlu0 %v1982_v26 }
 0x5e1   : > { %v1975_v27 = vpop.permute.xlu1 %1974 }
 0x5e2   : > { %v1988_v30 = vsel %vm1940_vm2, %v1975_v27, 0.0  ;;  %v2092_v27 = vstv %s6336_s16  ;;  %s7025_s16 = sld [smem:[#allocation40_spill]] }
 0x5e5   : > { %v1977_v28 = vpop.permute.xlu1 %1976 }
 0x5e6   : > { %v1991_v29 = vsel %vm1940_vm2, %v1977_v28, 0.0  ;;  %v2046_v28 = vstv %s6343_s8  ;;  %s7022_s8 = sld [smem:[#allocation38_spill]] }
 0x5e7   : > { %1992 = vadd.xlane.f32.xlu0 %v1991_v29  ;;  %v2111_v29 = vstv %s6345_s9  ;;  %s7021_s9 = smov 112  }
 0x5eb   : > { %1989 = vadd.xlane.f32.xlu0 %v1988_v30 }
 0x5ef   : > { %2027 = vrot.lane.b32.xlu1 %v4573_v31, %s6930_s7 }
 0x601   : > { %2015 = vrot.lane.b32.xlu0 %v4572_v32, %s6930_s7  ;;  %s6334_s7 = sld [smem:[#allocation2 + $0x102]] }
 0x607   : > { %v2088_v24 = vstv %s6334_s7  ;;  %s7026_s7 = sld [smem:[#allocation42_spill]] }
 0x66b   : > { %v1987_v36 = vpop.xlane.xlu1 %1986 }
 0x66c   : > { %v1995_v37 = vmul.f32 0.0625, %v1987_v36  ;;  %v1984_v38 = vpop.xlane.xlu0 %1983 }
 0x66d   : > { %v1994_v39 = vmul.f32 0.0625, %v1984_v38 }
 0x66e   : > { %v1999_v40 = vadd.f32 1e-05, %v1995_v37 }
 0x66f   : > { %v1998_v41 = vadd.f32 1e-05, %v1994_v39  ;;  %v2028_v59 = vpop.permute.xlu1 %2027 }
 0x670   : > { %5333 = vrsqrt.f32 %v1999_v40  ;;  %v2069_v40 = vstv %s6353_s12  ;;  %s7024_s12 = sld [smem:[#allocation39_spill]] }
 0x671   : > { %5335 = vrsqrt.f32 %v1998_v41 }
 0x674   : > { %v1993_v42 = vpop.xlane.xlu0 %1992 }
 0x675   : > { %v1997_v43 = vmul.f32 0.0625, %v1993_v42 }
 0x677   : > { %v2001_v44 = vadd.f32 1e-05, %v1997_v43 }
 0x678   : > { %v1990_v45 = vpop.xlane.xlu0 %1989 }
 0x679   : > { %5337 = vrsqrt.f32 %v2001_v44  ;;  %v1996_v46 = vmul.f32 0.0625, %v1990_v45  ;;  %v2096_v45 = vstv %s6357_s23  ;;  %s6468_s23 = sld [smem:[#allocation8 + $0x100]] }
 0x67a   : > { %v5334_v47 = vpop.eup %5333 }
 0x67b   : > { %v5336_v48 = vpop.eup %5335  ;;  %v2000_v50 = vadd.f32 1e-05, %v1996_v46  ;;  %v2007_v53 = vmul.f32 %v5334_v47, %v1959_v7  ;;  %v2061_v7 = vstv %s6328_s3  ;;  %v2050_v46 = vstv %s6359_s19  ;;  %s7028_s3 = sld [smem:[#allocation43_spill]]  ;;  %s6470_s19 = sld [smem:[#allocation8 + $0x101]] }
 0x67c   : > { %v2006_v52 = vmul.f32 %v5336_v48, %v1958_v10  ;;  %v2016_v54 = vpop.permute.xlu0 %2015 }
 0x67d   : > { %5339 = vrsqrt.f32 %v2000_v50  ;;  %v2019_v57 = vmul.f32 %v2016_v54, %v2007_v53  ;;  %v2115_v53 = vstv %s6365_s26  ;;  %s6472_s26 = sld [smem:[#allocation8]] }
 0x67e   : > { %v2018_v56 = vmul.f32 %v2016_v54, %v2006_v52 }
 0x67f   : > { %v2031_v63 = vadd.f32 %v2028_v59, %v2019_v57 }
 0x680   : > { %v2030_v62 = vadd.f32 %v2028_v59, %v2018_v56 }
 0x681   : > { %v2085_v15 = vmul.f32 %v2084_v1, %v2031_v63  ;;  %v2039_v18 = vmul.f32 %v2038_v3, %v2031_v63  ;;  %v2108_v33 = vmul.f32 %v2107_v22, %v2031_v63 }
 0x682   : > { %v2082_v12 = vmul.f32 %v2081_v0, %v2030_v62  ;;  %v2036_v16 = vmul.f32 %v2035_v2, %v2030_v62  ;;  %v2059_v20 = vmul.f32 %v2058_v6, %v2030_v62  ;;  %v2105_v32 = vmul.f32 %v2104_v11, %v2030_v62 }
 0x683   : > { %v5338_v60 = vpop.eup %5337  ;;  %v2119_v0 = vstv %s4591_s5  ;;  %s6476_s5 = sld [smem:[#allocation8 + $0x80]] }
 0x684   : > { %v2009_v61 = vmul.f32 %v5338_v60, %v6302_v21  ;;  %v2062_v21 = vmul.f32 %v2061_v7, %v2031_v63  ;;  %v2086_v30 = vadd.f32 %v2085_v15, %v2082_v12  ;;  %v2040_v31 = vadd.f32 %v2039_v18, %v2036_v16  ;;  %v4592_v12 = vld [vmem:[%s7022_s8] ss:$0 sm:$0xff]  ;;  %s6478_s8 = sld [smem:[#allocation8 + $0x81]] }
 0x685   : > { %v2109_v52 = vadd.f32 %v2108_v33, %v2105_v32  ;;  %v2073_v60 = vstv %s4581_s2  ;;  %s6474_s2 = sld [smem:[#allocation8 + $0x1]] }
 0x686   : > { %v2021_v5 = vmul.f32 %v2016_v54, %v2009_v61  ;;  %v2063_v36 = vadd.f32 %v2062_v21, %v2059_v20 }
 0x687   : > { %v5340_v4 = vpop.eup %5339 }
 0x688   : > { %v2008_v10 = vmul.f32 %v5340_v4, %v6296_v17  ;;  %v2033_v23 = vadd.f32 %v2028_v59, %v2021_v5  ;;  %v2065_v17 = vstv %s6340_s6  ;;  %s7023_s6 = sld [smem:[#allocation41_spill]] }
 0x68a   : > { %v2020_v19 = vmul.f32 %v2016_v54, %v2008_v10  ;;  %v2093_v38 = vmul.f32 %v2092_v27, %v2033_v23  ;;  %v2047_v39 = vmul.f32 %v2046_v28, %v2033_v23  ;;  %v2070_v50 = vmul.f32 %v2069_v40, %v2033_v23 }
 0x68b   : > { %v2116_v61 = vmul.f32 %v2115_v53, %v2033_v23 }
 0x68c   : > { %v2032_v26 = vadd.f32 %v2028_v59, %v2020_v19 }
 0x68e   : > { %v2089_v34 = vmul.f32 %v2088_v24, %v2032_v26  ;;  %v2043_v35 = vmul.f32 %v2042_v25, %v2032_v26  ;;  %v2066_v37 = vmul.f32 %v2065_v17, %v2032_v26  ;;  %v2112_v44 = vmul.f32 %v2111_v29, %v2032_v26 }
 0x690   : > { %v2090_v41 = vadd.f32 %v2089_v34, %v2086_v30  ;;  %v2044_v42 = vadd.f32 %v2043_v35, %v2040_v31  ;;  %v2067_v43 = vadd.f32 %v2066_v37, %v2063_v36  ;;  %v2113_v59 = vadd.f32 %v2112_v44, %v2109_v52  ;;  %v2236_v44 = vld [vmem:[%s7023_s6 + $0x8] sm:$0xff] }
 0x692   : > { %v2094_v47 = vadd.f32 %v2093_v38, %v2090_v41  ;;  %v2048_v48 = vadd.f32 %v2047_v39, %v2044_v42  ;;  %v2071_v57 = vadd.f32 %v2070_v50, %v2067_v43  ;;  %v2117_v63 = vadd.f32 %v2116_v61, %v2113_v59  ;;  %v2235_v43 = vld [vmem:[%s7023_s6] sm:$0xff] }
 0x694   : > { %v2097_v54 = vadd.f32 %v2096_v45, %v2094_v47  ;;  %v2051_v56 = vadd.f32 %v2050_v46, %v2048_v48  ;;  %v2074_v62 = vadd.f32 %v2073_v60, %v2071_v57  ;;  %v2120_v1 = vadd.f32 %v2119_v0, %v2117_v63  ;;  %v2237_v46 = vld [vmem:[%s7023_s6 + $0x10] sm:$0xff]  ;;  %v2238_v47 = vld [vmem:[%s7023_s6 + $0x18] sm:$0xff]  ;;  %s6492_s6 = sld [smem:[#allocation8 + $0x3]] }
 0x695   : > { %v4957_v45 = vpack.c.bf16 %v2236_v44, %v2235_v43  ;;  %v4961_v48 = vpack.c.bf16 %v2238_v47, %v2237_v46 }
 0x696   : > { %2099 = vrot.lane.b32.xlu0 %v2097_v54, %s7021_s9  ;;  %2053 = vrot.lane.b32.xlu1 %v2051_v56, %s7021_s9 }
 0x697   : > { %4958 = vmatprep.subr.bf16.mxu1 %v4957_v45 }
 0x698   : > { %4960 = vmatpush3.bf16.msra.mxu1 %v4957_v45 }
 0x699   : > { %4962 = vmatprep.subr.bf16.mxu1 %v4961_v48 }
 0x69a   : > { %2076 = vrot.lane.b32.xlu1 %v2074_v62, %s7021_s9 }
 0x69c   : > { %4964 = vmatpush3.bf16.msra.mxu1 %v4961_v48 }
 0x69e   : > { %2122 = vrot.lane.b32.xlu1 %v2120_v1, %s7021_s9 }
 0x708   : > { %v2054_v2 = vpop.permute.xlu1 %2053  ;;  %v2100_v4 = vpop.permute.xlu0 %2099 }
 0x709   : > { %v2056_v3 = vmul.f32 %v2054_v2, %v6274_v51  ;;  %v2102_v7 = vmul.f32 %v2100_v4, %v6280_v55  ;;  %v4597_v2 = vld [vmem:[%s7024_s12] ss:$0 sm:$0xff]  ;;  %s6480_s12 = sld [smem:[#allocation8 + $0x180]] }
 0x70b   : > { %4779 = vmatprep.mubr.msk.f32.mxu0 %vm1940_vm2, %v2056_v3 }
 0x70c   : > { %v2077_v5 = vpop.permute.xlu1 %2076 }
 0x70d   : > { %v2079_v6 = vmul.f32 %v2077_v5, %v6272_v49 }
 0x70f   : > { %4780 = vmatmul.mubr.msk.f32.vlgmr.msra.gmra.mrb[4].mxu0 %vm1940_vm2, %v2079_v6  ;;  %v4598_v6 = vld [vmem:[%s7025_s16] ss:$0 sm:$0xff]  ;;  %s6482_s16 = sld [smem:[#allocation8 + $0x181]] }
 0x710   : > { %4782 = vmatprep.mubr.msk.f32.mxu0 %vm1940_vm2, %v2102_v7  ;;  %v2123_v10 = vpop.permute.xlu1 %2122 }
 0x711   : > { %v2125_v11 = vmul.f32 %v2123_v10, %v6284_v58 }
 0x713   : > { %4783 = vmatmul.mubr.msk.f32.gmra.mrb[6].mxu0 %vm1940_vm2, %v2125_v11 }
 0x7e2   : > { %v4781_v15 = vpop.f32.mrb[4].mxu0 }
 0x7e3   : > { %v2216_v51 = vadd.f32 %v4781_v15, %v4592_v12  ;;  %v2210_v16 = vpop.f32.mrb[5].mxu0 }
 0x7e4   : > { %v2211_v18 = vadd.f32 %v4592_v12, %v2210_v16 }
 0x7e5   : > { %v6388_v19 = vadd.f32 %v2216_v51, %v6239_v9 }
 0x7e6   : > { %v6391_v49 = vadd.f32 %v2211_v18, %v6237_v8  ;;  %v4784_v55 = vpop.f32.mrb[6].mxu0 }
 0x7e7   : > { %v2220_v20 = vpop.f32.mrb[7].mxu0  ;;  %v2248_v21 = vsel %vm1711_vm1, %v6388_v19, 0.0  ;;  %v2226_v22 = vadd.f32 %v4784_v55, %v4592_v12 }
 0x7e8   : > { %v2221_v58 = vadd.f32 %v4592_v12, %v2220_v20  ;;  %2249 = vadd.xlane.f32.xlu1 %v2248_v21  ;;  %v2245_v23 = vsel %vm1711_vm1, %v6391_v49, 0.0 }
 0x7e9   : > { %2246 = vadd.xlane.f32.xlu0 %v2245_v23  ;;  %v6401_v9 = vadd.f32 %v2226_v22, %v6245_v14 }
 0x7ea   : > { %v6398_v24 = vadd.f32 %v2221_v58, %v6243_v13  ;;  %v4599_v58 = vld [vmem:[%s7026_s7] ss:$0 sm:$0xff]  ;;  %s6484_s7 = sld [smem:[#allocation8 + $0x102]] }
 0x7eb   : > { %v2254_v25 = vsel %vm1711_vm1, %v6401_v9, 0.0 }
 0x7ec   : > { %v2251_v8 = vsel %vm1711_vm1, %v6398_v24, 0.0 }
 0x7ed   : > { %2252 = vadd.xlane.f32.xlu0 %v2251_v8 }
 0x7f1   : > { %2255 = vadd.xlane.f32.xlu0 %v2254_v25 }
 0x875   : > { %v2250_v17 = vpop.xlane.xlu1 %2249 }
 0x876   : > { %v2258_v26 = vmul.f32 0.03125, %v2250_v17  ;;  %v2247_v27 = vpop.xlane.xlu0 %2246 }
 0x877   : > { %v2257_v28 = vmul.f32 0.03125, %v2247_v27 }
 0x878   : > { %v2262_v29 = vsub.f32 %v6388_v19, %v2258_v26 }
 0x879   : > { %v2261_v13 = vsub.f32 %v6391_v49, %v2257_v28 }
 0x87a   : > { %v2253_v30 = vpop.xlane.xlu0 %2252  ;;  %v2266_v31 = vmul.f32 %v2262_v29, %v2262_v29 }
 0x87b   : > { %v2259_v14 = vmul.f32 0.03125, %v2253_v30  ;;  %v2265_v32 = vmul.f32 %v2261_v13, %v2261_v13 }
 0x87c   : > { %v2272_v33 = vsel %vm1711_vm1, %v2266_v31, 0.0 }
 0x87d   : > { %v2263_v34 = vsub.f32 %v6398_v24, %v2259_v14  ;;  %2273 = vadd.xlane.f32.xlu1 %v2272_v33  ;;  %v2269_v35 = vsel %vm1711_vm1, %v2265_v32, 0.0 }
 0x87e   : > { %2270 = vadd.xlane.f32.xlu0 %v2269_v35  ;;  %v2256_v36 = vpop.xlane.xlu0 %2255 }
 0x87f   : > { %v2260_v37 = vmul.f32 0.03125, %v2256_v36  ;;  %v2267_v38 = vmul.f32 %v2263_v34, %v2263_v34 }
 0x881   : > { %v2264_v39 = vsub.f32 %v6401_v9, %v2260_v37  ;;  %v2275_v40 = vsel %vm1711_vm1, %v2267_v38, 0.0 }
 0x882   : > { %2276 = vadd.xlane.f32.xlu0 %v2275_v40 }
 0x883   : > { %v2268_v41 = vmul.f32 %v2264_v39, %v2264_v39 }
 0x885   : > { %v2278_v42 = vsel %vm1711_vm1, %v2268_v41, 0.0 }
 0x886   : > { %2279 = vadd.xlane.f32.xlu1 %v2278_v42 }
 0x90a   : > { %v2274_v50 = vpop.xlane.xlu1 %2273 }
 0x90b   : > { %v2282_v52 = vmul.f32 0.03125, %v2274_v50  ;;  %v2271_v53 = vpop.xlane.xlu0 %2270 }
 0x90c   : > { %v2281_v54 = vmul.f32 0.03125, %v2271_v53 }
 0x90d   : > { %v2286_v56 = vadd.f32 1e-05, %v2282_v52 }
 0x90e   : > { %v2285_v57 = vadd.f32 1e-05, %v2281_v54 }
 0x90f   : > { %5341 = vrsqrt.f32 %v2286_v56  ;;  %v2277_v59 = vpop.xlane.xlu0 %2276 }
 0x910   : > { %5343 = vrsqrt.f32 %v2285_v57  ;;  %v2283_v60 = vmul.f32 0.03125, %v2277_v59 }
 0x912   : > { %v2287_v61 = vadd.f32 1e-05, %v2283_v60 }
 0x913   : > { %v2280_v62 = vpop.xlane.xlu1 %2279 }
 0x914   : > { %5345 = vrsqrt.f32 %v2287_v61  ;;  %v2284_v63 = vmul.f32 0.03125, %v2280_v62 }
 0x916   : > { %v2288_v0 = vadd.f32 1e-05, %v2284_v63 }
 0x918   : > { %5347 = vrsqrt.f32 %v2288_v0 }
 0x919   : > { %v5342_v1 = vpop.eup %5341 }
 0x91a   : > { %v5344_v3 = vpop.eup %5343  ;;  %v2294_v4 = vmul.f32 %v5342_v1, %v2262_v29 }
 0x91b   : > { %v2293_v5 = vmul.f32 %v5344_v3, %v2261_v13 }
 0x91c   : > { %v2304_v7 = vmul.f32 %v4597_v2, %v2294_v4 }
 0x91d   : > { %v2303_v10 = vmul.f32 %v4597_v2, %v2293_v5 }
 0x91e   : > { %v5346_v11 = vpop.eup %5345  ;;  %v2314_v51 = vadd.f32 %v4598_v6, %v2304_v7 }
 0x91f   : > { %v2313_v12 = vadd.f32 %v4598_v6, %v2303_v10  ;;  %v2295_v15 = vmul.f32 %v5346_v11, %v2263_v34 }
 0x921   : > { %4793 = vmatprep.mubr.msk.f32.mxu1 %vm1711_vm1, %v2313_v12  ;;  %v2305_v16 = vmul.f32 %v4597_v2, %v2295_v15 }
 0x922   : > { %v5348_v18 = vpop.eup %5347  ;;  %4794 = vmatmul.mubr.msk.f32.vlgmr.msra.gmra.mrb[4].mxu1 %vm1711_vm1, %v2314_v51 }
 0x923   : > { %v2315_v55 = vadd.f32 %v4598_v6, %v2305_v16  ;;  %v2296_v20 = vmul.f32 %v5348_v18, %v2264_v39 }
 0x925   : > { %4796 = vmatprep.mubr.msk.f32.mxu1 %vm1711_vm1, %v2315_v55  ;;  %v2306_v21 = vmul.f32 %v4597_v2, %v2296_v20 }
 0x927   : > { %v2316_v22 = vadd.f32 %v4598_v6, %v2306_v21 }
 0x929   : > { %4797 = vmatmul.mubr.msk.f32.gmra.mrb[6].mxu1 %vm1711_vm1, %v2316_v22 }
 0x9f5   : > { %v4795_v23 = vpop.f32.mrb[4].mxu1 }
 0x9f6   : > { %v2407_v8 = vadd.f32 %v4795_v23, %v4599_v58  ;;  %v2401_v25 = vpop.f32.mrb[5].mxu1 }
 0x9f7   : > { %v2402_v17 = vadd.f32 %v4599_v58, %v2401_v25 }
 0x9f8   : > { %v2425_v26 = vmul.f32 0.044715, %v2407_v8  ;;  %v2421_v52 = vmul.f32 0.5, %v2407_v8 }
 0x9f9   : > { %v2424_v27 = vmul.f32 0.044715, %v2402_v17  ;;  %v2420_v54 = vmul.f32 0.5, %v2402_v17 }
 0x9fa   : > { %v2429_v28 = vmul.f32 %v2425_v26, %v2407_v8 }
 0x9fb   : > { %v2428_v29 = vmul.f32 %v2424_v27, %v2402_v17 }
 0x9fc   : > { %v4798_v13 = vpop.f32.mrb[6].mxu1  ;;  %v2433_v30 = vmul.f32 %v2429_v28, %v2407_v8 }
 0x9fd   : > { %v2417_v31 = vadd.f32 %v4798_v13, %v4599_v58  ;;  %v2411_v14 = vpop.f32.mrb[7].mxu1  ;;  %v2432_v32 = vmul.f32 %v2428_v29, %v2402_v17 }
 0x9fe   : > { %v2412_v33 = vadd.f32 %v4599_v58, %v2411_v14  ;;  %v2437_v34 = vadd.f32 %v2433_v30, %v2407_v8 }
 0x9ff   : > { %v2427_v35 = vmul.f32 0.044715, %v2417_v31  ;;  %v2436_v36 = vadd.f32 %v2432_v32, %v2402_v17  ;;  %v2423_v2 = vmul.f32 0.5, %v2417_v31 }
 0xa00   : > { %v2426_v37 = vmul.f32 0.044715, %v2412_v33  ;;  %v2441_v38 = vmul.f32 0.7978846, %v2437_v34  ;;  %v2422_v62 = vmul.f32 0.5, %v2412_v33 }
 0xa01   : > { %v2431_v39 = vmul.f32 %v2427_v35, %v2417_v31  ;;  %v2440_v40 = vmul.f32 0.7978846, %v2436_v36  ;;  %v4605_v35 = vld [vmem:[%s7027_s1] ss:$0 sm:$0xff]  ;;  %s6486_s1 = sld [smem:[#allocation8 + $0x103]] }
 0xa02   : > { %v2430_v41 = vmul.f32 %v2426_v37, %v2412_v33  ;;  %5349 = vtanh.f32 %v2441_v38  ;;  %v4604_v37 = vld [vmem:[%s7028_s3] ss:$0 sm:$0xff]  ;;  %s6488_s3 = sld [smem:[#allocation8 + $0x2]] }
 0xa03   : > { %5351 = vtanh.f32 %v2440_v40  ;;  %v2435_v42 = vmul.f32 %v2431_v39, %v2417_v31  ;;  %v2242_v38 = vld [vmem:[%s7029_s22] sm:$0xff]  ;;  %v2243_v39 = vld [vmem:[%s7029_s22 + $0x8] sm:$0xff] }
 0xa04   : > { %v2434_v43 = vmul.f32 %v2430_v41, %v2412_v33  ;;  %v4965_v40 = vpack.c.bf16 %v2243_v39, %v2242_v38 }
 0xa05   : > { %v2439_v44 = vadd.f32 %v2435_v42, %v2417_v31 }
 0xa06   : > { %v2438_v45 = vadd.f32 %v2434_v43, %v2412_v33  ;;  %4966 = vmatprep.subr.bf16.mxu0 %v4965_v40 }
 0xa07   : > { %v2443_v46 = vmul.f32 0.7978846, %v2439_v44  ;;  %4968 = vmatpush3.bf16.msra.mxu0 %v4965_v40 }
 0xa08   : > { %v2442_v47 = vmul.f32 0.7978846, %v2438_v45 }
 0xa09   : > { %5353 = vtanh.f32 %v2443_v46 }
 0xa0a   : > { %5355 = vtanh.f32 %v2442_v47 }
 0xa0c   : > { %v5350_v48 = vpop.eup %5349 }
 0xa0d   : > { %v5352_v50 = vpop.eup %5351  ;;  %v2449_v53 = vadd.f32 1.0, %v5350_v48 }
 0xa0e   : > { %v2448_v56 = vadd.f32 1.0, %v5352_v50 }
 0xa0f   : > { %v6426_v57 = vmul.f32 %v2449_v53, %v2421_v52 }
 0xa10   : > { %v6428_v59 = vmul.f32 %v2448_v56, %v2420_v54 }
 0xa11   : > { %2462 = vrot.lane.b32.xlu1 %v6426_v57, %s7021_s9 }
 0xa12   : > { %2460 = vrot.lane.b32.xlu0 %v6428_v59, %s7021_s9 }
 0xa13   : > { %v5354_v60 = vpop.eup %5353 }
 0xa14   : > { %v5356_v61 = vpop.eup %5355  ;;  %v2451_v1 = vadd.f32 1.0, %v5354_v60 }
 0xa15   : > { %v2450_v63 = vadd.f32 1.0, %v5356_v61 }
 0xa16   : > { %v6438_v3 = vmul.f32 %v2451_v1, %v2423_v2 }
 0xa17   : > { %v6434_v0 = vmul.f32 %v2450_v63, %v2422_v62 }
 0xa19   : > { %2464 = vrot.lane.b32.xlu1 %v6434_v0, %s7021_s9 }
 0xa1d   : > { %2466 = vrot.lane.b32.xlu1 %v6438_v3, %s7021_s9 }
 0xa83   : > { %v2463_v4 = vpop.permute.xlu1 %2462 }
 0xa84   : > { %v2461_v5 = vpop.permute.xlu0 %2460  ;;  %v2475_v6 = vsel %vm1940_vm2, %v2463_v4, 0.0 }
 0xa85   : > { %2476 = vadd.xlane.f32.xlu1 %v2475_v6  ;;  %v2472_v7 = vsel %vm1940_vm2, %v2461_v5, 0.0 }
 0xa86   : > { %2473 = vadd.xlane.f32.xlu0 %v2472_v7 }
 0xa8b   : > { %v2465_v10 = vpop.permute.xlu1 %2464 }
 0xa8c   : > { %v2478_v11 = vsel %vm1940_vm2, %v2465_v10, 0.0 }
 0xa8d   : > { %2479 = vadd.xlane.f32.xlu0 %v2478_v11  ;;  %v2611_v11 = vstv %s6468_s23  ;;  %s6506_s23 = sld [smem:[#allocation9 + $0x2]] }
 0xa8f   : > { %v2467_v12 = vpop.permute.xlu1 %2466 }
 0xa90   : > { %v2481_v15 = vsel %vm1940_vm2, %v2467_v12, 0.0  ;;  %v2614_v12 = vstv %s6470_s19  ;;  %s6508_s19 = sld [smem:[#allocation9]] }
 0xa91   : > { %2482 = vadd.xlane.f32.xlu0 %v2481_v15  ;;  %v2565_v15 = vstv %s6472_s26  ;;  %s6514_s26 = sld [smem:[#allocation8 + $0x183]] }
 0xb12   : > { %v2477_v51 = vpop.xlane.xlu1 %2476 }
 0xb13   : > { %v2485_v16 = vmul.f32 0.0625, %v2477_v51  ;;  %v2474_v18 = vpop.xlane.xlu0 %2473  ;;  %v2568_v51 = vstv %s6474_s2  ;;  %s6519_s2 = sld [smem:[#allocation9 + $0x1]] }
 0xb14   : > { %v2484_v55 = vmul.f32 0.0625, %v2474_v18 }
 0xb15   : > { %v2489_v20 = vsub.f32 %v6426_v57, %v2485_v16 }
 0xb16   : > { %v2488_v21 = vsub.f32 %v6428_v59, %v2484_v55  ;;  %v2588_v55 = vstv %s6476_s5  ;;  %s7031_s5 = sld [smem:[#allocation48_spill]] }
 0xb17   : > { %v2493_v22 = vmul.f32 %v2489_v20, %v2489_v20 }
 0xb18   : > { %v2492_v58 = vmul.f32 %v2488_v21, %v2488_v21 }
 0xb19   : > { %2502 = vrot.lane.b32.xlu1 %v2493_v22, %s7021_s9  ;;  %v2634_v22 = vstv %s6480_s12  ;;  %s7036_s12 = sld [smem:[#allocation54_spill]] }
 0xb1a   : > { %v2480_v23 = vpop.xlane.xlu0 %2479  ;;  %2500 = vrot.lane.b32.xlu0 %v2492_v58, %s7021_s9 }
 0xb1b   : > { %v2486_v8 = vmul.f32 0.0625, %v2480_v23 }
 0xb1d   : > { %v6451_v25 = vsub.f32 %v6434_v0, %v2486_v8 }
 0xb1e   : > { %v2483_v17 = vpop.xlane.xlu0 %2482 }
 0xb1f   : > { %v2487_v26 = vmul.f32 0.0625, %v2483_v17  ;;  %v2494_v27 = vmul.f32 %v6451_v25, %v6451_v25 }
 0xb21   : > { %v2491_v28 = vsub.f32 %v6438_v3, %v2487_v26  ;;  %2504 = vrot.lane.b32.xlu1 %v2494_v27, %s7021_s9 }
 0xb23   : > { %v2495_v29 = vmul.f32 %v2491_v28, %v2491_v28 }
 0xb25   : > { %2506 = vrot.lane.b32.xlu1 %v2495_v29, %s7021_s9  ;;  %v2637_v29 = vstv %s6482_s16  ;;  %s7037_s16 = sld [smem:[#allocation52_spill]] }
 0xb8b   : > { %v2503_v13 = vpop.permute.xlu1 %2502 }
 0xb8c   : > { %v2501_v30 = vpop.permute.xlu0 %2500  ;;  %v2515_v31 = vsel %vm1940_vm2, %v2503_v13, 0.0 }
 0xb8d   : > { %2516 = vadd.xlane.f32.xlu1 %v2515_v31  ;;  %v2512_v14 = vsel %vm1940_vm2, %v2501_v30, 0.0  ;;  %v2618_v30 = vstv %s6484_s7  ;;  %v2572_v31 = vstv %s6488_s3  ;;  %s7038_s7 = sld [smem:[#allocation53_spill]]  ;;  %s7040_s3 = sld [smem:[#allocation56_spill]] }
 0xb8e   : > { %2513 = vadd.xlane.f32.xlu0 %v2512_v14 }
 0xb93   : > { %v2505_v32 = vpop.permute.xlu1 %2504 }
 0xb94   : > { %v2518_v36 = vsel %vm1940_vm2, %v2505_v32, 0.0  ;;  %v2622_v32 = vstv %s6486_s1  ;;  %s7039_s1 = sld [smem:[#allocation55_spill]] }
 0xb97   : > { %v2507_v33 = vpop.permute.xlu1 %2506 }
 0xb98   : > { %v2521_v34 = vsel %vm1940_vm2, %v2507_v33, 0.0  ;;  %v2576_v33 = vstv %s6492_s6  ;;  %s7034_s6 = sld [smem:[#allocation49_spill]] }
 0xb99   : > { %2522 = vadd.xlane.f32.xlu0 %v2521_v34  ;;  %v2641_v34 = vstv %s6494_s13  ;;  %s4623_s13 = sld [smem:[#allocation9 + $0x3]] }
 0xb9d   : > { %2519 = vadd.xlane.f32.xlu0 %v2518_v36 }
 0xb9e   : > { %2557 = vrot.lane.b32.xlu1 %v4605_v35, %s7030_s11 }
 0xbb3   : > { %2545 = vrot.lane.b32.xlu0 %v4604_v37, %s7030_s11  ;;  %s6490_s11 = sld [smem:[#allocation8 + $0x82]] }
 0xc1a   : > { %v2517_v41 = vpop.xlane.xlu1 %2516 }
 0xc1b   : > { %v2525_v42 = vmul.f32 0.0625, %v2517_v41  ;;  %v2514_v43 = vpop.xlane.xlu0 %2513 }
 0xc1c   : > { %v2524_v44 = vmul.f32 0.0625, %v2514_v43 }
 0xc1d   : > { %v2529_v45 = vadd.f32 1e-05, %v2525_v42 }
 0xc1e   : > { %v2528_v46 = vadd.f32 1e-05, %v2524_v44  ;;  %v2558_v4 = vpop.permute.xlu1 %2557 }
 0xc1f   : > { %5357 = vrsqrt.f32 %v2529_v45  ;;  %v2599_v45 = vstv %s6502_s14  ;;  %s7032_s14 = sld [smem:[#allocation50_spill]] }
 0xc20   : > { %5359 = vrsqrt.f32 %v2528_v46 }
 0xc26   : > { %v2523_v47 = vpop.xlane.xlu0 %2522 }
 0xc27   : > { %v2527_v48 = vmul.f32 0.0625, %v2523_v47 }
 0xc29   : > { %v2531_v50 = vadd.f32 1e-05, %v2527_v48  ;;  %v5358_v54 = vpop.eup %5357 }
 0xc2a   : > { %v2520_v52 = vpop.xlane.xlu0 %2519  ;;  %v5360_v60 = vpop.eup %5359  ;;  %v2537_v63 = vmul.f32 %v5358_v54, %v2489_v20  ;;  %v2591_v20 = vstv %s6478_s8  ;;  %s7035_s8 = sld [smem:[#allocation51_spill]] }
 0xc2b   : > { %5361 = vrsqrt.f32 %v2531_v50  ;;  %v2526_v53 = vmul.f32 0.0625, %v2520_v52  ;;  %v2536_v62 = vmul.f32 %v5360_v60, %v2488_v21  ;;  %v2626_v52 = vstv %s6506_s23  ;;  %s7041_s23 = sld [smem:[#allocation57_spill]] }
 0xc2d   : > { %v2530_v56 = vadd.f32 1e-05, %v2526_v53  ;;  %v2580_v53 = vstv %s6508_s19  ;;  %s7042_s19 = sld [smem:[#allocation59_spill]] }
 0xc2e   : > { %v2546_v61 = vpop.permute.xlu0 %2545 }
 0xc2f   : > { %5363 = vrsqrt.f32 %v2530_v56  ;;  %v2548_v1 = vmul.f32 %v2546_v61, %v2536_v62  ;;  %v2549_v2 = vmul.f32 %v2546_v61, %v2537_v63  ;;  %v2645_v62 = vstv %s6514_s26  ;;  %v2772_v63 = vld [vmem:[%s7031_s5 + $0x48] sm:$0xff]  ;;  %s7043_s26 = sld [smem:[#allocation58_spill]] }
 0xc31   : > { %v2560_v7 = vadd.f32 %v2558_v4, %v2548_v1  ;;  %v2561_v10 = vadd.f32 %v2558_v4, %v2549_v2  ;;  %v2774_v1 = vld [vmem:[%s7031_s5 + $0x58] sm:$0xff]  ;;  %v2771_v2 = vld [vmem:[%s7031_s5 + $0x40] sm:$0xff] }
 0xc33   : > { %v2612_v58 = vmul.f32 %v2611_v11, %v2560_v7  ;;  %v2615_v23 = vmul.f32 %v2614_v12, %v2561_v10  ;;  %v2566_v8 = vmul.f32 %v2565_v15, %v2560_v7  ;;  %v2569_v17 = vmul.f32 %v2568_v51, %v2561_v10 }
 0xc34   : > { %v2589_v27 = vmul.f32 %v2588_v55, %v2560_v7  ;;  %v2635_v37 = vmul.f32 %v2634_v22, %v2560_v7  ;;  %v2638_v38 = vmul.f32 %v2637_v29, %v2561_v10  ;;  %v2603_v11 = vstv %s6519_s2  ;;  %s7044_s2 = sld [smem:[#allocation60_spill]] }
 0xc35   : > { %v5362_v5 = vpop.eup %5361  ;;  %v2616_v35 = vadd.f32 %v2615_v23, %v2612_v58  ;;  %v2570_v36 = vadd.f32 %v2569_v17, %v2566_v8  ;;  %v4969_v12 = vpack.c.bf16 %v2774_v1, %v2772_v63  ;;  %v2649_v55 = vstv %s4623_s13  ;;  %s7045_s13 = sld [smem:[#allocation63_spill]] }
 0xc36   : > { %v2539_v6 = vmul.f32 %v5362_v5, %v2491_v28  ;;  %v2592_v28 = vmul.f32 %v2591_v20, %v2561_v10  ;;  %v2773_v10 = vld [vmem:[%s7031_s5 + $0x50] sm:$0xff] }
 0xc37   : > { %v4971_v15 = vpack.c.bf16 %v2773_v10, %v2771_v2  ;;  %4970 = vmatprep.subr.bf16.mxu1 %v4969_v12 }
 0xc38   : > { %v2551_v18 = vmul.f32 %v2546_v61, %v2539_v6  ;;  %v2593_v41 = vadd.f32 %v2592_v28, %v2589_v27  ;;  %v2778_v28 = vld [vmem:[%s7031_s5 + $0x78] sm:$0xff] }
 0xc39   : > { %v5364_v16 = vpop.eup %5363  ;;  %4972 = vmatpush1.bf16.msra.mxu1 %v4971_v15  ;;  %v2783_v15 = vld [vmem:[%s7031_s5 + $0xa0] sm:$0xff] }
 0xc3a   : > { %v2538_v21 = vmul.f32 %v5364_v16, %v6451_v25  ;;  %v2563_v13 = vadd.f32 %v2558_v4, %v2551_v18  ;;  %v2595_v25 = vstv %s6490_s11  ;;  %s5763_s11 = smov 64  }
 0xc3c   : > { %v2550_v26 = vmul.f32 %v2546_v61, %v2538_v21  ;;  %v2623_v43 = vmul.f32 %v2622_v32, %v2563_v13  ;;  %v2577_v44 = vmul.f32 %v2576_v33, %v2563_v13  ;;  %v2600_v60 = vmul.f32 %v2599_v45, %v2563_v13  ;;  %v2797_v32 = vld [vmem:[%s7032_s14 + $0x8] sm:$0xff]  ;;  %v2798_v33 = vld [vmem:[%s7032_s14 + $0x10] sm:$0xff] }
 0xc3d   : > { %v2639_v61 = vadd.f32 %v2638_v38, %v2635_v37  ;;  %v2646_v51 = vmul.f32 %v2645_v62, %v2563_v13  ;;  %v2775_v13 = vld [vmem:[%s7031_s5 + $0x60] sm:$0xff]  ;;  %v2768_v45 = vld [vmem:[%s7031_s5 + $0x28] sm:$0xff]  ;;  %v2782_v62 = vld [vmem:[%s7031_s5 + $0x98] sm:$0xff] }
 0xc3e   : > { %v2562_v14 = vadd.f32 %v2558_v4, %v2550_v26  ;;  %v2800_v38 = vld [vmem:[%s7032_s14 + $0x20] sm:$0xff] }
 0xc40   : > { %v2619_v39 = vmul.f32 %v2618_v30, %v2562_v14  ;;  %v2573_v40 = vmul.f32 %v2572_v31, %v2562_v14  ;;  %v2596_v42 = vmul.f32 %v2595_v25, %v2562_v14  ;;  %v2642_v50 = vmul.f32 %v2641_v34, %v2562_v14  ;;  %v2766_v31 = vld [vmem:[%s7031_s5 + $0x18] sm:$0xff]  ;;  %v2796_v14 = vld [vmem:[%s7032_s14] sm:$0xff] }
 0xc41   : > { %v5761_v34 = vmov 0.0|0.0  }
 0xc42   : > { %v2620_v46 = vadd.f32 %v2619_v39, %v2616_v35  ;;  %v2574_v47 = vadd.f32 %v2573_v40, %v2570_v36  ;;  %v2597_v48 = vadd.f32 %v2596_v42, %v2593_v41  ;;  %v2643_v7 = vadd.f32 %v2642_v50, %v2639_v61  ;;  %5001 = vmatprep.subr.bf16.mxu0 %v5761_v34  ;;  %v2799_v36 = vld [vmem:[%s7032_s14 + $0x18] sm:$0xff]  ;;  %v2801_v39 = vld [vmem:[%s7032_s14 + $0x28] sm:$0xff]  ;;  %v2763_v42 = vld [vmem:[%s7031_s5] sm:$0xff] }
 0xc43   : > { %v5002_v35 = vpack.c.bf16 %v2797_v32, %v2796_v14  ;;  %v5005_v37 = vpack.c.bf16 %v2799_v36, %v2798_v33  ;;  %v5008_v40 = vpack.c.bf16 %v2801_v39, %v2800_v38  ;;  %v2780_v61 = vld [vmem:[%s7031_s5 + $0x88] sm:$0xff]  ;;  %v2807_v14 = vld [vmem:[%s7032_s14 + $0x58] sm:$0xff]  ;;  %v2808_v33 = vld [vmem:[%s7032_s14 + $0x60] sm:$0xff] }
 0xc44   : > { %v2624_v54 = vadd.f32 %v2623_v43, %v2620_v46  ;;  %v2578_v56 = vadd.f32 %v2577_v44, %v2574_v47  ;;  %v2601_v6 = vadd.f32 %v2600_v60, %v2597_v48  ;;  %v2647_v18 = vadd.f32 %v2646_v51, %v2643_v7  ;;  %v2765_v43 = vld [vmem:[%s7031_s5 + $0x10] sm:$0xff]  ;;  %v2770_v46 = vld [vmem:[%s7031_s5 + $0x38] sm:$0xff] }
 0xc45   : > { %v4979_v50 = vpack.c.bf16 %v2765_v43, %v2763_v42  ;;  %v4985_v2 = vpack.c.bf16 %v2782_v62, %v2780_v61  ;;  %v2786_v7 = vld [vmem:[%s7031_s5 + $0xb8] sm:$0xff]  ;;  %v2785_v51 = vld [vmem:[%s7031_s5 + $0xb0] sm:$0xff] }
 0xc46   : > { %v2627_v4 = vadd.f32 %v2626_v52, %v2624_v54  ;;  %v2581_v5 = vadd.f32 %v2580_v53, %v2578_v56  ;;  %v2604_v16 = vadd.f32 %v2603_v11, %v2601_v6  ;;  %v2650_v20 = vadd.f32 %v2649_v55, %v2647_v18  ;;  %v2767_v54 = vld [vmem:[%s7031_s5 + $0x20] sm:$0xff]  ;;  %v2769_v56 = vld [vmem:[%s7031_s5 + $0x30] sm:$0xff]  ;;  %v2784_v6 = vld [vmem:[%s7031_s5 + $0xa8] sm:$0xff] }
 0xc47   : > { %v4981_v53 = vpack.c.bf16 %v2770_v46, %v2768_v45  ;;  %v4983_v1 = vpack.c.bf16 %v2769_v56, %v2767_v54  ;;  %v4989_v12 = vpack.c.bf16 %v2786_v7, %v2784_v6  ;;  %v2790_v18 = vld [vmem:[%s7031_s5 + $0xd8] sm:$0xff]  ;;  %v4991_v55 = vpack.c.bf16 %v2785_v51, %v2783_v15  ;;  %v2810_v36 = vld [vmem:[%s7032_s14 + $0x70] sm:$0xff] }
 0xc48   : > { %2629 = vrot.lane.b32.xlu0 %v2627_v4, %s7021_s9  ;;  %2583 = vrot.lane.b32.xlu1 %v2581_v5, %s7021_s9  ;;  %v2779_v4 = vld [vmem:[%s7031_s5 + $0x80] sm:$0xff]  ;;  %v2781_v5 = vld [vmem:[%s7031_s5 + $0x90] sm:$0xff]  ;;  %v3118_v46 = vlaneseq }
 0xc49   : > { %v4987_v10 = vpack.c.bf16 %v2781_v5, %v2779_v4  ;;  %v2811_v38 = vld [vmem:[%s7032_s14 + $0x78] sm:$0xff]  ;;  %v2814_v43 = vld [vmem:[%s7032_s14 + $0x90] sm:$0xff] }
 0xc4a   : > { %v5023_v39 = vpack.c.bf16 %v2811_v38, %v2810_v36  ;;  %v6652_v38 = vld [vmem:[%s7039_s1] sm:$0x1] }
 0xc4c   : > { %2606 = vrot.lane.b32.xlu1 %v2604_v16, %s7021_s9  ;;  %v2788_v16 = vld [vmem:[%s7031_s5 + $0xc8] sm:$0xff] }
 0xc50   : > { %2652 = vrot.lane.b32.xlu1 %v2650_v20, %s7021_s9  ;;  %s7033_s9 = sld [smem:[#allocation47_spill]] }
 0xc56   : > { %v4624_v41 = vld [vmem:[%s7033_s9] ss:$0 sm:$0xff]  ;;  %s7046_s9 = sld [smem:[#allocation61_spill]] }
 0xcba   : > { %v2584_v21 = vpop.permute.xlu1 %2583  ;;  %v2630_v58 = vpop.permute.xlu0 %2629 }
 0xcbb   : > { %v2586_v22 = vmul.f32 %v2584_v21, %v6428_v59  ;;  %v2632_v17 = vmul.f32 %v2630_v58, %v6434_v0  ;;  %v2776_v59 = vld [vmem:[%s7031_s5 + $0x68] sm:$0xff]  ;;  %v4993_v21 = vpack.c.bf16 %v2790_v18, %v2788_v16 }
 0xcbc   : > { %v4973_v29 = vpack.c.bf16 %v2778_v28, %v2776_v59  ;;  %v2764_v0 = vld [vmem:[%s7031_s5 + $0x8] sm:$0xff]  ;;  %v2793_v59 = vld [vmem:[%s7031_s5 + $0xf0] sm:$0xff] }
 0xcbd   : > { %4803 = vmatprep.mubr.msk.f32.mxu0 %vm1940_vm2, %v2586_v22  ;;  %v4977_v25 = vpack.c.bf16 %v2766_v31, %v2764_v0  ;;  %v2789_v22 = vld [vmem:[%s7031_s5 + $0xd0] sm:$0xff]  ;;  %v2792_v58 = vld [vmem:[%s7031_s5 + $0xe8] sm:$0xff]  ;;  %v2804_v0 = vld [vmem:[%s7032_s14 + $0x40] sm:$0xff] }
 0xcbe   : > { %v2607_v23 = vpop.permute.xlu1 %2606  ;;  %4974 = vmatprep.subr.bf16.mxu1 %v4973_v29  ;;  %v2805_v31 = vld [vmem:[%s7032_s14 + $0x48] sm:$0xff] }
 0xcbf   : > { %v2609_v8 = vmul.f32 %v2607_v23, %v6426_v57  ;;  %v2777_v57 = vld [vmem:[%s7031_s5 + $0x70] sm:$0xff]  ;;  %v2794_v23 = vld [vmem:[%s7031_s5 + $0xf8] sm:$0xff] }
 0xcc0   : > { %v4975_v30 = vpack.c.bf16 %v2777_v57, %v2775_v13  ;;  %v2802_v13 = vld [vmem:[%s7032_s14 + $0x30] sm:$0xff]  ;;  %v2803_v57 = vld [vmem:[%s7032_s14 + $0x38] sm:$0xff] }
 0xcc1   : > { %4804 = vmatmul.mubr.msk.f32.vlgmr.msra.gmra.mrb[8].mxu0 %vm1940_vm2, %v2609_v8 }
 0xcc2   : > { %4806 = vmatprep.mubr.msk.f32.mxu0 %vm1940_vm2, %v2632_v17  ;;  %v2653_v26 = vpop.permute.xlu1 %2652  ;;  %4976 = vmatpush1.bf16.msra.mxu1 %v4975_v30  ;;  %v5011_v30 = vpack.c.bf16 %v2803_v57, %v2802_v13  ;;  %v3231_v57 = vld [vmem:[%s7036_s12 + $0x10] sm:$0xff] }
 0xcc3   : > { %v2655_v27 = vmul.f32 %v2653_v26, %v6438_v3  ;;  %v5760_v3 = vmov 0.0   ;;  %4978 = vmatprep.subr.bf16.mxu1 %v4977_v25  ;;  %5003 = vmatpush1.bf16.msra.mxu0 %v5002_v35  ;;  %v4997_v26 = vpack.c.bf16 %v2794_v23, %v2792_v58  ;;  %v5014_v25 = vpack.c.bf16 %v2805_v31, %v2804_v0  ;;  %v2809_v35 = vld [vmem:[%s7032_s14 + $0x68] sm:$0xff] }
 0xcc4   : > { %2884 = vmatprep.mubr.f32.mxu1 %v5760_v3  ;;  %5004 = vmatprep.subr.bf16.mxu0 %v5761_v34 }
 0xcc5   : > { %4807 = vmatmul.mubr.msk.f32.gmra.mrb[10].mxu0 %vm1940_vm2, %v2655_v27  ;;  %v2791_v27 = vld [vmem:[%s7031_s5 + $0xe0] sm:$0xff] }
 0xcc6   : > { %v4999_v28 = vpack.c.bf16 %v2793_v59, %v2791_v27 }
 0xcc7   : > { %5006 = vmatpush1.bf16.msra.mxu0 %v5005_v37  ;;  %v5020_v37 = vpack.c.bf16 %v2809_v35, %v2808_v33  ;;  %v4636_v35 = vld [vmem:[%s7038_s7] ss:$0 sm:$0xff]  ;;  %s7050_s7 = sld [smem:[#allocation68_spill]] }
 0xcc8   : > { %5007 = vmatprep.subr.bf16.mxu0 %v5761_v34 }
 0xccb   : > { %5009 = vmatpush1.bf16.msra.mxu0 %v5008_v40  ;;  %v2812_v40 = vld [vmem:[%s7032_s14 + $0x80] sm:$0xff] }
 0xccc   : > { %5010 = vmatprep.subr.bf16.mxu0 %v5761_v34 }
 0xccd   : > { %s7051_s1 = smov %s7050_s7 }
 0xccf   : > { %5012 = vmatpush1.bf16.msra.mxu0 %v5011_v30  ;;  %v3232_v30 = vld [vmem:[%s7036_s12 + $0x18] sm:$0xff] }
 0xcd0   : > { %5013 = vmatprep.subr.bf16.mxu0 %v5761_v34  ;;  %v5035_v0 = vpack.c.bf16 %v3232_v30, %v3231_v57 }
 0xcd3   : > { %5015 = vmatpush1.bf16.msra.mxu0 %v5014_v25 }
 0xcd4   : > { %5016 = vmatprep.subr.bf16.mxu0 %v5761_v34 }
 0xd94   : > { %v4805_v44 = vpop.f32.mrb[8].mxu0 }
 0xd95   : > { %v2746_v47 = vadd.f32 %v4805_v44, %v4624_v41  ;;  %v2740_v48 = vpop.f32.mrb[9].mxu0  ;;  %v2815_v44 = vld [vmem:[%s7032_s14 + $0x98] sm:$0xff] }
 0xd96   : > { %v5029_v45 = vpack.c.bf16 %v2815_v44, %v2814_v43 }
 0xd97   : > { %v2760_v52 = vadd.f32 %v2746_v47, %v6388_v19  ;;  %v2741_v19 = vadd.f32 %v4624_v41, %v2740_v48  ;;  %v6615_v47 = vshrl.u32 %v3118_v46, 7 }
 0xd98   : > { %v4808_v60 = vpop.f32.mrb[10].mxu0 }
 0xd99   : > { %v2750_v63 = vpop.f32.mrb[11].mxu0  ;;  %4629 = vmatmul.mubr.msk.f32.vlgmr.msra.gmra.mrb[8].mxu1 %vm1711_vm1, %v2760_v52  ;;  %v2759_v11 = vadd.f32 %v2741_v19, %v6391_v49  ;;  %v2787_v49 = vld [vmem:[%s7031_s5 + $0xc0] sm:$0xff]  ;;  %v2756_v29 = vadd.f32 %v4808_v60, %v4624_v41  ;;  %v6618_v48 = vsub.s32 0, %v6615_v47  ;;  %v3124_v52 = vsub.s32 1, %v6615_v47 }
 0xd9a   : > { %4980 = vmatpush1.bf16.msra.mxu1 %v4979_v50  ;;  %2958 = vmatprep.mubr.f32.mxu1 %v5760_v3  ;;  %v2751_v20 = vadd.f32 %v4624_v41, %v2750_v63  ;;  %v4995_v8 = vpack.c.bf16 %v2789_v22, %v2787_v49  ;;  %v2813_v41 = vld [vmem:[%s7032_s14 + $0x88] sm:$0xff]  ;;  %v2795_v50 = vld [vmem:[%s7034_s6] sm:$0x3]  ;;  %s7047_s6 = sld [smem:[#allocation62_spill]] }
 0xd9b   : > { %4982 = vmatprep.subr.bf16.mxu1 %v4981_v53  ;;  %v5026_v42 = vpack.c.bf16 %v2813_v41, %v2812_v40  ;;  %v3121_v53 = vrot.slane %v2795_v50, %v6618_v48  ;;  %v3125_v54 = vrot.slane %v2795_v50, %v3124_v52  ;;  %v4633_v49 = vld [vmem:[%s7035_s8] ss:$0 sm:$0xff]  ;;  %v3357_v41 = vmul.f32 0.0, %v6652_v38  ;;  %s7048_s8 = sld [smem:[#allocation64_spill]] }
 0xd9c   : > { %v2761_v17 = vadd.f32 %v2751_v20, %v6398_v24  ;;  %v2762_v24 = vadd.f32 %v2756_v29, %v6401_v9  ;;  %v2806_v9 = vld [vmem:[%s7032_s14 + $0x50] sm:$0xff]  ;;  %v3229_v29 = vld [vmem:[%s7036_s12] sm:$0xff]  ;;  %v5764_v50 = vmov 1966171168  }
 0xd9d   : > { %v5017_v32 = vpack.c.bf16 %v2807_v14, %v2806_v9  ;;  %v3370_v52 = vunpack.c.l.s4 %v5764_v50 }
 0xd9e   : > { %4984 = vmatpush1.bf16.msra.mxu1 %v4983_v1 }
 0xd9f   : > { %4986 = vmatprep.subr.bf16.mxu1 %v4985_v2  ;;  %5018 = vmatpush1.bf16.msra.mxu0 %v5017_v32  ;;  %v4635_v32 = vld [vmem:[%s7037_s16] ss:$0 sm:$0xff]  ;;  %s7049_s16 = sld [smem:[#allocation66_spill]] }
 0xda0   : > { %5019 = vmatprep.subr.bf16.mxu0 %v5761_v34 }
 0xda1   : > { %4630 = vmatmul.mubr.msk.f32.vlgmr.msra.gmra.mrb[8].mxu1 %vm1711_vm1, %v2759_v11 }
 0xda2   : > { %4988 = vmatpush1.bf16.msra.mxu1 %v4987_v10  ;;  %3032 = vmatprep.mubr.f32.mxu1 %v5760_v3 }
 0xda3   : > { %4990 = vmatprep.subr.bf16.mxu1 %v4989_v12  ;;  %5021 = vmatpush1.bf16.msra.mxu0 %v5020_v37 }
 0xda4   : > { %5022 = vmatprep.subr.bf16.mxu0 %v5761_v34 }
 0xda6   : > { %4992 = vmatpush1.bf16.msra.mxu1 %v4991_v55 }
 0xda7   : > { %4994 = vmatprep.subr.bf16.mxu1 %v4993_v21  ;;  %5024 = vmatpush1.bf16.msra.mxu0 %v5023_v39  ;;  %v6655_v39 = vld [vmem:[%s7040_s3] sm:$0x1]  ;;  %s1581_s3 = sand.u32 1, %s5689_s10  }
 0xda8   : > { %5025 = vmatprep.subr.bf16.mxu0 %v5761_v34 }
 0xda9   : > { %4631 = vmatmul.mubr.msk.f32.vlgmr.msra.gmra.mrb[8].mxu1 %vm1711_vm1, %v2761_v17 }
 0xdaa   : > { %4996 = vmatpush1.bf16.msra.mxu1 %v4995_v8  ;;  %3108 = vmatprep.mubr.f32.mxu1 %v5760_v3 }
 0xdab   : > { %4998 = vmatprep.subr.bf16.mxu1 %v4997_v26  ;;  %5027 = vmatpush1.bf16.msra.mxu0 %v5026_v42 }
 0xdac   : > { %5028 = vmatprep.subr.bf16.mxu0 %v5761_v34 }
 0xdae   : > { %5000 = vmatpush1.bf16.msra.mxu1 %v4999_v28 }
 0xdaf   : > { %5031 = vmatprep.subr.bf16.mxu1 %v5761_v34  ;;  %5030 = vmatpush1.bf16.msra.mxu0 %v5029_v45 }
 0xdb0   : > { %5061 = vmatprep.subr.bf16.mxu0 %v5761_v34 }
 0xdb1   : > { %4632 = vmatmul.mubr.msk.f32.vlgmr.msra.gmra.mrb[8].mxu1 %vm1711_vm1, %v2762_v24  ;;  %v3230_v24 = vld [vmem:[%s7036_s12 + $0x8] sm:$0xff] }
 0xdb2   : > { %v5032_v13 = vpack.c.bf16 %v3230_v24, %v3229_v29  ;;  %4817 = vmatprep.mubr.msk.f32.mxu1 %vm5762_vm3, %v5760_v3 }
 0xdb4   : > { %5033 = vmatpush3.bf16.msra.mxu1 %v5032_v13 }
 0xdb5   : > { %5034 = vmatprep.subr.bf16.mxu1 %v5761_v34 }
 0xdb8   : > { %5036 = vmatpush3.bf16.msra.mxu1 %v5035_v0 }
 0xdb9   : > { %5037 = vmatprep.subr.bf16.mxu1 %v5761_v34 }
 0xe84   : > { %v3110_v56 = vpop.f32.mrb[8].mxu1 }
 0xe85   : > { %v3128_v60 = vadd.f32 %v3121_v53, %v3110_v56  ;;  %v3112_v61 = vpop.f32.mrb[9].mxu1  ;;  %v3371_v53 = vunpack.c.0.s8 %v3370_v52 }
 0xe86   : > { %v3129_v62 = vadd.f32 %v3125_v54, %v3112_v61 }
 0xe87   : > { %v3132_v63 = vmul.f32 0.044715, %v3128_v60  ;;  %v3130_v55 = vmul.f32 0.5, %v3128_v60  ;;  %v6664_v54 = vsub.s32 %v3371_v53, %v6615_v47  ;;  %v3241_v53 = vld [vmem:[%s7041_s23 + $0x30] sm:$0xff] }
 0xe88   : > { %v3133_v1 = vmul.f32 0.044715, %v3129_v62  ;;  %v3131_v16 = vmul.f32 0.5, %v3129_v62 }
 0xe89   : > { %v3134_v19 = vmul.f32 %v3132_v63, %v3128_v60 }
 0xe8a   : > { %v3135_v2 = vmul.f32 %v3133_v1, %v3129_v62 }
 0xe8b   : > { %v3136_v4 = vmul.f32 %v3134_v19, %v3128_v60 }
 0xe8c   : > { %v3137_v5 = vmul.f32 %v3135_v2, %v3129_v62 }
 0xe8d   : > { %v3138_v6 = vadd.f32 %v3136_v4, %v3128_v60 }
 0xe8e   : > { %v3139_v7 = vadd.f32 %v3137_v5, %v3129_v62 }
 0xe8f   : > { %v3140_v10 = vmul.f32 0.7978846, %v3138_v6 }
 0xe90   : > { %v3141_v11 = vmul.f32 0.7978846, %v3139_v7 }
 0xe91   : > { %5365 = vtanh.f32 %v3140_v10 }
 0xe92   : > { %5367 = vtanh.f32 %v3141_v11 }
 0xe9b   : > { %v5366_v12 = vpop.eup %5365 }
 0xe9c   : > { %v5368_v15 = vpop.eup %5367  ;;  %v3144_v51 = vadd.f32 1.0, %v5366_v12 }
 0xe9d   : > { %v3145_v18 = vadd.f32 1.0, %v5368_v15 }
 0xe9e   : > { %v3146_v21 = vmul.f32 %v3144_v51, %v3130_v55 }
 0xe9f   : > { %v3147_v20 = vmul.f32 %v3145_v18, %v3131_v16 }
 0xea1   : > { %4634 = vmatprep.mubr.msk.f32.mxu0 %vm1711_vm1, %v3147_v20 }
 0xea2   : > { %3222 = vmatmul.mubr.f32.vlgmr.msra.gmra.mrb[12].mxu0 %v3146_v21 }
 0xea3   : > { %4863 = vmatprep.mubr.msk.f32.mxu0 %vm5762_vm3, %v5760_v3 }
 0xf75   : > { %v3223_v22 = vpop.f32.mrb[12].mxu0 }
 0xf76   : > { %v6625_v58 = vadd.f32 %v4633_v49, %v3223_v22  ;;  %v3225_v23 = vpop.f32.mrb[13].mxu0 }
 0xf78   : > { %v3257_v8 = vsel %vm1711_vm1, %v6625_v58, 0.0 }
 0xf79   : > { %3258 = vadd.xlane.f32.xlu0 %v3257_v8 }
 0xf8f   : > { %3358 = vrot.lane.b32.xlu0 %v5760_v3, %s5763_s11 }
0x1006   : > { %v3259_v17 = vpop.xlane.xlu0 %3258 }
0x1007   : > { %v3260_v26 = vmul.f32 0.03125, %v3259_v17 }
0x1009   : > { %v3261_v27 = vsub.f32 %v6625_v58, %v3260_v26 }
0x100a   : > { %v6657_v40 = vpop.permute.xlu0 %3358 }
0x100b   : > { %v3262_v59 = vmul.f32 %v3261_v27, %v3261_v27  ;;  %v3360_v42 = vmul.f32 %v6657_v40, %v6655_v39 }
0x100d   : > { %v3263_v28 = vsel %vm1711_vm1, %v3262_v59, 0.0  ;;  %v3361_v43 = vadd.f32 %v3360_v42, %v3357_v41 }
0x100e   : > { %3264 = vadd.xlane.f32.xlu1 %v3263_v28 }
0x109b   : > { %v3265_v31 = vpop.xlane.xlu1 %3264 }
0x109c   : > { %v3266_v25 = vmul.f32 0.03125, %v3265_v31 }
0x109e   : > { %v3267_v9 = vadd.f32 1e-05, %v3266_v25  ;;  %v3235_v25 = vld [vmem:[%s7041_s23] sm:$0xff] }
0x10a0   : > { %5369 = vrsqrt.f32 %v3267_v9  ;;  %v3236_v9 = vld [vmem:[%s7041_s23 + $0x8] sm:$0xff] }
0x10aa   : > { %v5370_v14 = vpop.eup %5369 }
0x10ab   : > { %v3269_v33 = vmul.f32 %v5370_v14, %v3261_v27  ;;  %v3237_v14 = vld [vmem:[%s7041_s23 + $0x10] sm:$0xff] }
0x10ad   : > { %v3276_v36 = vmul.f32 %v4635_v32, %v3269_v33 }
0x10af   : > { %v6645_v37 = vadd.f32 %v4636_v35, %v3276_v36  ;;  %v5038_v35 = vpack.c.bf16 %v3236_v9, %v3235_v25  ;;  %v3238_v36 = vld [vmem:[%s7041_s23 + $0x18] sm:$0xff] }
0x10b1   : > { %4818 = vmatmul.mubr.msk.f32.vlgmr.msra.gmra.mrb[10].mxu1 %vm1711_vm1, %v6645_v37 }
0x10b2   : > { %4852 = vmatprep.mubr.msk.f32.mxu1 %vm5762_vm3, %v5760_v3  ;;  %5039 = vmatpush3.bf16.msra.mxu1 %v5038_v35 }
0x10b3   : > { %5040 = vmatprep.subr.bf16.mxu1 %v5761_v34 }
0x1184   : > { %v3353_v44 = vpop.f32.mrb[10].mxu1 }
0x1185   : > { %v3362_v45 = vadd.f32 %v3361_v43, %v3353_v44  ;;  %v4819_v46 = vpop.f32.mrb[11].mxu1  ;;  %v3375_v56 = vrot.slane %v3353_v44, %v6664_v54  ;;  %v3414_v17 = vcombine.high %v3353_v44, %v3353_v44  ;;  %v5041_v43 = vpack.c.bf16 %v3238_v36, %v3237_v14  ;;  %v3239_v44 = vld [vmem:[%s7041_s23 + $0x20] sm:$0xff] }
0x1187   : > { %3364 = vrot.lane.b32.xlu1 %v3362_v45, %s5763_s11  ;;  %v3376_v60 = vcombine.high %v3375_v56, %v3375_v56  ;;  %v3363_v62 = vmul.f32 %v3362_v45, %v6652_v38  ;;  %v3383_v4 = vrot.slane %v3375_v56, %v6664_v54  ;;  %v3421_v26 = vrot.slane %v3414_v17, %v6664_v54  ;;  %v3242_v56 = vld [vmem:[%s7041_s23 + $0x38] sm:$0xff] }
0x1188   : > { %5042 = vmatpush3.bf16.msra.mxu1 %v5041_v43 }
0x1189   : > { %v3390_v19 = vrot.slane %v3376_v60, %v6664_v54  ;;  %v3398_v10 = vcombine.high %v3383_v4, %v3383_v4  ;;  %v6688_v24 = vrot.slane %v3421_v26, %v6664_v54  ;;  %v3436_v0 = vcombine.high %v3421_v26, %v3421_v26  ;;  %5043 = vmatprep.subr.bf16.mxu1 %v5761_v34 }
0x118b   : > { %v3406_v49 = vcombine.high %v3390_v19, %v3390_v19  ;;  %v3443_v42 = vrot.slane %v3436_v0, %v6664_v54 }
0x11f9   : > { %v3365_v61 = vpop.permute.xlu1 %3364 }
0x11fa   : > { %v3366_v63 = vmul.f32 %v3365_v61, %v6655_v39  ;;  %v5047_v61 = vpack.c.bf16 %v3242_v56, %v3241_v53 }
0x11fc   : > { %v3367_v1 = vadd.f32 %v3366_v63, %v3363_v62  ;;  %v3243_v62 = vld [vmem:[%s7041_s23 + $0x40] sm:$0xff]  ;;  %v3244_v63 = vld [vmem:[%s7041_s23 + $0x48] sm:$0xff] }
0x11fe   : > { %v3392_v2 = vadd.f32 %v3390_v19, %v3367_v1  ;;  %v5050_v1 = vpack.c.bf16 %v3244_v63, %v3243_v62  ;;  %v3245_v19 = vld [vmem:[%s7041_s23 + $0x50] sm:$0xff]  ;;  %v3686_v63 = vld [vmem:[%s7045_s13] sm:$0xff] }
0x1200   : > { %3394 = vrot.lane.b32.xlu0 %v3392_v2, %s5763_s11  ;;  %v3393_v47 = vmul.f32 %v3392_v2, %v6652_v38  ;;  %v3466_v11 = vrot.slane %v3392_v2, %v6618_v48  ;;  %v3246_v2 = vld [vmem:[%s7041_s23 + $0x58] sm:$0xff] }
0x1201   : > { %v5053_v4 = vpack.c.bf16 %v3246_v2, %v3245_v19  ;;  %v3689_v2 = vld [vmem:[%s7045_s13 + $0x18] sm:$0xff] }
0x1202   : > { %v3505_v51 = vsel %vm3504_vm4, %v3362_v45, %v3466_v11  ;;  %v3240_v45 = vld [vmem:[%s7041_s23 + $0x28] sm:$0xff] }
0x1203   : > { %v5044_v52 = vpack.c.bf16 %v3240_v45, %v3239_v44 }
0x1205   : > { %5045 = vmatpush3.bf16.msra.mxu1 %v5044_v52 }
0x1206   : > { %5046 = vmatprep.subr.bf16.mxu1 %v5761_v34 }
0x1209   : > { %5048 = vmatpush3.bf16.msra.mxu1 %v5047_v61 }
0x120a   : > { %5049 = vmatprep.subr.bf16.mxu1 %v5761_v34 }
0x120d   : > { %5051 = vmatpush3.bf16.msra.mxu1 %v5050_v1  ;;  %v3687_v1 = vld [vmem:[%s7045_s13 + $0x8] sm:$0xff] }
0x120e   : > { %5052 = vmatprep.subr.bf16.mxu1 %v5761_v34  ;;  %v5068_v19 = vpack.c.bf16 %v3687_v1, %v3686_v63 }
0x1211   : > { %5054 = vmatpush3.bf16.msra.mxu1 %v5053_v4 }
0x1212   : > { %5055 = vmatprep.subr.bf16.mxu1 %v5761_v34 }
0x1272   : > { %v3395_v5 = vpop.permute.xlu0 %3394 }
0x1273   : > { %v3396_v6 = vmul.f32 %v3395_v5, %v6655_v39  ;;  %v3247_v5 = vld [vmem:[%s7041_s23 + $0x60] sm:$0xff] }
0x1275   : > { %v3397_v7 = vadd.f32 %v3396_v6, %v3393_v47  ;;  %v3248_v47 = vld [vmem:[%s7041_s23 + $0x68] sm:$0xff] }
0x1276   : > { %v5056_v6 = vpack.c.bf16 %v3248_v47, %v3247_v5 }
0x1277   : > { %v3400_v12 = vadd.f32 %v3398_v10, %v3397_v7  ;;  %v3249_v7 = vld [vmem:[%s7041_s23 + $0x70] sm:$0xff]  ;;  %v3250_v10 = vld [vmem:[%s7041_s23 + $0x78] sm:$0xff] }
0x1278   : > { %5057 = vmatpush3.bf16.msra.mxu1 %v5056_v6  ;;  %v5059_v11 = vpack.c.bf16 %v3250_v10, %v3249_v7  ;;  %v4641_v10 = vld [vmem:[%s7046_s9] ss:$0 sm:$0xff] }
0x1279   : > { %3402 = vrot.lane.b32.xlu1 %v3400_v12, %s5763_s11  ;;  %v3472_v15 = vrot.slane %v3400_v12, %v6618_v48  ;;  %v3401_v55 = vmul.f32 %v3400_v12, %v6652_v38  ;;  %5058 = vmatprep.subr.bf16.mxu1 %v5761_v34 }
0x127b   : > { %v3507_v16 = vsel %vm3506_vm5, %v3505_v51, %v3472_v15 }
0x127c   : > { %5060 = vmatpush3.bf16.msra.mxu1 %v5059_v11 }
0x127d   : > { %5097 = vmatprep.subr.bf16.mxu1 %v5761_v34 }
0x12eb   : > { %v3403_v18 = vpop.permute.xlu1 %3402 }
0x12ec   : > { %v3404_v20 = vmul.f32 %v3403_v18, %v6655_v39  ;;  %v3451_v18 = vcombine.high %v6688_v24, %v6688_v24 }
0x12ee   : > { %v3405_v21 = vadd.f32 %v3404_v20, %v3401_v55 }
0x12f0   : > { %v3408_v22 = vadd.f32 %v3406_v49, %v3405_v21 }
0x12f2   : > { %3410 = vrot.lane.b32.xlu0 %v3408_v22, %s5763_s11  ;;  %v3478_v23 = vrot.slane %v3408_v22, %v6618_v48  ;;  %v3409_v59 = vmul.f32 %v3408_v22, %v6652_v38 }
0x12f4   : > { %v3509_v8 = vsel %vm3508_vm6, %v3507_v16, %v3478_v23 }
0x1364   : > { %v3411_v27 = vpop.permute.xlu0 %3410 }
0x1365   : > { %v3412_v28 = vmul.f32 %v3411_v27, %v6655_v39 }
0x1367   : > { %v3413_v29 = vadd.f32 %v3412_v28, %v3409_v59  ;;  %v3252_v28 = vld [vmem:[%s7042_s19] sm:$0xff] }
0x1369   : > { %v3430_v13 = vadd.f32 %v6688_v24, %v3413_v29  ;;  %v3253_v29 = vld [vmem:[%s7042_s19 + $0x8] sm:$0xff]  ;;  %v3254_v24 = vld [vmem:[%s7042_s19 + $0x10] sm:$0xff] }
0x136b   : > { %3432 = vrot.lane.b32.xlu1 %v3430_v13, %s5763_s11  ;;  %v3484_v57 = vrot.slane %v3430_v13, %v6618_v48  ;;  %v3431_v32 = vmul.f32 %v3430_v13, %v6652_v38  ;;  %v5062_v13 = vpack.c.bf16 %v3253_v29, %v3252_v28 }
0x136d   : > { %v3511_v30 = vsel %vm3510_vm7, %v3509_v8, %v3484_v57  ;;  %v3459_v8 = vcombine.high %v3443_v42, %v3443_v42  ;;  %5063 = vmatpush3.bf16.msra.mxu0 %v5062_v13  ;;  %v4638_v57 = vld [vmem:[%s7043_s26] ss:$0 sm:$0xff]  ;;  %s4652_s26 = sshll.u32 %s6042_s0, 7  ;;  %s5765_s0 = smov [#allocation20]  }
0x136e   : > { %5064 = vmatprep.subr.bf16.mxu0 %v5761_v34 }
0x13dd   : > { %v3433_v31 = vpop.permute.xlu1 %3432 }
0x13de   : > { %v3434_v33 = vmul.f32 %v3433_v31, %v6655_v39 }
0x13e0   : > { %v3435_v41 = vadd.f32 %v3434_v33, %v3431_v32 }
0x13e2   : > { %v3445_v46 = vadd.f32 %v3443_v42, %v3435_v41 }
0x13e4   : > { %3447 = vrot.lane.b32.xlu0 %v3445_v46, %s5763_s11  ;;  %v3490_v50 = vrot.slane %v3445_v46, %v6618_v48  ;;  %v3446_v15 = vmul.f32 %v3445_v46, %v6652_v38 }
0x13e6   : > { %v3513_v60 = vsel %vm3512_vm8, %v3511_v30, %v3490_v50  ;;  %v3524_v30 = vmul.f32 %v4638_v57, %v6645_v37  ;;  %v4639_v37 = vld [vmem:[%s7044_s2] ss:$0 sm:$0xff] }
0x1456   : > { %v3448_v12 = vpop.permute.xlu0 %3447 }
0x1457   : > { %v3449_v51 = vmul.f32 %v3448_v12, %v6655_v39  ;;  %v4642_v12 = vld [vmem:[%s7047_s6] ss:$0 sm:$0xff]  ;;  %s6870_s6 = scalar_lea.hbm %s6019_s4, %s4652_s26 }
0x1459   : > { %v3450_v16 = vadd.f32 %v3449_v51, %v3446_v15 }
0x145b   : > { %v3453_v55 = vadd.f32 %v3451_v18, %v3450_v16  ;;  %v6770_v16 = vld [vmem:[#allocation11] sm:$0x1]  ;;  %v6772_v18 = vld [vmem:[#allocation12] sm:$0x1] }
0x145d   : > { %3455 = vrot.lane.b32.xlu1 %v3453_v55, %s5763_s11  ;;  %v3496_v20 = vrot.slane %v3453_v55, %v6618_v48  ;;  %v3454_v22 = vmul.f32 %v3453_v55, %v6652_v38  ;;  %v3255_v38 = vld [vmem:[%s7042_s19 + $0x18] sm:$0xff]  ;;  %v3814_v55 = vmul.f32 0.0, %v6770_v16 }
0x145f   : > { %v3515_v21 = vsel %vm3514_vm9, %v3513_v60, %v3496_v20  ;;  %v3815_v20 = vmul.f32 %v6772_v18, %v6657_v40 }
0x14cf   : > { %v3456_v49 = vpop.permute.xlu1 %3455 }
0x14d0   : > { %v3457_v23 = vmul.f32 %v3456_v49, %v6655_v39  ;;  %v5065_v39 = vpack.c.bf16 %v3255_v38, %v3254_v24 }
0x14d2   : > { %v3458_v17 = vadd.f32 %v3457_v23, %v3454_v22  ;;  %5066 = vmatpush3.bf16.msra.mxu0 %v5065_v39 }
0x14d3   : > { %5067 = vmatprep.subr.bf16.mxu0 %v5761_v34 }
0x14d4   : > { %v3461_v26 = vadd.f32 %v3459_v8, %v3458_v17 }
0x14d6   : > { %v3502_v27 = vrot.slane %v3461_v26, %v6618_v48 }
0x14d8   : > { %v3517_v59 = vsel %vm3516_vm10, %v3515_v21, %v3502_v27  ;;  %v3816_v21 = vadd.f32 %v3815_v20, %v3814_v55  ;;  %v3697_v55 = vld [vmem:[%s7048_s8 + $0x28] sm:$0xff] }
0x14d9   : > { %4853 = vmatmul.mubr.f32.vlgmr.msra.gmra.mrb[12].mxu1 %v3517_v59 }
0x14da   : > { %4920 = vmatprep.mubr.msk.f32.mxu1 %vm5762_vm3, %v5760_v3 }
0x15ac   : > { %v3591_v0 = vpop.f32.mrb[12].mxu1 }
0x15ad   : > { %v3592_v31 = vadd.f32 %v3591_v0, %v3524_v30  ;;  %v4854_v25 = vpop.f32.mrb[13].mxu1 }
0x15af   : > { %v3596_v9 = vmul.f32 0.044715, %v3592_v31  ;;  %v3595_v41 = vmul.f32 0.5, %v3592_v31 }
0x15b1   : > { %v3597_v14 = vmul.f32 %v3596_v9, %v3592_v31 }
0x15b3   : > { %v3598_v32 = vmul.f32 %v3597_v14, %v3592_v31 }
0x15b5   : > { %v3599_v33 = vadd.f32 %v3598_v32, %v3592_v31 }
0x15b7   : > { %v3600_v35 = vmul.f32 0.7978846, %v3599_v33 }
0x15b9   : > { %5371 = vtanh.f32 %v3600_v35 }
0x15c3   : > { %v5372_v36 = vpop.eup %5371 }
0x15c4   : > { %v3602_v42 = vadd.f32 1.0, %v5372_v36 }
0x15c6   : > { %v3603_v43 = vmul.f32 %v3602_v42, %v3595_v41 }
0x15c8   : > { %4864 = vmatmul.mubr.msk.f32.vlgmr.msra.gmra.mrb[14].mxu0 %vm1711_vm1, %v3603_v43 }
0x15c9   : > { %4874 = vmatprep.mubr.msk.f32.mxu0 %vm5762_vm3, %v5760_v3  ;;  %5069 = vmatpush3.bf16.msra.mxu0 %v5068_v19 }
0x15ca   : > { %5070 = vmatprep.subr.bf16.mxu0 %v5761_v34 }
0x169b   : > { %v3679_v44 = vpop.f32.mrb[14].mxu0 }
0x169c   : > { %v3680_v45 = vadd.f32 %v4639_v37, %v3679_v44  ;;  %v4865_v46 = vpop.f32.mrb[15].mxu0 }
0x169e   : > { %v6750_v50 = vadd.f32 %v3680_v45, %v6625_v58  ;;  %v3688_v58 = vld [vmem:[%s7045_s13 + $0x10] sm:$0xff] }
0x169f   : > { %v5071_v4 = vpack.c.bf16 %v3689_v2, %v3688_v58  ;;  %v3692_v58 = vld [vmem:[%s7048_s8] sm:$0xff]  ;;  %v3693_v2 = vld [vmem:[%s7048_s8 + $0x8] sm:$0xff] }
0x16a0   : > { %v3714_v52 = vsel %vm1711_vm1, %v6750_v50, 0.0 }
0x16a1   : > { %3715 = vadd.xlane.f32.xlu0 %v3714_v52  ;;  %5072 = vmatpush3.bf16.msra.mxu0 %v5071_v4  ;;  %v3694_v4 = vld [vmem:[%s7048_s8 + $0x10] sm:$0xff] }
0x16a2   : > { %5073 = vmatprep.subr.bf16.mxu0 %v5761_v34 }
0x172e   : > { %v3716_v53 = vpop.xlane.xlu0 %3715 }
0x172f   : > { %v3717_v56 = vmul.f32 0.03125, %v3716_v53 }
0x1731   : > { %v3718_v60 = vsub.f32 %v6750_v50, %v3717_v56 }
0x1733   : > { %v3719_v61 = vmul.f32 %v3718_v60, %v3718_v60 }
0x1735   : > { %v3720_v62 = vsel %vm1711_vm1, %v3719_v61, 0.0 }
0x1736   : > { %3721 = vadd.xlane.f32.xlu1 %v3720_v62 }
0x17c3   : > { %v3722_v5 = vpop.xlane.xlu1 %3721 }
0x17c4   : > { %v3723_v47 = vmul.f32 0.03125, %v3722_v5 }
0x17c6   : > { %v3724_v6 = vadd.f32 1e-05, %v3723_v47 }
0x17c8   : > { %5373 = vrsqrt.f32 %v3724_v6  ;;  %v5074_v6 = vpack.c.bf16 %v3693_v2, %v3692_v58 }
0x17d2   : > { %v5374_v7 = vpop.eup %5373 }
0x17d3   : > { %v3726_v11 = vmul.f32 %v5374_v7, %v3718_v60  ;;  %v3695_v7 = vld [vmem:[%s7048_s8 + $0x18] sm:$0xff] }
0x17d5   : > { %v3733_v15 = vmul.f32 %v4641_v10, %v3726_v11 }
0x17d7   : > { %v6764_v51 = vadd.f32 %v4642_v12, %v3733_v15  ;;  %v5077_v12 = vpack.c.bf16 %v3695_v7, %v3694_v4  ;;  %v3696_v15 = vld [vmem:[%s7048_s8 + $0x20] sm:$0xff] }
0x17d9   : > { %4875 = vmatmul.mubr.msk.f32.vlgmr.msra.gmra.mrb[16].mxu0 %vm1711_vm1, %v6764_v51 }
0x17da   : > { %4909 = vmatprep.mubr.msk.f32.mxu0 %vm5762_vm3, %v5760_v3  ;;  %5075 = vmatpush3.bf16.msra.mxu0 %v5074_v6 }
0x17db   : > { %5076 = vmatprep.subr.bf16.mxu0 %v5761_v34 }
0x17de   : > { %5078 = vmatpush3.bf16.msra.mxu0 %v5077_v12 }
0x17df   : > { %5079 = vmatprep.subr.bf16.mxu0 %v5761_v34 }
0x18ac   : > { %v3810_v49 = vpop.f32.mrb[16].mxu0 }
0x18ad   : > { %v3817_v22 = vadd.f32 %v3816_v21, %v3810_v49  ;;  %v4876_v23 = vpop.f32.mrb[17].mxu0  ;;  %v3830_v8 = vrot.slane %v3810_v49, %v6664_v54  ;;  %v3869_v44 = vcombine.high %v3810_v49, %v3810_v49  ;;  %v5080_v49 = vpack.c.bf16 %v3697_v55, %v3696_v15  ;;  %v4135_v15 = vld [vmem:[%s7051_s1 + $0x18] sm:$0xff] }
0x18af   : > { %3819 = vrot.lane.b32.xlu0 %v3817_v22, %s5763_s11  ;;  %v3831_v17 = vcombine.high %v3830_v8, %v3830_v8  ;;  %v3818_v27 = vmul.f32 %v3817_v22, %v6770_v16  ;;  %v3838_v40 = vrot.slane %v3830_v8, %v6664_v54  ;;  %v3876_v45 = vrot.slane %v3869_v44, %v6664_v54 }
0x18b0   : > { %5081 = vmatpush3.bf16.msra.mxu0 %v5080_v49 }
0x18b1   : > { %v3845_v29 = vrot.slane %v3831_v17, %v6664_v54  ;;  %v3853_v30 = vcombine.high %v3838_v40, %v3838_v40  ;;  %v3883_v60 = vrot.slane %v3876_v45, %v6664_v54  ;;  %v3891_v1 = vcombine.high %v3876_v45, %v3876_v45  ;;  %5082 = vmatprep.subr.bf16.mxu0 %v5761_v34  ;;  %v3700_v17 = vld [vmem:[%s7048_s8 + $0x40] sm:$0xff]  ;;  %v3705_v40 = vld [vmem:[%s7048_s8 + $0x68] sm:$0xff] }
0x18b3   : > { %v3861_v41 = vcombine.high %v3845_v29, %v3845_v29  ;;  %v3898_v11 = vrot.slane %v3891_v1, %v6664_v54  ;;  %v3698_v54 = vld [vmem:[%s7048_s8 + $0x30] sm:$0xff] }
0x1921   : > { %v3820_v26 = vpop.permute.xlu0 %3819 }
0x1922   : > { %v3821_v59 = vmul.f32 %v3820_v26, %v6772_v18  ;;  %v3701_v26 = vld [vmem:[%s7048_s8 + $0x48] sm:$0xff] }
0x1924   : > { %v3822_v28 = vadd.f32 %v3821_v59, %v3818_v27  ;;  %v5086_v27 = vpack.c.bf16 %v3701_v26, %v3700_v17  ;;  %v3702_v59 = vld [vmem:[%s7048_s8 + $0x50] sm:$0xff] }
0x1925   : > { %v4139_v17 = vld [vmem:[%s6009_s24 + $0x10] sm:$0xff] }
0x1926   : > { %v3847_v24 = vadd.f32 %v3845_v29, %v3822_v28  ;;  %v3703_v28 = vld [vmem:[%s7048_s8 + $0x58] sm:$0xff] }
0x1927   : > { %v5089_v29 = vpack.c.bf16 %v3703_v28, %v3702_v59  ;;  %v4647_v28 = vld [vmem:[#allocation17] ss:$0 sm:$0xff] }
0x1928   : > { %3849 = vrot.lane.b32.xlu1 %v3847_v24, %s5763_s11  ;;  %v3848_v38 = vmul.f32 %v3847_v24, %v6770_v16  ;;  %v3921_v0 = vrot.slane %v3847_v24, %v6618_v48  ;;  %v3704_v24 = vld [vmem:[%s7048_s8 + $0x60] sm:$0xff] }
0x192a   : > { %v3959_v9 = vsel %vm3504_vm4, %v3817_v22, %v3921_v0  ;;  %v3699_v22 = vld [vmem:[%s7048_s8 + $0x38] sm:$0xff] }
0x192b   : > { %v5083_v8 = vpack.c.bf16 %v3699_v22, %v3698_v54 }
0x192d   : > { %5084 = vmatpush3.bf16.msra.mxu0 %v5083_v8  ;;  %v4138_v8 = vld [vmem:[%s6009_s24 + $0x8] sm:$0xff] }
0x192e   : > { %5085 = vmatprep.subr.bf16.mxu0 %v5761_v34 }
0x1931   : > { %5087 = vmatpush3.bf16.msra.mxu0 %v5086_v27  ;;  %v4140_v27 = vld [vmem:[%s6009_s24 + $0x18] sm:$0xff] }
0x1932   : > { %5088 = vmatprep.subr.bf16.mxu0 %v5761_v34  ;;  %v5113_v59 = vpack.c.bf16 %v4140_v27, %v4139_v17 }
0x1935   : > { %5090 = vmatpush3.bf16.msra.mxu0 %v5089_v29 }
0x1936   : > { %5091 = vmatprep.subr.bf16.mxu0 %v5761_v34 }
0x199a   : > { %v3850_v13 = vpop.permute.xlu1 %3849 }
0x199b   : > { %v3851_v39 = vmul.f32 %v3850_v13, %v6772_v18  ;;  %v5092_v13 = vpack.c.bf16 %v3705_v40, %v3704_v24 }
0x199d   : > { %v3852_v57 = vadd.f32 %v3851_v39, %v3848_v38  ;;  %5093 = vmatpush3.bf16.msra.mxu0 %v5092_v13  ;;  %v3706_v38 = vld [vmem:[%s7048_s8 + $0x70] sm:$0xff]  ;;  %v3707_v39 = vld [vmem:[%s7048_s8 + $0x78] sm:$0xff] }
0x199e   : > { %5094 = vmatprep.subr.bf16.mxu0 %v5761_v34 }
0x199f   : > { %v3855_v31 = vadd.f32 %v3853_v30, %v3852_v57  ;;  %v5095_v57 = vpack.c.bf16 %v3707_v39, %v3706_v38 }
0x19a1   : > { %3857 = vrot.lane.b32.xlu0 %v3855_v31, %s5763_s11  ;;  %v3927_v25 = vrot.slane %v3855_v31, %v6618_v48  ;;  %v3856_v33 = vmul.f32 %v3855_v31, %v6770_v16  ;;  %5096 = vmatpush3.bf16.msra.mxu0 %v5095_v57 }
0x19a3   : > { %v3960_v14 = vsel %vm3506_vm5, %v3959_v9, %v3927_v25  ;;  %v3906_v9 = vcombine.high %v3883_v60, %v3883_v60 }
0x1a13   : > { %v3858_v32 = vpop.permute.xlu0 %3857 }
0x1a14   : > { %v3859_v35 = vmul.f32 %v3858_v32, %v6772_v18 }
0x1a16   : > { %v3860_v36 = vadd.f32 %v3859_v35, %v3856_v33 }
0x1a18   : > { %v3863_v42 = vadd.f32 %v3861_v41, %v3860_v36 }
0x1a1a   : > { %3865 = vrot.lane.b32.xlu1 %v3863_v42, %s5763_s11  ;;  %v3933_v43 = vrot.slane %v3863_v42, %v6618_v48  ;;  %v3864_v52 = vmul.f32 %v3863_v42, %v6770_v16  ;;  %v3914_v42 = vcombine.high %v3898_v11, %v3898_v11 }
0x1a1c   : > { %v3961_v37 = vsel %vm3508_vm6, %v3960_v14, %v3933_v43 }
0x1a8c   : > { %v3866_v46 = vpop.permute.xlu1 %3865 }
0x1a8d   : > { %v3867_v53 = vmul.f32 %v3866_v46, %v6772_v18  ;;  %v3709_v46 = vld [vmem:[%s7049_s16] sm:$0xff] }
0x1a8f   : > { %v3868_v56 = vadd.f32 %v3867_v53, %v3864_v52  ;;  %v3710_v52 = vld [vmem:[%s7049_s16 + $0x8] sm:$0xff]  ;;  %v3711_v53 = vld [vmem:[%s7049_s16 + $0x10] sm:$0xff] }
0x1a91   : > { %v3885_v61 = vadd.f32 %v3883_v60, %v3868_v56  ;;  %v5098_v56 = vpack.c.bf16 %v3710_v52, %v3709_v46  ;;  %v3712_v60 = vld [vmem:[%s7049_s16 + $0x18] sm:$0xff] }
0x1a93   : > { %3887 = vrot.lane.b32.xlu0 %v3885_v61, %s5763_s11  ;;  %v3939_v62 = vrot.slane %v3885_v61, %v6618_v48  ;;  %v3886_v5 = vmul.f32 %v3885_v61, %v6770_v16  ;;  %5099 = vmatpush3.bf16.msra.mxu1 %v5098_v56  ;;  %v5101_v61 = vpack.c.bf16 %v3712_v60, %v3711_v53 }
0x1a94   : > { %5100 = vmatprep.subr.bf16.mxu1 %v5761_v34 }
0x1a95   : > { %v3962_v63 = vsel %vm3510_vm7, %v3961_v37, %v3939_v62 }
0x1a97   : > { %5102 = vmatpush3.bf16.msra.mxu1 %v5101_v61 }
0x1a98   : > { %5103 = vmatprep.subr.bf16.mxu1 %v5761_v34 }
0x1b05   : > { %v3888_v19 = vpop.permute.xlu0 %3887 }
0x1b06   : > { %v3889_v47 = vmul.f32 %v3888_v19, %v6772_v18 }
0x1b08   : > { %v3890_v10 = vadd.f32 %v3889_v47, %v3886_v5  ;;  %v4132_v5 = vld [vmem:[%s7050_s7] sm:$0xff]  ;;  %v4133_v47 = vld [vmem:[%s7051_s1 + $0x8] sm:$0xff]  ;;  %s4311_s7 = scalar_lea.sflag [#allocation4], %s1581_s3 }
0x1b0a   : > { %v3900_v20 = vadd.f32 %v3898_v11, %v3890_v10  ;;  %v5104_v11 = vpack.c.bf16 %v4133_v47, %v4132_v5 }
0x1b0c   : > { %3902 = vrot.lane.b32.xlu1 %v3900_v20, %s5763_s11  ;;  %v3945_v21 = vrot.slane %v3900_v20, %v6618_v48  ;;  %v3901_v0 = vmul.f32 %v3900_v20, %v6770_v16  ;;  %v4645_v20 = vld [vmem:[#allocation15] ss:$0 sm:$0xff] }
0x1b0e   : > { %v3963_v23 = vsel %vm3512_vm8, %v3962_v63, %v3945_v21 }
0x1b7e   : > { %v3903_v30 = vpop.permute.xlu1 %3902 }
0x1b7f   : > { %v3904_v31 = vmul.f32 %v3903_v30, %v6772_v18 }
0x1b81   : > { %v3905_v25 = vadd.f32 %v3904_v31, %v3901_v0 }
0x1b83   : > { %v3908_v14 = vadd.f32 %v3906_v9, %v3905_v25 }
0x1b85   : > { %3910 = vrot.lane.b32.xlu0 %v3908_v14, %s5763_s11  ;;  %v3951_v32 = vrot.slane %v3908_v14, %v6618_v48  ;;  %v3909_v36 = vmul.f32 %v3908_v14, %v6770_v16  ;;  %v4644_v16 = vld [vmem:[#allocation14] ss:$0 sm:$0xff]  ;;  %s4557_s11 = sshll.u32 %s1581_s3, 3 }
0x1b86   : > { %s1583_s2 = scalar_lea.vmem [#allocation20], %s4557_s11  ;;  %s5611_s11 = sshll.u32 %s5765_s0, 4  ;;  %s5612_s11 = int_to_ptr.vmem [resolvable:$false] %s5611_s11 }
0x1b87   : > { %v3964_v33 = vsel %vm3514_vm9, %v3963_v23, %v3951_v32  ;;  %v4137_v23 = vld [vmem:[%s6009_s24] sm:$0xff]  ;;  %s4324_s9 = sshll.u32 %s1583_s2, 4  ;;  %s5613_s5 = scalar_lea.vmem %s5612_s11, 256  ;;  %s6872_s9 = int_to_ptr.vmem [resolvable:$true] %s4324_s9 }
0x1b88   : > { %v5110_v26 = vpack.c.bf16 %v4138_v8, %v4137_v23  ;;  %p5614_p12 = scmp.lt.s32.totalorder %s6872_s9, %s5612_s11 }
0x1bf7   : > { %v3911_v35 = vpop.permute.xlu0 %3910 }
0x1bf8   : > { %v3912_v41 = vmul.f32 %v3911_v35, %v6772_v18 }
0x1bfa   : > { %v3913_v43 = vadd.f32 %v3912_v41, %v3909_v36 }
0x1bfc   : > { %v3916_v37 = vadd.f32 %v3914_v42, %v3913_v43 }
0x1bfe   : > { %v3957_v44 = vrot.slane %v3916_v37, %v6618_v48  ;;  %v3972_v48 = vmul.f32 %v4644_v16, %v6764_v51  ;;  %v4134_v51 = vld [vmem:[%s7051_s1 + $0x10] sm:$0xff]  ;;  %s5607_s1 = scalar_lea.vmem %s6872_s9, 128 }
0x1bff   : > { %v5107_v55 = vpack.c.bf16 %v4135_v15, %v4134_v51  ;;  %p5608_p0 = scmp.ne.s32.totalorder %s6872_s9, %s5607_s1  ;;  %p5615_p1 = scmp.lt.s32.totalorder %s5613_s5, %s5607_s1 }
0x1c00   : > { %v3965_v45 = vsel %vm3516_vm10, %v3964_v33, %v3957_v44 }
0x1c01   : > { %4910 = vmatmul.mubr.f32.vlgmr.msra.gmra.mrb[18].mxu0 %v3965_v45  ;;  %p5609_p9 = pnand %p5608_p0, %p7052_p6  ;;  %p5616_p2 = por %p5615_p1, %p5614_p12 }
0x1c03   : > { %p5610_p13 = pneg %p5609_p9 }
0x1c05   : > { %p5617_p5 = pnand %p5616_p2, %p5610_p13 }
0x1cd4   : > { %v4039_v18 = vpop.f32.mrb[18].mxu0 }
0x1cd5   : > { %v4040_v62 = vadd.f32 %v4039_v18, %v3972_v48  ;;  %v4911_v63 = vpop.f32.mrb[19].mxu0 }
0x1cd7   : > { %v4044_v1 = vmul.f32 0.044715, %v4040_v62  ;;  %v4043_v7 = vmul.f32 0.5, %v4040_v62 }
0x1cd9   : > { %v4045_v19 = vmul.f32 %v4044_v1, %v4040_v62 }
0x1cdb   : > { %v4046_v58 = vmul.f32 %v4045_v19, %v4040_v62 }
0x1cdd   : > { %v4047_v2 = vadd.f32 %v4046_v58, %v4040_v62 }
0x1cdf   : > { %v4048_v4 = vmul.f32 0.7978846, %v4047_v2 }
0x1ce1   : > { %5375 = vtanh.f32 %v4048_v4 }
0x1ceb   : > { %v5376_v6 = vpop.eup %5375 }
0x1cec   : > { %v4050_v10 = vadd.f32 1.0, %v5376_v6 }
0x1cee   : > { %v4051_v12 = vmul.f32 %v4050_v10, %v4043_v7 }
0x1cf0   : > { %4921 = vmatmul.mubr.msk.f32.vlgmr.msra.gmra.mrb[14].mxu1 %vm1711_vm1, %v4051_v12 }
0x1cf1   : > { %5105 = vmatpush3.bf16.msra.mxu1 %v5104_v11  ;;  %4931 = vmatprep.mubr.msk.f32.mxu1 %vm5762_vm3, %v5760_v3 }
0x1cf2   : > { %5106 = vmatprep.subr.bf16.mxu1 %v5761_v34 }
0x1cf5   : > { %5108 = vmatpush3.bf16.msra.mxu1 %v5107_v55 }
0x1cf6   : > { %5109 = vmatprep.subr.bf16.mxu1 %v5761_v34 }
0x1dc3   : > { %v4127_v21 = vpop.f32.mrb[14].mxu1 }
0x1dc4   : > { %v4128_v49 = vadd.f32 %v4645_v20, %v4127_v21  ;;  %v4922_v54 = vpop.f32.mrb[15].mxu1 }
0x1dc6   : > { %v4131_v22 = vadd.f32 %v4128_v49, %v6750_v50 }
0x1dc8   : > { %4932 = vmatmul.mubr.msk.f32.vlgmr.msra.gmra.mrb[16].mxu1 %vm1711_vm1, %v4131_v22 }
0x1dc9   : > { %4942 = vmatprep.mubr.msk.f32.mxu1 %vm5762_vm3, %v5760_v3  ;;  %5111 = vmatpush3.bf16.msra.mxu1 %v5110_v26 }
0x1dca   : > { %5112 = vmatprep.subr.bf16.mxu1 %v5761_v34  ;;  %v4649_v34 = vld [vmem:[#allocation18] ss:$0 sm:$0xff] }
0x1dcd   : > { %5114 = vmatpush3.bf16.msra.mxu1 %v5113_v59 }
0x1e9b   : > { %v4217_v29 = vpop.f32.mrb[16].mxu1 }
0x1e9c   : > { %v4218_v24 = vadd.f32 %v4647_v28, %v4217_v29  ;;  %v4933_v50 = vpop.f32.mrb[17].mxu1 }
0x1e9e   : > { %v4222_v40 = vmul.f32 0.044715, %v4218_v24  ;;  %v4221_v30 = vmul.f32 0.5, %v4218_v24 }
0x1ea0   : > { %v4223_v13 = vmul.f32 %v4222_v40, %v4218_v24 }
0x1ea2   : > { %v4224_v38 = vmul.f32 %v4223_v13, %v4218_v24 }
0x1ea4   : > { %v4225_v3 = vadd.f32 %v4224_v38, %v4218_v24 }
0x1ea6   : > { %v4226_v39 = vmul.f32 0.7978846, %v4225_v3 }
0x1ea8   : > { %5377 = vtanh.f32 %v4226_v39 }
0x1eb2   : > { %v5378_v57 = vpop.eup %5377 }
0x1eb3   : > { %v4228_v0 = vadd.f32 1.0, %v5378_v57 }
0x1eb5   : > { %v4229_v31 = vmul.f32 %v4228_v0, %v4221_v30 }
0x1eb7   : > { %4943 = vmatmul.mubr.msk.f32.vlgmr.msra.gmra.mrb[18].mxu1 %vm1711_vm1, %v4229_v31 }
0x1f8a   : > { %v4305_v25 = vpop.f32.mrb[18].mxu1 }
0x1f8b   : > { %v4306_v9 = vadd.f32 %v4649_v34, %v4305_v25  ;;  %v4944_v14 = vpop.f32.mrb[19].mxu1 }
0x1f8d   : > { %4309 = vst [vmem:[%s1583_s2] sm:$0xff] %v4306_v9 }
0x1f8e   : > { %5620 = shalt.err (!%p5617_p5)
}
0x1f8f   : > { %s5621_s3 = scalar_lea.hbm %s6870_s6, 128  ;;  %s5625_s26 = scalar_lea.hbm %s6019_s4, 256 }
0x1f90   : > { %p5622_p3 = scmp.ne.s32.totalorder %s6870_s6, %s5621_s3  ;;  %p5626_p8 = scmp.lt.u32.totalorder %s6870_s6, %s6019_s4 }
0x1f91   : > { %p5627_p11 = scmp.lt.u32.totalorder %s5625_s26, %s5621_s3  ;;  %p5629_p0 = scmp.lt.u32.totalorder %s5621_s3, %s6870_s6 }
0x1f92   : > { %p5623_p7 = pnand %p5622_p3, %p7052_p6 }
0x1f93   : > { %p5628_p10 = por %p5627_p11, %p5626_p8 }
0x1f94   : > { %p5624_p4 = pneg %p5623_p7 }
0x1f95   : > { %p5630_p9 = por %p5629_p0, %p5628_p10 }
0x1f97   : > { %p5631_p13 = pnand %p5630_p9, %p5624_p4 }
0x1f99   : > { %5634 = shalt.err (!%p5631_p13)
}
0x1f9a   : > { %5161 = dma.vmem_to_hbm [thread:$0]  (%p7052_p6), %s6872_s9, 128, %s6870_s6, %s4311_s7  }
0x1f9b PF: > { %s7053_s5 = sld [smem:[#allocation70_spill]]  ;;  %s7054_s1 = sld [smem:[#allocation74_spill]] }
0x1f9c   : > { %p5218_p12 = scmp.ge.s32.totalorder %s5697_s15, 2 }
0x1fa1   : > { %s4336_s2 = sand.u32 1, %s7053_s5   ;;  %p7055_p1 = scmp.ne.s32.totalorder %s7054_s1, 0 }
0x1fa2   : > { %s4337_s0 = scalar_lea.sflag [#allocation4], %s4336_s2 }
0x1fa3   : > { %p5195_p2 = pnand %p5218_p12, %p7055_p1 }
0x1fa5   : > { %5680 = dma.done.wait (!%p5195_p2), %s4337_s0, 128  }
0x1fa6   : > { %5682 = vsyncadd (!%p5195_p2), %s4337_s0, 4294967168  ;;  %s7056_s15 = sld [smem:[#allocation72_spill]]  ;;  %s7057_s11 = sld [smem:[#allocation71_spill]] }
0x1fa7   : > { %s7058_s3 = sld [smem:[#allocation73_spill]]  ;;  %s7059_s7 = smov %s5689_s10 }
0x1fac   : > { %p116_p5 = scmp.ge.s32.totalorder %s7056_s15, 4   ;;  %s7060_s10 = smov %s7057_s11 }
0x1fad   : > { %s7061_s11 = smov %s7058_s3 }
0x1fae   :  { %118 = sbr.rel (!%p116_p5) target bundleno = 108 (0x6c), region = 342 }
0x1fb5   :  { %4342 = vsyncpa [#allocation3], 1 }
0x1fb6   :  { %4344 = vsyncpa [#allocation3 + $0x1], 1 }
0x1fb7   :  { %4345 = vsyncpa [#allocation13], 1 }
0x1fb8   :  { %4346 = vsyncpa [#allocation16], 1 }
0x1fb9   :  { %4347 = vsyncpa [#allocation19], 1 }
0x1fba   :  { %4348 = vsyncpa [#allocation4], 1 }
0x1fbb   :  { %4350 = vsyncpa [#allocation4 + $0x1], 1 }
0x1fbc   :  { %4351 = vsyncpa [#allocation5], 1 }
0x1fbd   :  { %4353 = vsyncpa [#allocation5 + $0x1], 1 }
0x1fbe   :  { %4354 = vsyncpa [#allocation7], 1 }
0x1fbf   :  { %4355 = vsyncpa [#allocation10], 1 }

</bundles_post_ra>
